<compile_context>
chip_gen: v5e
topology: v5e:2x2
jax: 0.10.0
libtpu: 0.0.40
codegen_flags: <defaults>
</compile_context>

<pallas_src>
import numpy as np
import jax
import jax.numpy as jnp
from jax.experimental import pallas as pl
from jax.experimental.pallas import tpu as pltpu


def _round_up(x, m):
    return ((x + m - 1) // m) * m


# ------------------------------ Fused decoder kernel ------------------------------
def _make_decoder_kernel(num_layers, T, B, H_pad):
    """Builds a kernel closure for a fixed (static) num_layers / T / padded-B / padded-H."""
    H4 = 4 * H_pad

    def kernel(*refs):
        # inputs: x, (w_ih, w_hh, bias) * num_layers, lin_w, lin_b
        x_ref = refs[0]
        layer_refs = refs[1:1 + 3 * num_layers]
        linw_ref = refs[1 + 3 * num_layers]          # [H_pad, V_pad]
        linb_ref = refs[2 + 3 * num_layers]          # [1, V_pad]
        out_ref = refs[3 + 3 * num_layers]           # [T*B, V_pad]
        proj_scr = refs[4 + 3 * num_layers]          # [T*B, 4*H_pad]
        seq_bufs = (refs[5 + 3 * num_layers],        # [T*B, H_pad]  (ping)
                    refs[6 + 3 * num_layers])        # [T*B, H_pad]  (pong)

        for l in range(num_layers):
            wih_ref = layer_refs[3 * l + 0]          # [E_in, 4*H_pad]
            whh_ref = layer_refs[3 * l + 1]          # [H_pad, 4*H_pad]
            b_ref = layer_refs[3 * l + 2]            # [1, 4*H_pad]

            # Batched input projection over all timesteps (bias folded in once).
            if l == 0:
                inp = x_ref[...]                     # [T*B, E]
            else:
                inp = seq_bufs[(l - 1) % 2][...]     # [T*B, H_pad]
            proj_scr[...] = (jnp.dot(inp, wih_ref[...],
                                     preferred_element_type=jnp.float32)
                             + b_ref[...])

            # Recurrence: only h @ W_hh remains inside the (fully unrolled) time loop.
            h = jnp.zeros((B, H_pad), jnp.float32)
            c = jnp.zeros((B, H_pad), jnp.float32)
            dst = seq_bufs[l % 2]
            for t in range(T):
                row = t * B
                g = proj_scr[pl.ds(row, B)] + jnp.dot(
                    h, whh_ref[...], preferred_element_type=jnp.float32)   # [B, 4*H_pad]
                i_g = jax.nn.sigmoid(g[:, 0 * H_pad:1 * H_pad])
                f_g = jax.nn.sigmoid(g[:, 1 * H_pad:2 * H_pad])
                g_g = jnp.tanh(g[:, 2 * H_pad:3 * H_pad])
                o_g = jax.nn.sigmoid(g[:, 3 * H_pad:4 * H_pad])
                c = f_g * c + i_g * g_g
                h = o_g * jnp.tanh(c)
                dst[pl.ds(row, B)] = h

        # Linear head on the dense [T*B, H_pad] matrix (lane-dense V_pad output).
        h_all = seq_bufs[(num_layers - 1) % 2][...]
        out_ref[...] = (jnp.dot(h_all, linw_ref[...],
                                preferred_element_type=jnp.float32)
                        + linb_ref[...])

    return kernel


# --------------------------- Weight preparation (wrapper) ---------------------------
def _pad_gate_blocks(w, H, H_pad):
    """w: [4H, ...] PyTorch gate-stacked (i,f,g,o) -> [4*H_pad, ...], gate k at k*H_pad."""
    blocks = jnp.split(w, 4, axis=0)
    pad = [(0, H_pad - H)] + [(0, 0)] * (w.ndim - 1)
    return jnp.concatenate([jnp.pad(b, pad) for b in blocks], axis=0)


def prepare_decoder_params(params, H_pad, V_pad):
    """Pad gate blocks to H_pad, pad vocab to V_pad, pre-transpose for [in, 4H]/[H, V] matmuls."""
    H = params["lstm"][0]["w_hh"].shape[1]
    args = []
    for l, layer in enumerate(params["lstm"]):
        wih = _pad_gate_blocks(layer["w_ih"], H, H_pad)          # [4*H_pad, E_in]
        if l > 0:
            wih = jnp.pad(wih, ((0, 0), (0, H_pad - H)))         # input cols H -> H_pad
        whh = _pad_gate_blocks(layer["w_hh"], H, H_pad)          # [4*H_pad, H]
        whh = jnp.pad(whh, ((0, 0), (0, H_pad - H)))             # [4*H_pad, H_pad]
        bias = _pad_gate_blocks(layer["b_ih"] + layer["b_hh"], H, H_pad)  # [4*H_pad]
        args += [jnp.asarray(wih.T, jnp.float32),                # [E_in, 4*H_pad]
                 jnp.asarray(whh.T, jnp.float32),                # [H_pad, 4*H_pad]
                 bias.reshape(1, 4 * H_pad).astype(jnp.float32)]
    V = params["linear_w"].shape[0]
    linw = jnp.pad(params["linear_w"], ((0, V_pad - V), (0, H_pad - H)))  # [V_pad, H_pad]
    linb = jnp.pad(params["linear_b"], (0, V_pad - V))
    args += [jnp.asarray(linw.T, jnp.float32),                   # [H_pad, V_pad]
             linb.reshape(1, V_pad).astype(jnp.float32)]
    return args


# ------------------------------- Decoder forward -------------------------------
def decoder_forward(params, features, captions, lengths):
    """features: [B, E], captions: [B, Tcap] int32, lengths: static python list, sorted descending."""
    lengths = list(int(x) for x in lengths)
    assert all(lengths[i] >= lengths[i + 1] for i in range(len(lengths) - 1)), \
        "lengths must be sorted descending (pack_padded_sequence enforce_sorted=True semantics)"
    B, T_cap = captions.shape
    T = T_cap + 1
    assert max(lengths) <= T and len(lengths) == B

    H = params["lstm"][0]["w_hh"].shape[1]
    V = params["linear_w"].shape[0]
    num_layers = len(params["lstm"])
    H_pad = _round_up(H, 128)
    V_pad = _round_up(V, 128)
    B_pad = _round_up(B, 8)

    # TODO(synk): embedding lookup (row gather) stays in plain JAX; at this size an in-kernel
    #             scalar-prefetch/pl.Element gather is not worth a pallas_call of its own.
    emb = jnp.take(params["embed"], captions, axis=0)                  # [B, Tcap, E]
    x = jnp.concatenate([features[:, None, :].astype(emb.dtype), emb], axis=1)   # [B, T, E]
    x = jnp.transpose(x, (1, 0, 2)).astype(jnp.float32)                # [T, B, E] time-major
    if B_pad != B:
        x = jnp.pad(x, ((0, 0), (0, B_pad - B), (0, 0)))
    x2d = x.reshape(T * B_pad, x.shape[-1])                            # [T*B_pad, E]

    weight_args = prepare_decoder_params(params, H_pad, V_pad)

    out = pl.pallas_call(
        _make_decoder_kernel(num_layers, T, B_pad, H_pad),
        out_shape=jax.ShapeDtypeStruct((T * B_pad, V_pad), jnp.float32),
        scratch_shapes=[
            pltpu.VMEM((T * B_pad, 4 * H_pad), jnp.float32),   # batched input projections
            pltpu.VMEM((T * B_pad, H_pad), jnp.float32),       # layer-output sequence (ping)
            pltpu.VMEM((T * B_pad, H_pad), jnp.float32),       # layer-output sequence (pong)
        ],
    )(x2d, *weight_args)

    # pack_padded_sequence ordering: timestep-major over valid batch entries (lengths desc).
    lengths_np = np.asarray(lengths)
    idx_t, idx_b = [], []
    for t in range(T):
        n_valid = int((lengths_np > t).sum())
        idx_t.extend([t] * n_valid)
        idx_b.extend(range(n_valid))
    flat_idx = np.asarray(idx_t) * B_pad + np.asarray(idx_b)
    return out[flat_idx, :V]                                           # [sum(lengths), V]


# ------------------------------- Pure-JAX reference ----------------------------
def _lstm_ref(x_tbe, w_ih, w_hh, b_ih, b_hh):
    _, B, _ = x_tbe.shape
    H = w_hh.shape[1]

    def step(carry, x):
        h, c = carry
        gates = x @ w_ih.T + h @ w_hh.T + b_ih + b_hh
        i, f, g, o = jnp.split(gates, 4, axis=-1)
        c = jax.nn.sigmoid(f) * c + jax.nn.sigmoid(i) * jnp.tanh(g)
        h = jax.nn.sigmoid(o) * jnp.tanh(c)
        return (h, c), h

    init = (jnp.zeros((B, H), jnp.float32), jnp.zeros((B, H), jnp.float32))
    _, hs = jax.lax.scan(step, init, x_tbe)
    return hs


def decoder_forward_ref(params, features, captions, lengths):
    emb = jnp.take(params["embed"], captions, axis=0)
    x = jnp.concatenate([features[:, None, :], emb], axis=1)
    x = jnp.transpose(x, (1, 0, 2)).astype(jnp.float32)
    for layer in params["lstm"]:
        x = _lstm_ref(x, layer["w_ih"], layer["w_hh"], layer["b_ih"], layer["b_hh"])
    T, B, _ = x.shape
    lengths_np = np.asarray(lengths)
    idx = [(t, b) for t in range(T) for b in range(B) if lengths_np[b] > t]
    idx_t = np.array([i[0] for i in idx])
    idx_b = np.array([i[1] for i in idx])
    packed_h = x[idx_t, idx_b]
    return packed_h @ params["linear_w"].T + params["linear_b"]


# ------------------------------------ Main -------------------------------------
if __name__ == "__main__":
    embed_size, hidden_size, vocab_size, num_layers = 32, 64, 40, 2
    B, T_cap = 4, 7
    T = T_cap + 1                                   # features step + caption steps
    lengths = [8, 6, 5, 3]                          # sorted descending, each <= T

    key = jax.random.PRNGKey(0)
    keys = jax.random.split(key, 4 + 4 * num_layers)

    params = {
        "embed": 0.1 * jax.random.normal(keys[0], (vocab_size, embed_size), jnp.float32),
        "linear_w": 0.1 * jax.random.normal(keys[1], (vocab_size, hidden_size), jnp.float32),
        "linear_b": 0.1 * jax.random.normal(keys[2], (vocab_size,), jnp.float32),
        "lstm": [],
    }
    for l in range(num_layers):
        in_size = embed_size if l == 0 else hidden_size
        k0, k1, k2, k3 = keys[4 + 4 * l: 8 + 4 * l]
        params["lstm"].append({
            "w_ih": 0.1 * jax.random.normal(k0, (4 * hidden_size, in_size), jnp.float32),
            "w_hh": 0.1 * jax.random.normal(k1, (4 * hidden_size, hidden_size), jnp.float32),
            "b_ih": 0.1 * jax.random.normal(k2, (4 * hidden_size,), jnp.float32),
            "b_hh": 0.1 * jax.random.normal(k3, (4 * hidden_size,), jnp.float32),
        })

    features = jax.random.normal(keys[3], (B, embed_size), jnp.float32)
    captions = jax.random.randint(jax.random.PRNGKey(123), (B, T_cap), 0, vocab_size)

    out = decoder_forward(params, features, captions, lengths)
    out = jax.block_until_ready(out)
    assert out.shape == (sum(lengths), vocab_size), out.shape

    ref = jax.block_until_ready(decoder_forward_ref(params, features, captions, lengths))
    np.testing.assert_allclose(np.asarray(out), np.asarray(ref), rtol=1e-4, atol=1e-5)

    print("KERNEL_OK")
</pallas_src>

<mosaic_0001>
module attributes {stable_mosaic.version = 11 : i64} {
  func.func @kernel(%arg0: memref<64x32xf32, #tpu.memory_space<vmem>>, %arg1: memref<32x512xf32, #tpu.memory_space<vmem>>, %arg2: memref<128x512xf32, #tpu.memory_space<vmem>>, %arg3: memref<1x512xf32, #tpu.memory_space<vmem>>, %arg4: memref<128x512xf32, #tpu.memory_space<vmem>>, %arg5: memref<128x512xf32, #tpu.memory_space<vmem>>, %arg6: memref<1x512xf32, #tpu.memory_space<vmem>>, %arg7: memref<128x128xf32, #tpu.memory_space<vmem>>, %arg8: memref<1x128xf32, #tpu.memory_space<vmem>>, %arg9: memref<64x128xf32, #tpu.memory_space<vmem>>, %arg10: memref<64x512xf32, #tpu.memory_space<vmem>>, %arg11: memref<64x128xf32, #tpu.memory_space<vmem>>, %arg12: memref<64x128xf32, #tpu.memory_space<vmem>>) attributes {dimension_semantics = [], scalar_prefetch = 0 : i64, scratch_operands = 3 : i64, tpu.core_type = #tpu.core_type<tc>} {
    %c0 = arith.constant 0 : index
    %c0_0 = arith.constant 0 : index
    %0 = vector.load %arg0[%c0, %c0_0] : memref<64x32xf32, #tpu.memory_space<vmem>>, vector<64x32xf32>
    %c0_1 = arith.constant 0 : index
    %c0_2 = arith.constant 0 : index
    %1 = vector.load %arg1[%c0_1, %c0_2] : memref<32x512xf32, #tpu.memory_space<vmem>>, vector<32x512xf32>
    %cst = arith.constant dense<0.000000e+00> : vector<64x512xf32>
    %2 = tpu.matmul %0, %1, %cst {dimension_numbers = #tpu.dot_dimension_numbers<[1], [0], [0], [1], [0, 0, 1, 1], [], []>} : vector<64x32xf32>, vector<32x512xf32>, vector<64x512xf32> -> vector<64x512xf32>
    %c0_3 = arith.constant 0 : index
    %c0_4 = arith.constant 0 : index
    %3 = vector.load %arg3[%c0_3, %c0_4] : memref<1x512xf32, #tpu.memory_space<vmem>>, vector<1x512xf32>
    %4 = vector.broadcast %3 : vector<1x512xf32> to vector<64x512xf32>
    %5 = arith.addf %2, %4 : vector<64x512xf32>
    %c0_5 = arith.constant 0 : index
    %c0_6 = arith.constant 0 : index
    %6 = vector.load %arg10[%c0_5, %c0_6] : memref<64x512xf32, #tpu.memory_space<vmem>>, vector<64x512xf32>
    tpu.vector_store %arg10[%c0_5, %c0_6], %5 {strides = array<i32>} : memref<64x512xf32, #tpu.memory_space<vmem>>, vector<64x512xf32>,
    %cst_7 = arith.constant 0.000000e+00 : f32
    %7 = vector.broadcast %cst_7 : f32 to vector<8x128xf32>
    %cst_8 = arith.constant 0.000000e+00 : f32
    %8 = vector.broadcast %cst_8 : f32 to vector<8x128xf32>
    %c0_9 = arith.constant 0 : index
    %c0_10 = arith.constant 0 : index
    %9 = vector.load %arg10[%c0_9, %c0_10] : memref<64x512xf32, #tpu.memory_space<vmem>>, vector<8x512xf32>
    %c0_11 = arith.constant 0 : index
    %c0_12 = arith.constant 0 : index
    %10 = vector.load %arg2[%c0_11, %c0_12] : memref<128x512xf32, #tpu.memory_space<vmem>>, vector<128x512xf32>
    %cst_13 = arith.constant dense<0.000000e+00> : vector<8x512xf32>
    %11 = tpu.matmul %7, %10, %cst_13 {dimension_numbers = #tpu.dot_dimension_numbers<[1], [0], [0], [1], [0, 0, 1, 1], [], []>} : vector<8x128xf32>, vector<128x512xf32>, vector<8x512xf32> -> vector<8x512xf32>
    %12 = arith.addf %9, %11 : vector<8x512xf32>
    %13 = vector.extract_strided_slice %12 {offsets = [0, 0], sizes = [8, 128], strides = [1, 1]} : vector<8x512xf32> to vector<8x128xf32>
    %14 = arith.negf %13 : vector<8x128xf32>
    %15 = math.exp %14 : vector<8x128xf32>
    %cst_14 = arith.constant 1.000000e+00 : f32
    %16 = vector.broadcast %cst_14 : f32 to vector<8x128xf32>
    %17 = arith.addf %16, %15 : vector<8x128xf32>
    %18 = arith.divf %16, %17 : vector<8x128xf32>
    %19 = vector.extract_strided_slice %12 {offsets = [0, 128], sizes = [8, 128], strides = [1, 1]} : vector<8x512xf32> to vector<8x128xf32>
    %20 = arith.negf %19 : vector<8x128xf32>
    %21 = math.exp %20 : vector<8x128xf32>
    %cst_15 = arith.constant 1.000000e+00 : f32
    %22 = vector.broadcast %cst_15 : f32 to vector<8x128xf32>
    %23 = arith.addf %22, %21 : vector<8x128xf32>
    %24 = arith.divf %22, %23 : vector<8x128xf32>
    %25 = vector.extract_strided_slice %12 {offsets = [0, 256], sizes = [8, 128], strides = [1, 1]} : vector<8x512xf32> to vector<8x128xf32>
    %26 = math.tanh %25 : vector<8x128xf32>
    %27 = vector.extract_strided_slice %12 {offsets = [0, 384], sizes = [8, 128], strides = [1, 1]} : vector<8x512xf32> to vector<8x128xf32>
    %28 = arith.negf %27 : vector<8x128xf32>
    %29 = math.exp %28 : vector<8x128xf32>
    %cst_16 = arith.constant 1.000000e+00 : f32
    %30 = vector.broadcast %cst_16 : f32 to vector<8x128xf32>
    %31 = arith.addf %30, %29 : vector<8x128xf32>
    %32 = arith.divf %30, %31 : vector<8x128xf32>
    %33 = arith.mulf %24, %8 : vector<8x128xf32>
    %34 = arith.mulf %18, %26 : vector<8x128xf32>
    %35 = arith.addf %33, %34 : vector<8x128xf32>
    %36 = math.tanh %35 : vector<8x128xf32>
    %37 = arith.mulf %32, %36 : vector<8x128xf32>
    %c0_17 = arith.constant 0 : index
    %c0_18 = arith.constant 0 : index
    %38 = vector.load %arg11[%c0_17, %c0_18] : memref<64x128xf32, #tpu.memory_space<vmem>>, vector<8x128xf32>
    tpu.vector_store %arg11[%c0_17, %c0_18], %37 {strides = array<i32>} : memref<64x128xf32, #tpu.memory_space<vmem>>, vector<8x128xf32>,
    %c8 = arith.constant 8 : index
    %c0_19 = arith.constant 0 : index
    %39 = vector.load %arg10[%c8, %c0_19] : memref<64x512xf32, #tpu.memory_space<vmem>>, vector<8x512xf32>
    %c0_20 = arith.constant 0 : index
    %c0_21 = arith.constant 0 : index
    %40 = vector.load %arg2[%c0_20, %c0_21] : memref<128x512xf32, #tpu.memory_space<vmem>>, vector<128x512xf32>
    %cst_22 = arith.constant dense<0.000000e+00> : vector<8x512xf32>
    %41 = tpu.matmul %37, %40, %cst_22 {dimension_numbers = #tpu.dot_dimension_numbers<[1], [0], [0], [1], [0, 0, 1, 1], [], []>} : vector<8x128xf32>, vector<128x512xf32>, vector<8x512xf32> -> vector<8x512xf32>
    %42 = arith.addf %39, %41 : vector<8x512xf32>
    %43 = vector.extract_strided_slice %42 {offsets = [0, 0], sizes = [8, 128], strides = [1, 1]} : vector<8x512xf32> to vector<8x128xf32>
    %44 = arith.negf %43 : vector<8x128xf32>
    %45 = math.exp %44 : vector<8x128xf32>
    %cst_23 = arith.constant 1.000000e+00 : f32
    %46 = vector.broadcast %cst_23 : f32 to vector<8x128xf32>
    %47 = arith.addf %46, %45 : vector<8x128xf32>
    %48 = arith.divf %46, %47 : vector<8x128xf32>
    %49 = vector.extract_strided_slice %42 {offsets = [0, 128], sizes = [8, 128], strides = [1, 1]} : vector<8x512xf32> to vector<8x128xf32>
    %50 = arith.negf %49 : vector<8x128xf32>
    %51 = math.exp %50 : vector<8x128xf32>
    %cst_24 = arith.constant 1.000000e+00 : f32
    %52 = vector.broadcast %cst_24 : f32 to vector<8x128xf32>
    %53 = arith.addf %52, %51 : vector<8x128xf32>
    %54 = arith.divf %52, %53 : vector<8x128xf32>
    %55 = vector.extract_strided_slice %42 {offsets = [0, 256], sizes = [8, 128], strides = [1, 1]} : vector<8x512xf32> to vector<8x128xf32>
    %56 = math.tanh %55 : vector<8x128xf32>
    %57 = vector.extract_strided_slice %42 {offsets = [0, 384], sizes = [8, 128], strides = [1, 1]} : vector<8x512xf32> to vector<8x128xf32>
    %58 = arith.negf %57 : vector<8x128xf32>
    %59 = math.exp %58 : vector<8x128xf32>
    %cst_25 = arith.constant 1.000000e+00 : f32
    %60 = vector.broadcast %cst_25 : f32 to vector<8x128xf32>
    %61 = arith.addf %60, %59 : vector<8x128xf32>
    %62 = arith.divf %60, %61 : vector<8x128xf32>
    %63 = arith.mulf %54, %35 : vector<8x128xf32>
    %64 = arith.mulf %48, %56 : vector<8x128xf32>
    %65 = arith.addf %63, %64 : vector<8x128xf32>
    %66 = math.tanh %65 : vector<8x128xf32>
    %67 = arith.mulf %62, %66 : vector<8x128xf32>
    %c8_26 = arith.constant 8 : index
    %c0_27 = arith.constant 0 : index
    %68 = vector.load %arg11[%c8_26, %c0_27] : memref<64x128xf32, #tpu.memory_space<vmem>>, vector<8x128xf32>
    tpu.vector_store %arg11[%c8_26, %c0_27], %67 {strides = array<i32>} : memref<64x128xf32, #tpu.memory_space<vmem>>, vector<8x128xf32>,
    %c16 = arith.constant 16 : index
    %c0_28 = arith.constant 0 : index
    %69 = vector.load %arg10[%c16, %c0_28] : memref<64x512xf32, #tpu.memory_space<vmem>>, vector<8x512xf32>
    %c0_29 = arith.constant 0 : index
    %c0_30 = arith.constant 0 : index
    %70 = vector.load %arg2[%c0_29, %c0_30] : memref<128x512xf32, #tpu.memory_space<vmem>>, vector<128x512xf32>
    %cst_31 = arith.constant dense<0.000000e+00> : vector<8x512xf32>
    %71 = tpu.matmul %67, %70, %cst_31 {dimension_numbers = #tpu.dot_dimension_numbers<[1], [0], [0], [1], [0, 0, 1, 1], [], []>} : vector<8x128xf32>, vector<128x512xf32>, vector<8x512xf32> -> vector<8x512xf32>
    %72 = arith.addf %69, %71 : vector<8x512xf32>
    %73 = vector.extract_strided_slice %72 {offsets = [0, 0], sizes = [8, 128], strides = [1, 1]} : vector<8x512xf32> to vector<8x128xf32>
    %74 = arith.negf %73 : vector<8x128xf32>
    %75 = math.exp %74 : vector<8x128xf32>
    %cst_32 = arith.constant 1.000000e+00 : f32
    %76 = vector.broadcast %cst_32 : f32 to vector<8x128xf32>
    %77 = arith.addf %76, %75 : vector<8x128xf32>
    %78 = arith.divf %76, %77 : vector<8x128xf32>
    %79 = vector.extract_strided_slice %72 {offsets = [0, 128], sizes = [8, 128], strides = [1, 1]} : vector<8x512xf32> to vector<8x128xf32>
    %80 = arith.negf %79 : vector<8x128xf32>
    %81 = math.exp %80 : vector<8x128xf32>
    %cst_33 = arith.constant 1.000000e+00 : f32
    %82 = vector.broadcast %cst_33 : f32 to vector<8x128xf32>
    %83 = arith.addf %82, %81 : vector<8x128xf32>
    %84 = arith.divf %82, %83 : vector<8x128xf32>
    %85 = vector.extract_strided_slice %72 {offsets = [0, 256], sizes = [8, 128], strides = [1, 1]} : vector<8x512xf32> to vector<8x128xf32>
    %86 = math.tanh %85 : vector<8x128xf32>
    %87 = vector.extract_strided_slice %72 {offsets = [0, 384], sizes = [8, 128], strides = [1, 1]} : vector<8x512xf32> to vector<8x128xf32>
    %88 = arith.negf %87 : vector<8x128xf32>
    %89 = math.exp %88 : vector<8x128xf32>
    %cst_34 = arith.constant 1.000000e+00 : f32
    %90 = vector.broadcast %cst_34 : f32 to vector<8x128xf32>
    %91 = arith.addf %90, %89 : vector<8x128xf32>
    %92 = arith.divf %90, %91 : vector<8x128xf32>
    %93 = arith.mulf %84, %65 : vector<8x128xf32>
    %94 = arith.mulf %78, %86 : vector<8x128xf32>
    %95 = arith.addf %93, %94 : vector<8x128xf32>
    %96 = math.tanh %95 : vector<8x128xf32>
    %97 = arith.mulf %92, %96 : vector<8x128xf32>
    %c16_35 = arith.constant 16 : index
    %c0_36 = arith.constant 0 : index
    %98 = vector.load %arg11[%c16_35, %c0_36] : memref<64x128xf32, #tpu.memory_space<vmem>>, vector<8x128xf32>
    tpu.vector_store %arg11[%c16_35, %c0_36], %97 {strides = array<i32>} : memref<64x128xf32, #tpu.memory_space<vmem>>, vector<8x128xf32>,
    %c24 = arith.constant 24 : index
    %c0_37 = arith.constant 0 : index
    %99 = vector.load %arg10[%c24, %c0_37] : memref<64x512xf32, #tpu.memory_space<vmem>>, vector<8x512xf32>
    %c0_38 = arith.constant 0 : index
    %c0_39 = arith.constant 0 : index
    %100 = vector.load %arg2[%c0_38, %c0_39] : memref<128x512xf32, #tpu.memory_space<vmem>>, vector<128x512xf32>
    %cst_40 = arith.constant dense<0.000000e+00> : vector<8x512xf32>
    %101 = tpu.matmul %97, %100, %cst_40 {dimension_numbers = #tpu.dot_dimension_numbers<[1], [0], [0], [1], [0, 0, 1, 1], [], []>} : vector<8x128xf32>, vector<128x512xf32>, vector<8x512xf32> -> vector<8x512xf32>
    %102 = arith.addf %99, %101 : vector<8x512xf32>
    %103 = vector.extract_strided_slice %102 {offsets = [0, 0], sizes = [8, 128], strides = [1, 1]} : vector<8x512xf32> to vector<8x128xf32>
    %104 = arith.negf %103 : vector<8x128xf32>
    %105 = math.exp %104 : vector<8x128xf32>
    %cst_41 = arith.constant 1.000000e+00 : f32
    %106 = vector.broadcast %cst_41 : f32 to vector<8x128xf32>
    %107 = arith.addf %106, %105 : vector<8x128xf32>
    %108 = arith.divf %106, %107 : vector<8x128xf32>
    %109 = vector.extract_strided_slice %102 {offsets = [0, 128], sizes = [8, 128], strides = [1, 1]} : vector<8x512xf32> to vector<8x128xf32>
    %110 = arith.negf %109 : vector<8x128xf32>
    %111 = math.exp %110 : vector<8x128xf32>
    %cst_42 = arith.constant 1.000000e+00 : f32
    %112 = vector.broadcast %cst_42 : f32 to vector<8x128xf32>
    %113 = arith.addf %112, %111 : vector<8x128xf32>
    %114 = arith.divf %112, %113 : vector<8x128xf32>
    %115 = vector.extract_strided_slice %102 {offsets = [0, 256], sizes = [8, 128], strides = [1, 1]} : vector<8x512xf32> to vector<8x128xf32>
    %116 = math.tanh %115 : vector<8x128xf32>
    %117 = vector.extract_strided_slice %102 {offsets = [0, 384], sizes = [8, 128], strides = [1, 1]} : vector<8x512xf32> to vector<8x128xf32>
    %118 = arith.negf %117 : vector<8x128xf32>
    %119 = math.exp %118 : vector<8x128xf32>
    %cst_43 = arith.constant 1.000000e+00 : f32
    %120 = vector.broadcast %cst_43 : f32 to vector<8x128xf32>
    %121 = arith.addf %120, %119 : vector<8x128xf32>
    %122 = arith.divf %120, %121 : vector<8x128xf32>
    %123 = arith.mulf %114, %95 : vector<8x128xf32>
    %124 = arith.mulf %108, %116 : vector<8x128xf32>
    %125 = arith.addf %123, %124 : vector<8x128xf32>
    %126 = math.tanh %125 : vector<8x128xf32>
    %127 = arith.mulf %122, %126 : vector<8x128xf32>
    %c24_44 = arith.constant 24 : index
    %c0_45 = arith.constant 0 : index
    %128 = vector.load %arg11[%c24_44, %c0_45] : memref<64x128xf32, #tpu.memory_space<vmem>>, vector<8x128xf32>
    tpu.vector_store %arg11[%c24_44, %c0_45], %127 {strides = array<i32>} : memref<64x128xf32, #tpu.memory_space<vmem>>, vector<8x128xf32>,
    %c32 = arith.constant 32 : index
    %c0_46 = arith.constant 0 : index
    %129 = vector.load %arg10[%c32, %c0_46] : memref<64x512xf32, #tpu.memory_space<vmem>>, vector<8x512xf32>
    %c0_47 = arith.constant 0 : index
    %c0_48 = arith.constant 0 : index
    %130 = vector.load %arg2[%c0_47, %c0_48] : memref<128x512xf32, #tpu.memory_space<vmem>>, vector<128x512xf32>
    %cst_49 = arith.constant dense<0.000000e+00> : vector<8x512xf32>
    %131 = tpu.matmul %127, %130, %cst_49 {dimension_numbers = #tpu.dot_dimension_numbers<[1], [0], [0], [1], [0, 0, 1, 1], [], []>} : vector<8x128xf32>, vector<128x512xf32>, vector<8x512xf32> -> vector<8x512xf32>
    %132 = arith.addf %129, %131 : vector<8x512xf32>
    %133 = vector.extract_strided_slice %132 {offsets = [0, 0], sizes = [8, 128], strides = [1, 1]} : vector<8x512xf32> to vector<8x128xf32>
    %134 = arith.negf %133 : vector<8x128xf32>
    %135 = math.exp %134 : vector<8x128xf32>
    %cst_50 = arith.constant 1.000000e+00 : f32
    %136 = vector.broadcast %cst_50 : f32 to vector<8x128xf32>
    %137 = arith.addf %136, %135 : vector<8x128xf32>
    %138 = arith.divf %136, %137 : vector<8x128xf32>
    %139 = vector.extract_strided_slice %132 {offsets = [0, 128], sizes = [8, 128], strides = [1, 1]} : vector<8x512xf32> to vector<8x128xf32>
    %140 = arith.negf %139 : vector<8x128xf32>
    %141 = math.exp %140 : vector<8x128xf32>
    %cst_51 = arith.constant 1.000000e+00 : f32
    %142 = vector.broadcast %cst_51 : f32 to vector<8x128xf32>
    %143 = arith.addf %142, %141 : vector<8x128xf32>
    %144 = arith.divf %142, %143 : vector<8x128xf32>
    %145 = vector.extract_strided_slice %132 {offsets = [0, 256], sizes = [8, 128], strides = [1, 1]} : vector<8x512xf32> to vector<8x128xf32>
    %146 = math.tanh %145 : vector<8x128xf32>
    %147 = vector.extract_strided_slice %132 {offsets = [0, 384], sizes = [8, 128], strides = [1, 1]} : vector<8x512xf32> to vector<8x128xf32>
    %148 = arith.negf %147 : vector<8x128xf32>
    %149 = math.exp %148 : vector<8x128xf32>
    %cst_52 = arith.constant 1.000000e+00 : f32
    %150 = vector.broadcast %cst_52 : f32 to vector<8x128xf32>
    %151 = arith.addf %150, %149 : vector<8x128xf32>
    %152 = arith.divf %150, %151 : vector<8x128xf32>
    %153 = arith.mulf %144, %125 : vector<8x128xf32>
    %154 = arith.mulf %138, %146 : vector<8x128xf32>
    %155 = arith.addf %153, %154 : vector<8x128xf32>
    %156 = math.tanh %155 : vector<8x128xf32>
    %157 = arith.mulf %152, %156 : vector<8x128xf32>
    %c32_53 = arith.constant 32 : index
    %c0_54 = arith.constant 0 : index
    %158 = vector.load %arg11[%c32_53, %c0_54] : memref<64x128xf32, #tpu.memory_space<vmem>>, vector<8x128xf32>
    tpu.vector_store %arg11[%c32_53, %c0_54], %157 {strides = array<i32>} : memref<64x128xf32, #tpu.memory_space<vmem>>, vector<8x128xf32>,
    %c40 = arith.constant 40 : index
    %c0_55 = arith.constant 0 : index
    %159 = vector.load %arg10[%c40, %c0_55] : memref<64x512xf32, #tpu.memory_space<vmem>>, vector<8x512xf32>
    %c0_56 = arith.constant 0 : index
    %c0_57 = arith.constant 0 : index
    %160 = vector.load %arg2[%c0_56, %c0_57] : memref<128x512xf32, #tpu.memory_space<vmem>>, vector<128x512xf32>
    %cst_58 = arith.constant dense<0.000000e+00> : vector<8x512xf32>
    %161 = tpu.matmul %157, %160, %cst_58 {dimension_numbers = #tpu.dot_dimension_numbers<[1], [0], [0], [1], [0, 0, 1, 1], [], []>} : vector<8x128xf32>, vector<128x512xf32>, vector<8x512xf32> -> vector<8x512xf32>
    %162 = arith.addf %159, %161 : vector<8x512xf32>
    %163 = vector.extract_strided_slice %162 {offsets = [0, 0], sizes = [8, 128], strides = [1, 1]} : vector<8x512xf32> to vector<8x128xf32>
    %164 = arith.negf %163 : vector<8x128xf32>
    %165 = math.exp %164 : vector<8x128xf32>
    %cst_59 = arith.constant 1.000000e+00 : f32
    %166 = vector.broadcast %cst_59 : f32 to vector<8x128xf32>
    %167 = arith.addf %166, %165 : vector<8x128xf32>
    %168 = arith.divf %166, %167 : vector<8x128xf32>
    %169 = vector.extract_strided_slice %162 {offsets = [0, 128], sizes = [8, 128], strides = [1, 1]} : vector<8x512xf32> to vector<8x128xf32>
    %170 = arith.negf %169 : vector<8x128xf32>
    %171 = math.exp %170 : vector<8x128xf32>
    %cst_60 = arith.constant 1.000000e+00 : f32
    %172 = vector.broadcast %cst_60 : f32 to vector<8x128xf32>
    %173 = arith.addf %172, %171 : vector<8x128xf32>
    %174 = arith.divf %172, %173 : vector<8x128xf32>
    %175 = vector.extract_strided_slice %162 {offsets = [0, 256], sizes = [8, 128], strides = [1, 1]} : vector<8x512xf32> to vector<8x128xf32>
    %176 = math.tanh %175 : vector<8x128xf32>
    %177 = vector.extract_strided_slice %162 {offsets = [0, 384], sizes = [8, 128], strides = [1, 1]} : vector<8x512xf32> to vector<8x128xf32>
    %178 = arith.negf %177 : vector<8x128xf32>
    %179 = math.exp %178 : vector<8x128xf32>
    %cst_61 = arith.constant 1.000000e+00 : f32
    %180 = vector.broadcast %cst_61 : f32 to vector<8x128xf32>
    %181 = arith.addf %180, %179 : vector<8x128xf32>
    %182 = arith.divf %180, %181 : vector<8x128xf32>
    %183 = arith.mulf %174, %155 : vector<8x128xf32>
    %184 = arith.mulf %168, %176 : vector<8x128xf32>
    %185 = arith.addf %183, %184 : vector<8x128xf32>
    %186 = math.tanh %185 : vector<8x128xf32>
    %187 = arith.mulf %182, %186 : vector<8x128xf32>
    %c40_62 = arith.constant 40 : index
    %c0_63 = arith.constant 0 : index
    %188 = vector.load %arg11[%c40_62, %c0_63] : memref<64x128xf32, #tpu.memory_space<vmem>>, vector<8x128xf32>
    tpu.vector_store %arg11[%c40_62, %c0_63], %187 {strides = array<i32>} : memref<64x128xf32, #tpu.memory_space<vmem>>, vector<8x128xf32>,
    %c48 = arith.constant 48 : index
    %c0_64 = arith.constant 0 : index
    %189 = vector.load %arg10[%c48, %c0_64] : memref<64x512xf32, #tpu.memory_space<vmem>>, vector<8x512xf32>
    %c0_65 = arith.constant 0 : index
    %c0_66 = arith.constant 0 : index
    %190 = vector.load %arg2[%c0_65, %c0_66] : memref<128x512xf32, #tpu.memory_space<vmem>>, vector<128x512xf32>
    %cst_67 = arith.constant dense<0.000000e+00> : vector<8x512xf32>
    %191 = tpu.matmul %187, %190, %cst_67 {dimension_numbers = #tpu.dot_dimension_numbers<[1], [0], [0], [1], [0, 0, 1, 1], [], []>} : vector<8x128xf32>, vector<128x512xf32>, vector<8x512xf32> -> vector<8x512xf32>
    %192 = arith.addf %189, %191 : vector<8x512xf32>
    %193 = vector.extract_strided_slice %192 {offsets = [0, 0], sizes = [8, 128], strides = [1, 1]} : vector<8x512xf32> to vector<8x128xf32>
    %194 = arith.negf %193 : vector<8x128xf32>
    %195 = math.exp %194 : vector<8x128xf32>
    %cst_68 = arith.constant 1.000000e+00 : f32
    %196 = vector.broadcast %cst_68 : f32 to vector<8x128xf32>
    %197 = arith.addf %196, %195 : vector<8x128xf32>
    %198 = arith.divf %196, %197 : vector<8x128xf32>
    %199 = vector.extract_strided_slice %192 {offsets = [0, 128], sizes = [8, 128], strides = [1, 1]} : vector<8x512xf32> to vector<8x128xf32>
    %200 = arith.negf %199 : vector<8x128xf32>
    %201 = math.exp %200 : vector<8x128xf32>
    %cst_69 = arith.constant 1.000000e+00 : f32
    %202 = vector.broadcast %cst_69 : f32 to vector<8x128xf32>
    %203 = arith.addf %202, %201 : vector<8x128xf32>
    %204 = arith.divf %202, %203 : vector<8x128xf32>
    %205 = vector.extract_strided_slice %192 {offsets = [0, 256], sizes = [8, 128], strides = [1, 1]} : vector<8x512xf32> to vector<8x128xf32>
    %206 = math.tanh %205 : vector<8x128xf32>
    %207 = vector.extract_strided_slice %192 {offsets = [0, 384], sizes = [8, 128], strides = [1, 1]} : vector<8x512xf32> to vector<8x128xf32>
    %208 = arith.negf %207 : vector<8x128xf32>
    %209 = math.exp %208 : vector<8x128xf32>
    %cst_70 = arith.constant 1.000000e+00 : f32
    %210 = vector.broadcast %cst_70 : f32 to vector<8x128xf32>
    %211 = arith.addf %210, %209 : vector<8x128xf32>
    %212 = arith.divf %210, %211 : vector<8x128xf32>
    %213 = arith.mulf %204, %185 : vector<8x128xf32>
    %214 = arith.mulf %198, %206 : vector<8x128xf32>
    %215 = arith.addf %213, %214 : vector<8x128xf32>
    %216 = math.tanh %215 : vector<8x128xf32>
    %217 = arith.mulf %212, %216 : vector<8x128xf32>
    %c48_71 = arith.constant 48 : index
    %c0_72 = arith.constant 0 : index
    %218 = vector.load %arg11[%c48_71, %c0_72] : memref<64x128xf32, #tpu.memory_space<vmem>>, vector<8x128xf32>
    tpu.vector_store %arg11[%c48_71, %c0_72], %217 {strides = array<i32>} : memref<64x128xf32, #tpu.memory_space<vmem>>, vector<8x128xf32>,
    %c56 = arith.constant 56 : index
    %c0_73 = arith.constant 0 : index
    %219 = vector.load %arg10[%c56, %c0_73] : memref<64x512xf32, #tpu.memory_space<vmem>>, vector<8x512xf32>
    %c0_74 = arith.constant 0 : index
    %c0_75 = arith.constant 0 : index
    %220 = vector.load %arg2[%c0_74, %c0_75] : memref<128x512xf32, #tpu.memory_space<vmem>>, vector<128x512xf32>
    %cst_76 = arith.constant dense<0.000000e+00> : vector<8x512xf32>
    %221 = tpu.matmul %217, %220, %cst_76 {dimension_numbers = #tpu.dot_dimension_numbers<[1], [0], [0], [1], [0, 0, 1, 1], [], []>} : vector<8x128xf32>, vector<128x512xf32>, vector<8x512xf32> -> vector<8x512xf32>
    %222 = arith.addf %219, %221 : vector<8x512xf32>
    %223 = vector.extract_strided_slice %222 {offsets = [0, 0], sizes = [8, 128], strides = [1, 1]} : vector<8x512xf32> to vector<8x128xf32>
    %224 = arith.negf %223 : vector<8x128xf32>
    %225 = math.exp %224 : vector<8x128xf32>
    %cst_77 = arith.constant 1.000000e+00 : f32
    %226 = vector.broadcast %cst_77 : f32 to vector<8x128xf32>
    %227 = arith.addf %226, %225 : vector<8x128xf32>
    %228 = arith.divf %226, %227 : vector<8x128xf32>
    %229 = vector.extract_strided_slice %222 {offsets = [0, 128], sizes = [8, 128], strides = [1, 1]} : vector<8x512xf32> to vector<8x128xf32>
    %230 = arith.negf %229 : vector<8x128xf32>
    %231 = math.exp %230 : vector<8x128xf32>
    %cst_78 = arith.constant 1.000000e+00 : f32
    %232 = vector.broadcast %cst_78 : f32 to vector<8x128xf32>
    %233 = arith.addf %232, %231 : vector<8x128xf32>
    %234 = arith.divf %232, %233 : vector<8x128xf32>
    %235 = vector.extract_strided_slice %222 {offsets = [0, 256], sizes = [8, 128], strides = [1, 1]} : vector<8x512xf32> to vector<8x128xf32>
    %236 = math.tanh %235 : vector<8x128xf32>
    %237 = vector.extract_strided_slice %222 {offsets = [0, 384], sizes = [8, 128], strides = [1, 1]} : vector<8x512xf32> to vector<8x128xf32>
    %238 = arith.negf %237 : vector<8x128xf32>
    %239 = math.exp %238 : vector<8x128xf32>
    %cst_79 = arith.constant 1.000000e+00 : f32
    %240 = vector.broadcast %cst_79 : f32 to vector<8x128xf32>
    %241 = arith.addf %240, %239 : vector<8x128xf32>
    %242 = arith.divf %240, %241 : vector<8x128xf32>
    %243 = arith.mulf %234, %215 : vector<8x128xf32>
    %244 = arith.mulf %228, %236 : vector<8x128xf32>
    %245 = arith.addf %243, %244 : vector<8x128xf32>
    %246 = math.tanh %245 : vector<8x128xf32>
    %247 = arith.mulf %242, %246 : vector<8x128xf32>
    %c56_80 = arith.constant 56 : index
    %c0_81 = arith.constant 0 : index
    %248 = vector.load %arg11[%c56_80, %c0_81] : memref<64x128xf32, #tpu.memory_space<vmem>>, vector<8x128xf32>
    tpu.vector_store %arg11[%c56_80, %c0_81], %247 {strides = array<i32>} : memref<64x128xf32, #tpu.memory_space<vmem>>, vector<8x128xf32>,
    %c0_82 = arith.constant 0 : index
    %c0_83 = arith.constant 0 : index
    %249 = vector.load %arg11[%c0_82, %c0_83] : memref<64x128xf32, #tpu.memory_space<vmem>>, vector<64x128xf32>
    %c0_84 = arith.constant 0 : index
    %c0_85 = arith.constant 0 : index
    %250 = vector.load %arg4[%c0_84, %c0_85] : memref<128x512xf32, #tpu.memory_space<vmem>>, vector<128x512xf32>
    %cst_86 = arith.constant dense<0.000000e+00> : vector<64x512xf32>
    %251 = tpu.matmul %249, %250, %cst_86 {dimension_numbers = #tpu.dot_dimension_numbers<[1], [0], [0], [1], [0, 0, 1, 1], [], []>} : vector<64x128xf32>, vector<128x512xf32>, vector<64x512xf32> -> vector<64x512xf32>
    %c0_87 = arith.constant 0 : index
    %c0_88 = arith.constant 0 : index
    %252 = vector.load %arg6[%c0_87, %c0_88] : memref<1x512xf32, #tpu.memory_space<vmem>>, vector<1x512xf32>
    %253 = vector.broadcast %252 : vector<1x512xf32> to vector<64x512xf32>
    %254 = arith.addf %251, %253 : vector<64x512xf32>
    %c0_89 = arith.constant 0 : index
    %c0_90 = arith.constant 0 : index
    %255 = vector.load %arg10[%c0_89, %c0_90] : memref<64x512xf32, #tpu.memory_space<vmem>>, vector<64x512xf32>
    tpu.vector_store %arg10[%c0_89, %c0_90], %254 {strides = array<i32>} : memref<64x512xf32, #tpu.memory_space<vmem>>, vector<64x512xf32>,
    %cst_91 = arith.constant 0.000000e+00 : f32
    %256 = vector.broadcast %cst_91 : f32 to vector<8x128xf32>
    %cst_92 = arith.constant 0.000000e+00 : f32
    %257 = vector.broadcast %cst_92 : f32 to vector<8x128xf32>
    %c0_93 = arith.constant 0 : index
    %c0_94 = arith.constant 0 : index
    %258 = vector.load %arg10[%c0_93, %c0_94] : memref<64x512xf32, #tpu.memory_space<vmem>>, vector<8x512xf32>
    %c0_95 = arith.constant 0 : index
    %c0_96 = arith.constant 0 : index
    %259 = vector.load %arg5[%c0_95, %c0_96] : memref<128x512xf32, #tpu.memory_space<vmem>>, vector<128x512xf32>
    %cst_97 = arith.constant dense<0.000000e+00> : vector<8x512xf32>
    %260 = tpu.matmul %256, %259, %cst_97 {dimension_numbers = #tpu.dot_dimension_numbers<[1], [0], [0], [1], [0, 0, 1, 1], [], []>} : vector<8x128xf32>, vector<128x512xf32>, vector<8x512xf32> -> vector<8x512xf32>
    %261 = arith.addf %258, %260 : vector<8x512xf32>
    %262 = vector.extract_strided_slice %261 {offsets = [0, 0], sizes = [8, 128], strides = [1, 1]} : vector<8x512xf32> to vector<8x128xf32>
    %263 = arith.negf %262 : vector<8x128xf32>
    %264 = math.exp %263 : vector<8x128xf32>
    %cst_98 = arith.constant 1.000000e+00 : f32
    %265 = vector.broadcast %cst_98 : f32 to vector<8x128xf32>
    %266 = arith.addf %265, %264 : vector<8x128xf32>
    %267 = arith.divf %265, %266 : vector<8x128xf32>
    %268 = vector.extract_strided_slice %261 {offsets = [0, 128], sizes = [8, 128], strides = [1, 1]} : vector<8x512xf32> to vector<8x128xf32>
    %269 = arith.negf %268 : vector<8x128xf32>
    %270 = math.exp %269 : vector<8x128xf32>
    %cst_99 = arith.constant 1.000000e+00 : f32
    %271 = vector.broadcast %cst_99 : f32 to vector<8x128xf32>
    %272 = arith.addf %271, %270 : vector<8x128xf32>
    %273 = arith.divf %271, %272 : vector<8x128xf32>
    %274 = vector.extract_strided_slice %261 {offsets = [0, 256], sizes = [8, 128], strides = [1, 1]} : vector<8x512xf32> to vector<8x128xf32>
    %275 = math.tanh %274 : vector<8x128xf32>
    %276 = vector.extract_strided_slice %261 {offsets = [0, 384], sizes = [8, 128], strides = [1, 1]} : vector<8x512xf32> to vector<8x128xf32>
    %277 = arith.negf %276 : vector<8x128xf32>
    %278 = math.exp %277 : vector<8x128xf32>
    %cst_100 = arith.constant 1.000000e+00 : f32
    %279 = vector.broadcast %cst_100 : f32 to vector<8x128xf32>
    %280 = arith.addf %279, %278 : vector<8x128xf32>
    %281 = arith.divf %279, %280 : vector<8x128xf32>
    %282 = arith.mulf %273, %257 : vector<8x128xf32>
    %283 = arith.mulf %267, %275 : vector<8x128xf32>
    %284 = arith.addf %282, %283 : vector<8x128xf32>
    %285 = math.tanh %284 : vector<8x128xf32>
    %286 = arith.mulf %281, %285 : vector<8x128xf32>
    %c0_101 = arith.constant 0 : index
    %c0_102 = arith.constant 0 : index
    %287 = vector.load %arg12[%c0_101, %c0_102] : memref<64x128xf32, #tpu.memory_space<vmem>>, vector<8x128xf32>
    tpu.vector_store %arg12[%c0_101, %c0_102], %286 {strides = array<i32>} : memref<64x128xf32, #tpu.memory_space<vmem>>, vector<8x128xf32>,
    %c8_103 = arith.constant 8 : index
    %c0_104 = arith.constant 0 : index
    %288 = vector.load %arg10[%c8_103, %c0_104] : memref<64x512xf32, #tpu.memory_space<vmem>>, vector<8x512xf32>
    %c0_105 = arith.constant 0 : index
    %c0_106 = arith.constant 0 : index
    %289 = vector.load %arg5[%c0_105, %c0_106] : memref<128x512xf32, #tpu.memory_space<vmem>>, vector<128x512xf32>
    %cst_107 = arith.constant dense<0.000000e+00> : vector<8x512xf32>
    %290 = tpu.matmul %286, %289, %cst_107 {dimension_numbers = #tpu.dot_dimension_numbers<[1], [0], [0], [1], [0, 0, 1, 1], [], []>} : vector<8x128xf32>, vector<128x512xf32>, vector<8x512xf32> -> vector<8x512xf32>
    %291 = arith.addf %288, %290 : vector<8x512xf32>
    %292 = vector.extract_strided_slice %291 {offsets = [0, 0], sizes = [8, 128], strides = [1, 1]} : vector<8x512xf32> to vector<8x128xf32>
    %293 = arith.negf %292 : vector<8x128xf32>
    %294 = math.exp %293 : vector<8x128xf32>
    %cst_108 = arith.constant 1.000000e+00 : f32
    %295 = vector.broadcast %cst_108 : f32 to vector<8x128xf32>
    %296 = arith.addf %295, %294 : vector<8x128xf32>
    %297 = arith.divf %295, %296 : vector<8x128xf32>
    %298 = vector.extract_strided_slice %291 {offsets = [0, 128], sizes = [8, 128], strides = [1, 1]} : vector<8x512xf32> to vector<8x128xf32>
    %299 = arith.negf %298 : vector<8x128xf32>
    %300 = math.exp %299 : vector<8x128xf32>
    %cst_109 = arith.constant 1.000000e+00 : f32
    %301 = vector.broadcast %cst_109 : f32 to vector<8x128xf32>
    %302 = arith.addf %301, %300 : vector<8x128xf32>
    %303 = arith.divf %301, %302 : vector<8x128xf32>
    %304 = vector.extract_strided_slice %291 {offsets = [0, 256], sizes = [8, 128], strides = [1, 1]} : vector<8x512xf32> to vector<8x128xf32>
    %305 = math.tanh %304 : vector<8x128xf32>
    %306 = vector.extract_strided_slice %291 {offsets = [0, 384], sizes = [8, 128], strides = [1, 1]} : vector<8x512xf32> to vector<8x128xf32>
    %307 = arith.negf %306 : vector<8x128xf32>
    %308 = math.exp %307 : vector<8x128xf32>
    %cst_110 = arith.constant 1.000000e+00 : f32
    %309 = vector.broadcast %cst_110 : f32 to vector<8x128xf32>
    %310 = arith.addf %309, %308 : vector<8x128xf32>
    %311 = arith.divf %309, %310 : vector<8x128xf32>
    %312 = arith.mulf %303, %284 : vector<8x128xf32>
    %313 = arith.mulf %297, %305 : vector<8x128xf32>
    %314 = arith.addf %312, %313 : vector<8x128xf32>
    %315 = math.tanh %314 : vector<8x128xf32>
    %316 = arith.mulf %311, %315 : vector<8x128xf32>
    %c8_111 = arith.constant 8 : index
    %c0_112 = arith.constant 0 : index
    %317 = vector.load %arg12[%c8_111, %c0_112] : memref<64x128xf32, #tpu.memory_space<vmem>>, vector<8x128xf32>
    tpu.vector_store %arg12[%c8_111, %c0_112], %316 {strides = array<i32>} : memref<64x128xf32, #tpu.memory_space<vmem>>, vector<8x128xf32>,
    %c16_113 = arith.constant 16 : index
    %c0_114 = arith.constant 0 : index
    %318 = vector.load %arg10[%c16_113, %c0_114] : memref<64x512xf32, #tpu.memory_space<vmem>>, vector<8x512xf32>
    %c0_115 = arith.constant 0 : index
    %c0_116 = arith.constant 0 : index
    %319 = vector.load %arg5[%c0_115, %c0_116] : memref<128x512xf32, #tpu.memory_space<vmem>>, vector<128x512xf32>
    %cst_117 = arith.constant dense<0.000000e+00> : vector<8x512xf32>
    %320 = tpu.matmul %316, %319, %cst_117 {dimension_numbers = #tpu.dot_dimension_numbers<[1], [0], [0], [1], [0, 0, 1, 1], [], []>} : vector<8x128xf32>, vector<128x512xf32>, vector<8x512xf32> -> vector<8x512xf32>
    %321 = arith.addf %318, %320 : vector<8x512xf32>
    %322 = vector.extract_strided_slice %321 {offsets = [0, 0], sizes = [8, 128], strides = [1, 1]} : vector<8x512xf32> to vector<8x128xf32>
    %323 = arith.negf %322 : vector<8x128xf32>
    %324 = math.exp %323 : vector<8x128xf32>
    %cst_118 = arith.constant 1.000000e+00 : f32
    %325 = vector.broadcast %cst_118 : f32 to vector<8x128xf32>
    %326 = arith.addf %325, %324 : vector<8x128xf32>
    %327 = arith.divf %325, %326 : vector<8x128xf32>
    %328 = vector.extract_strided_slice %321 {offsets = [0, 128], sizes = [8, 128], strides = [1, 1]} : vector<8x512xf32> to vector<8x128xf32>
    %329 = arith.negf %328 : vector<8x128xf32>
    %330 = math.exp %329 : vector<8x128xf32>
    %cst_119 = arith.constant 1.000000e+00 : f32
    %331 = vector.broadcast %cst_119 : f32 to vector<8x128xf32>
    %332 = arith.addf %331, %330 : vector<8x128xf32>
    %333 = arith.divf %331, %332 : vector<8x128xf32>
    %334 = vector.extract_strided_slice %321 {offsets = [0, 256], sizes = [8, 128], strides = [1, 1]} : vector<8x512xf32> to vector<8x128xf32>
    %335 = math.tanh %334 : vector<8x128xf32>
    %336 = vector.extract_strided_slice %321 {offsets = [0, 384], sizes = [8, 128], strides = [1, 1]} : vector<8x512xf32> to vector<8x128xf32>
    %337 = arith.negf %336 : vector<8x128xf32>
    %338 = math.exp %337 : vector<8x128xf32>
    %cst_120 = arith.constant 1.000000e+00 : f32
    %339 = vector.broadcast %cst_120 : f32 to vector<8x128xf32>
    %340 = arith.addf %339, %338 : vector<8x128xf32>
    %341 = arith.divf %339, %340 : vector<8x128xf32>
    %342 = arith.mulf %333, %314 : vector<8x128xf32>
    %343 = arith.mulf %327, %335 : vector<8x128xf32>
    %344 = arith.addf %342, %343 : vector<8x128xf32>
    %345 = math.tanh %344 : vector<8x128xf32>
    %346 = arith.mulf %341, %345 : vector<8x128xf32>
    %c16_121 = arith.constant 16 : index
    %c0_122 = arith.constant 0 : index
    %347 = vector.load %arg12[%c16_121, %c0_122] : memref<64x128xf32, #tpu.memory_space<vmem>>, vector<8x128xf32>
    tpu.vector_store %arg12[%c16_121, %c0_122], %346 {strides = array<i32>} : memref<64x128xf32, #tpu.memory_space<vmem>>, vector<8x128xf32>,
    %c24_123 = arith.constant 24 : index
    %c0_124 = arith.constant 0 : index
    %348 = vector.load %arg10[%c24_123, %c0_124] : memref<64x512xf32, #tpu.memory_space<vmem>>, vector<8x512xf32>
    %c0_125 = arith.constant 0 : index
    %c0_126 = arith.constant 0 : index
    %349 = vector.load %arg5[%c0_125, %c0_126] : memref<128x512xf32, #tpu.memory_space<vmem>>, vector<128x512xf32>
    %cst_127 = arith.constant dense<0.000000e+00> : vector<8x512xf32>
    %350 = tpu.matmul %346, %349, %cst_127 {dimension_numbers = #tpu.dot_dimension_numbers<[1], [0], [0], [1], [0, 0, 1, 1], [], []>} : vector<8x128xf32>, vector<128x512xf32>, vector<8x512xf32> -> vector<8x512xf32>
    %351 = arith.addf %348, %350 : vector<8x512xf32>
    %352 = vector.extract_strided_slice %351 {offsets = [0, 0], sizes = [8, 128], strides = [1, 1]} : vector<8x512xf32> to vector<8x128xf32>
    %353 = arith.negf %352 : vector<8x128xf32>
    %354 = math.exp %353 : vector<8x128xf32>
    %cst_128 = arith.constant 1.000000e+00 : f32
    %355 = vector.broadcast %cst_128 : f32 to vector<8x128xf32>
    %356 = arith.addf %355, %354 : vector<8x128xf32>
    %357 = arith.divf %355, %356 : vector<8x128xf32>
    %358 = vector.extract_strided_slice %351 {offsets = [0, 128], sizes = [8, 128], strides = [1, 1]} : vector<8x512xf32> to vector<8x128xf32>
    %359 = arith.negf %358 : vector<8x128xf32>
    %360 = math.exp %359 : vector<8x128xf32>
    %cst_129 = arith.constant 1.000000e+00 : f32
    %361 = vector.broadcast %cst_129 : f32 to vector<8x128xf32>
    %362 = arith.addf %361, %360 : vector<8x128xf32>
    %363 = arith.divf %361, %362 : vector<8x128xf32>
    %364 = vector.extract_strided_slice %351 {offsets = [0, 256], sizes = [8, 128], strides = [1, 1]} : vector<8x512xf32> to vector<8x128xf32>
    %365 = math.tanh %364 : vector<8x128xf32>
    %366 = vector.extract_strided_slice %351 {offsets = [0, 384], sizes = [8, 128], strides = [1, 1]} : vector<8x512xf32> to vector<8x128xf32>
    %367 = arith.negf %366 : vector<8x128xf32>
    %368 = math.exp %367 : vector<8x128xf32>
    %cst_130 = arith.constant 1.000000e+00 : f32
    %369 = vector.broadcast %cst_130 : f32 to vector<8x128xf32>
    %370 = arith.addf %369, %368 : vector<8x128xf32>
    %371 = arith.divf %369, %370 : vector<8x128xf32>
    %372 = arith.mulf %363, %344 : vector<8x128xf32>
    %373 = arith.mulf %357, %365 : vector<8x128xf32>
    %374 = arith.addf %372, %373 : vector<8x128xf32>
    %375 = math.tanh %374 : vector<8x128xf32>
    %376 = arith.mulf %371, %375 : vector<8x128xf32>
    %c24_131 = arith.constant 24 : index
    %c0_132 = arith.constant 0 : index
    %377 = vector.load %arg12[%c24_131, %c0_132] : memref<64x128xf32, #tpu.memory_space<vmem>>, vector<8x128xf32>
    tpu.vector_store %arg12[%c24_131, %c0_132], %376 {strides = array<i32>} : memref<64x128xf32, #tpu.memory_space<vmem>>, vector<8x128xf32>,
    %c32_133 = arith.constant 32 : index
    %c0_134 = arith.constant 0 : index
    %378 = vector.load %arg10[%c32_133, %c0_134] : memref<64x512xf32, #tpu.memory_space<vmem>>, vector<8x512xf32>
    %c0_135 = arith.constant 0 : index
    %c0_136 = arith.constant 0 : index
    %379 = vector.load %arg5[%c0_135, %c0_136] : memref<128x512xf32, #tpu.memory_space<vmem>>, vector<128x512xf32>
    %cst_137 = arith.constant dense<0.000000e+00> : vector<8x512xf32>
    %380 = tpu.matmul %376, %379, %cst_137 {dimension_numbers = #tpu.dot_dimension_numbers<[1], [0], [0], [1], [0, 0, 1, 1], [], []>} : vector<8x128xf32>, vector<128x512xf32>, vector<8x512xf32> -> vector<8x512xf32>
    %381 = arith.addf %378, %380 : vector<8x512xf32>
    %382 = vector.extract_strided_slice %381 {offsets = [0, 0], sizes = [8, 128], strides = [1, 1]} : vector<8x512xf32> to vector<8x128xf32>
    %383 = arith.negf %382 : vector<8x128xf32>
    %384 = math.exp %383 : vector<8x128xf32>
    %cst_138 = arith.constant 1.000000e+00 : f32
    %385 = vector.broadcast %cst_138 : f32 to vector<8x128xf32>
    %386 = arith.addf %385, %384 : vector<8x128xf32>
    %387 = arith.divf %385, %386 : vector<8x128xf32>
    %388 = vector.extract_strided_slice %381 {offsets = [0, 128], sizes = [8, 128], strides = [1, 1]} : vector<8x512xf32> to vector<8x128xf32>
    %389 = arith.negf %388 : vector<8x128xf32>
    %390 = math.exp %389 : vector<8x128xf32>
    %cst_139 = arith.constant 1.000000e+00 : f32
    %391 = vector.broadcast %cst_139 : f32 to vector<8x128xf32>
    %392 = arith.addf %391, %390 : vector<8x128xf32>
    %393 = arith.divf %391, %392 : vector<8x128xf32>
    %394 = vector.extract_strided_slice %381 {offsets = [0, 256], sizes = [8, 128], strides = [1, 1]} : vector<8x512xf32> to vector<8x128xf32>
    %395 = math.tanh %394 : vector<8x128xf32>
    %396 = vector.extract_strided_slice %381 {offsets = [0, 384], sizes = [8, 128], strides = [1, 1]} : vector<8x512xf32> to vector<8x128xf32>
    %397 = arith.negf %396 : vector<8x128xf32>
    %398 = math.exp %397 : vector<8x128xf32>
    %cst_140 = arith.constant 1.000000e+00 : f32
    %399 = vector.broadcast %cst_140 : f32 to vector<8x128xf32>
    %400 = arith.addf %399, %398 : vector<8x128xf32>
    %401 = arith.divf %399, %400 : vector<8x128xf32>
    %402 = arith.mulf %393, %374 : vector<8x128xf32>
    %403 = arith.mulf %387, %395 : vector<8x128xf32>
    %404 = arith.addf %402, %403 : vector<8x128xf32>
    %405 = math.tanh %404 : vector<8x128xf32>
    %406 = arith.mulf %401, %405 : vector<8x128xf32>
    %c32_141 = arith.constant 32 : index
    %c0_142 = arith.constant 0 : index
    %407 = vector.load %arg12[%c32_141, %c0_142] : memref<64x128xf32, #tpu.memory_space<vmem>>, vector<8x128xf32>
    tpu.vector_store %arg12[%c32_141, %c0_142], %406 {strides = array<i32>} : memref<64x128xf32, #tpu.memory_space<vmem>>, vector<8x128xf32>,
    %c40_143 = arith.constant 40 : index
    %c0_144 = arith.constant 0 : index
    %408 = vector.load %arg10[%c40_143, %c0_144] : memref<64x512xf32, #tpu.memory_space<vmem>>, vector<8x512xf32>
    %c0_145 = arith.constant 0 : index
    %c0_146 = arith.constant 0 : index
    %409 = vector.load %arg5[%c0_145, %c0_146] : memref<128x512xf32, #tpu.memory_space<vmem>>, vector<128x512xf32>
    %cst_147 = arith.constant dense<0.000000e+00> : vector<8x512xf32>
    %410 = tpu.matmul %406, %409, %cst_147 {dimension_numbers = #tpu.dot_dimension_numbers<[1], [0], [0], [1], [0, 0, 1, 1], [], []>} : vector<8x128xf32>, vector<128x512xf32>, vector<8x512xf32> -> vector<8x512xf32>
    %411 = arith.addf %408, %410 : vector<8x512xf32>
    %412 = vector.extract_strided_slice %411 {offsets = [0, 0], sizes = [8, 128], strides = [1, 1]} : vector<8x512xf32> to vector<8x128xf32>
    %413 = arith.negf %412 : vector<8x128xf32>
    %414 = math.exp %413 : vector<8x128xf32>
    %cst_148 = arith.constant 1.000000e+00 : f32
    %415 = vector.broadcast %cst_148 : f32 to vector<8x128xf32>
    %416 = arith.addf %415, %414 : vector<8x128xf32>
    %417 = arith.divf %415, %416 : vector<8x128xf32>
    %418 = vector.extract_strided_slice %411 {offsets = [0, 128], sizes = [8, 128], strides = [1, 1]} : vector<8x512xf32> to vector<8x128xf32>
    %419 = arith.negf %418 : vector<8x128xf32>
    %420 = math.exp %419 : vector<8x128xf32>
    %cst_149 = arith.constant 1.000000e+00 : f32
    %421 = vector.broadcast %cst_149 : f32 to vector<8x128xf32>
    %422 = arith.addf %421, %420 : vector<8x128xf32>
    %423 = arith.divf %421, %422 : vector<8x128xf32>
    %424 = vector.extract_strided_slice %411 {offsets = [0, 256], sizes = [8, 128], strides = [1, 1]} : vector<8x512xf32> to vector<8x128xf32>
    %425 = math.tanh %424 : vector<8x128xf32>
    %426 = vector.extract_strided_slice %411 {offsets = [0, 384], sizes = [8, 128], strides = [1, 1]} : vector<8x512xf32> to vector<8x128xf32>
    %427 = arith.negf %426 : vector<8x128xf32>
    %428 = math.exp %427 : vector<8x128xf32>
    %cst_150 = arith.constant 1.000000e+00 : f32
    %429 = vector.broadcast %cst_150 : f32 to vector<8x128xf32>
    %430 = arith.addf %429, %428 : vector<8x128xf32>
    %431 = arith.divf %429, %430 : vector<8x128xf32>
    %432 = arith.mulf %423, %404 : vector<8x128xf32>
    %433 = arith.mulf %417, %425 : vector<8x128xf32>
    %434 = arith.addf %432, %433 : vector<8x128xf32>
    %435 = math.tanh %434 : vector<8x128xf32>
    %436 = arith.mulf %431, %435 : vector<8x128xf32>
    %c40_151 = arith.constant 40 : index
    %c0_152 = arith.constant 0 : index
    %437 = vector.load %arg12[%c40_151, %c0_152] : memref<64x128xf32, #tpu.memory_space<vmem>>, vector<8x128xf32>
    tpu.vector_store %arg12[%c40_151, %c0_152], %436 {strides = array<i32>} : memref<64x128xf32, #tpu.memory_space<vmem>>, vector<8x128xf32>,
    %c48_153 = arith.constant 48 : index
    %c0_154 = arith.constant 0 : index
    %438 = vector.load %arg10[%c48_153, %c0_154] : memref<64x512xf32, #tpu.memory_space<vmem>>, vector<8x512xf32>
    %c0_155 = arith.constant 0 : index
    %c0_156 = arith.constant 0 : index
    %439 = vector.load %arg5[%c0_155, %c0_156] : memref<128x512xf32, #tpu.memory_space<vmem>>, vector<128x512xf32>
    %cst_157 = arith.constant dense<0.000000e+00> : vector<8x512xf32>
    %440 = tpu.matmul %436, %439, %cst_157 {dimension_numbers = #tpu.dot_dimension_numbers<[1], [0], [0], [1], [0, 0, 1, 1], [], []>} : vector<8x128xf32>, vector<128x512xf32>, vector<8x512xf32> -> vector<8x512xf32>
    %441 = arith.addf %438, %440 : vector<8x512xf32>
    %442 = vector.extract_strided_slice %441 {offsets = [0, 0], sizes = [8, 128], strides = [1, 1]} : vector<8x512xf32> to vector<8x128xf32>
    %443 = arith.negf %442 : vector<8x128xf32>
    %444 = math.exp %443 : vector<8x128xf32>
    %cst_158 = arith.constant 1.000000e+00 : f32
    %445 = vector.broadcast %cst_158 : f32 to vector<8x128xf32>
    %446 = arith.addf %445, %444 : vector<8x128xf32>
    %447 = arith.divf %445, %446 : vector<8x128xf32>
    %448 = vector.extract_strided_slice %441 {offsets = [0, 128], sizes = [8, 128], strides = [1, 1]} : vector<8x512xf32> to vector<8x128xf32>
    %449 = arith.negf %448 : vector<8x128xf32>
    %450 = math.exp %449 : vector<8x128xf32>
    %cst_159 = arith.constant 1.000000e+00 : f32
    %451 = vector.broadcast %cst_159 : f32 to vector<8x128xf32>
    %452 = arith.addf %451, %450 : vector<8x128xf32>
    %453 = arith.divf %451, %452 : vector<8x128xf32>
    %454 = vector.extract_strided_slice %441 {offsets = [0, 256], sizes = [8, 128], strides = [1, 1]} : vector<8x512xf32> to vector<8x128xf32>
    %455 = math.tanh %454 : vector<8x128xf32>
    %456 = vector.extract_strided_slice %441 {offsets = [0, 384], sizes = [8, 128], strides = [1, 1]} : vector<8x512xf32> to vector<8x128xf32>
    %457 = arith.negf %456 : vector<8x128xf32>
    %458 = math.exp %457 : vector<8x128xf32>
    %cst_160 = arith.constant 1.000000e+00 : f32
    %459 = vector.broadcast %cst_160 : f32 to vector<8x128xf32>
    %460 = arith.addf %459, %458 : vector<8x128xf32>
    %461 = arith.divf %459, %460 : vector<8x128xf32>
    %462 = arith.mulf %453, %434 : vector<8x128xf32>
    %463 = arith.mulf %447, %455 : vector<8x128xf32>
    %464 = arith.addf %462, %463 : vector<8x128xf32>
    %465 = math.tanh %464 : vector<8x128xf32>
    %466 = arith.mulf %461, %465 : vector<8x128xf32>
    %c48_161 = arith.constant 48 : index
    %c0_162 = arith.constant 0 : index
    %467 = vector.load %arg12[%c48_161, %c0_162] : memref<64x128xf32, #tpu.memory_space<vmem>>, vector<8x128xf32>
    tpu.vector_store %arg12[%c48_161, %c0_162], %466 {strides = array<i32>} : memref<64x128xf32, #tpu.memory_space<vmem>>, vector<8x128xf32>,
    %c56_163 = arith.constant 56 : index
    %c0_164 = arith.constant 0 : index
    %468 = vector.load %arg10[%c56_163, %c0_164] : memref<64x512xf32, #tpu.memory_space<vmem>>, vector<8x512xf32>
    %c0_165 = arith.constant 0 : index
    %c0_166 = arith.constant 0 : index
    %469 = vector.load %arg5[%c0_165, %c0_166] : memref<128x512xf32, #tpu.memory_space<vmem>>, vector<128x512xf32>
    %cst_167 = arith.constant dense<0.000000e+00> : vector<8x512xf32>
    %470 = tpu.matmul %466, %469, %cst_167 {dimension_numbers = #tpu.dot_dimension_numbers<[1], [0], [0], [1], [0, 0, 1, 1], [], []>} : vector<8x128xf32>, vector<128x512xf32>, vector<8x512xf32> -> vector<8x512xf32>
    %471 = arith.addf %468, %470 : vector<8x512xf32>
    %472 = vector.extract_strided_slice %471 {offsets = [0, 0], sizes = [8, 128], strides = [1, 1]} : vector<8x512xf32> to vector<8x128xf32>
    %473 = arith.negf %472 : vector<8x128xf32>
    %474 = math.exp %473 : vector<8x128xf32>
    %cst_168 = arith.constant 1.000000e+00 : f32
    %475 = vector.broadcast %cst_168 : f32 to vector<8x128xf32>
    %476 = arith.addf %475, %474 : vector<8x128xf32>
    %477 = arith.divf %475, %476 : vector<8x128xf32>
    %478 = vector.extract_strided_slice %471 {offsets = [0, 128], sizes = [8, 128], strides = [1, 1]} : vector<8x512xf32> to vector<8x128xf32>
    %479 = arith.negf %478 : vector<8x128xf32>
    %480 = math.exp %479 : vector<8x128xf32>
    %cst_169 = arith.constant 1.000000e+00 : f32
    %481 = vector.broadcast %cst_169 : f32 to vector<8x128xf32>
    %482 = arith.addf %481, %480 : vector<8x128xf32>
    %483 = arith.divf %481, %482 : vector<8x128xf32>
    %484 = vector.extract_strided_slice %471 {offsets = [0, 256], sizes = [8, 128], strides = [1, 1]} : vector<8x512xf32> to vector<8x128xf32>
    %485 = math.tanh %484 : vector<8x128xf32>
    %486 = vector.extract_strided_slice %471 {offsets = [0, 384], sizes = [8, 128], strides = [1, 1]} : vector<8x512xf32> to vector<8x128xf32>
    %487 = arith.negf %486 : vector<8x128xf32>
    %488 = math.exp %487 : vector<8x128xf32>
    %cst_170 = arith.constant 1.000000e+00 : f32
    %489 = vector.broadcast %cst_170 : f32 to vector<8x128xf32>
    %490 = arith.addf %489, %488 : vector<8x128xf32>
    %491 = arith.divf %489, %490 : vector<8x128xf32>
    %492 = arith.mulf %483, %464 : vector<8x128xf32>
    %493 = arith.mulf %477, %485 : vector<8x128xf32>
    %494 = arith.addf %492, %493 : vector<8x128xf32>
    %495 = math.tanh %494 : vector<8x128xf32>
    %496 = arith.mulf %491, %495 : vector<8x128xf32>
    %c56_171 = arith.constant 56 : index
    %c0_172 = arith.constant 0 : index
    %497 = vector.load %arg12[%c56_171, %c0_172] : memref<64x128xf32, #tpu.memory_space<vmem>>, vector<8x128xf32>
    tpu.vector_store %arg12[%c56_171, %c0_172], %496 {strides = array<i32>} : memref<64x128xf32, #tpu.memory_space<vmem>>, vector<8x128xf32>,
    %c0_173 = arith.constant 0 : index
    %c0_174 = arith.constant 0 : index
    %498 = vector.load %arg12[%c0_173, %c0_174] : memref<64x128xf32, #tpu.memory_space<vmem>>, vector<64x128xf32>
    %c0_175 = arith.constant 0 : index
    %c0_176 = arith.constant 0 : index
    %499 = vector.load %arg7[%c0_175, %c0_176] : memref<128x128xf32, #tpu.memory_space<vmem>>, vector<128x128xf32>
    %cst_177 = arith.constant dense<0.000000e+00> : vector<64x128xf32>
    %500 = tpu.matmul %498, %499, %cst_177 {dimension_numbers = #tpu.dot_dimension_numbers<[1], [0], [0], [1], [0, 0, 1, 1], [], []>} : vector<64x128xf32>, vector<128x128xf32>, vector<64x128xf32> -> vector<64x128xf32>
    %c0_178 = arith.constant 0 : index
    %c0_179 = arith.constant 0 : index
    %501 = vector.load %arg8[%c0_178, %c0_179] : memref<1x128xf32, #tpu.memory_space<vmem>>, vector<1x128xf32>
    %502 = vector.broadcast %501 : vector<1x128xf32> to vector<64x128xf32>
    %503 = arith.addf %500, %502 : vector<64x128xf32>
    %c0_180 = arith.constant 0 : index
    %c0_181 = arith.constant 0 : index
    %504 = vector.load %arg9[%c0_180, %c0_181] : memref<64x128xf32, #tpu.memory_space<vmem>>, vector<64x128xf32>
    tpu.vector_store %arg9[%c0_180, %c0_181], %503 {strides = array<i32>} : memref<64x128xf32, #tpu.memory_space<vmem>>, vector<64x128xf32>,
    return
  }
}

</mosaic_0001>

<bundles_post_ra>
// kernel: tpu_custom_call.1
= control target key start
LH: loop header
LB: loop body
LE: loop exit
PB: predicated region body
PF: predicated region fallthrough
CT: control target
= control target key end

     0   :  { %14 = vsyncpa [#allocation6], 0  ;;  %s7242_s0 = inlined_call_operand.vmem [shape: f32[64,32], index: 0, kind: input, shape index: {}]   ;;  %s7243_s1 = inlined_call_operand.hbm [shape: f32[32,512], index: 1, kind: input, shape index: {}]   ;;  %s7244_s2 = inlined_call_operand.hbm [shape: f32[128,512], index: 2, kind: input, shape index: {}]   ;;  %s7245_s3 = inlined_call_operand.vmem [shape: f32[1,512], index: 3, kind: input, shape index: {}]   ;;  %s7246_s4 = inlined_call_operand.hbm [shape: f32[128,512], index: 4, kind: input, shape index: {}]   ;;  %s7247_s5 = inlined_call_operand.hbm [shape: f32[128,512], index: 5, kind: input, shape index: {}]   ;;  %s7248_s6 = inlined_call_operand.vmem [shape: f32[1,512], index: 6, kind: input, shape index: {}]   ;;  %s7249_s7 = inlined_call_operand.hbm [shape: f32[128,128], index: 7, kind: input, shape index: {}]   ;;  %s7250_s8 = inlined_call_operand.vmem [shape: f32[1,128], index: 8, kind: input, shape index: {}]   ;;  %s7251_s9 = inlined_call_operand.hbm [shape: f32[64,128], index: 9, kind: output, shape index: {}]  }
   0x1   :  { %15 = vsyncpa [#allocation9], 0 }
   0x2   :  { %16 = vsyncpa [#allocation12], 0 }
   0x3   :  { %17 = vsyncpa [#allocation7], 0  ;;  %s37_s11 = sshll.u32 %s7244_s2, 4  ;;  %s4706_s12 = smov [#allocation8]   ;;  %s38_s11 = int_to_ptr.hbm [resolvable:$true] %s37_s11 }
   0x4   :  { %s39_s13 = sshll.u32 %s4706_s12, 4  ;;  %s65_s16 = sshll.u32 %s7247_s5, 4  ;;  %s40_s13 = int_to_ptr.vmem [resolvable:$true] %s39_s13  ;;  %s66_s16 = int_to_ptr.hbm [resolvable:$true] %s65_s16 }
   0x5   :  { %s4707_s17 = smov 512   ;;  %s4708_s18 = smov 32  }
   0x6   :  { %45 = dma.hbm_to_vmem [thread:$0]  %s38_s11, 8192, %s40_s13, [#allocation9], %s4707_s17, %s4707_s17, %s4708_s18  }
   0x7   :  { %s4709_s19 = smov [#allocation11]   ;;  %s24_s23 = sshll.u32 %s7243_s1, 4  ;;  %s25_s23 = int_to_ptr.hbm [resolvable:$true] %s24_s23 }
   0x8   :  { %s67_s20 = sshll.u32 %s4709_s19, 4  ;;  %s52_s25 = sshll.u32 %s7246_s4, 4  ;;  %s68_s20 = int_to_ptr.vmem [resolvable:$true] %s67_s20  ;;  %s53_s25 = int_to_ptr.hbm [resolvable:$true] %s52_s25 }
   0x9   :  { %73 = dma.hbm_to_vmem [thread:$0]  %s66_s16, 8192, %s68_s20, [#allocation12], %s4707_s17, %s4707_s17, %s4708_s18  }
   0xa   :  { %s4710_s26 = smov [#allocation5]   ;;  %s4711_s5 = smov [#allocation10]  }
   0xb   :  { %s26_s27 = sshll.u32 %s4710_s26, 4  ;;  %s54_s28 = sshll.u32 %s4711_s5, 4  ;;  %s27_s27 = int_to_ptr.vmem [resolvable:$true] %s26_s27  ;;  %s55_s28 = int_to_ptr.vmem [resolvable:$true] %s54_s28 }
   0xc   :  { %32 = dma.hbm_to_vmem [thread:$0]  %s25_s23, 2048, %s27_s27, [#allocation6], %s4707_s17, %s4707_s17, %s4708_s18  }
   0xd   :  { %s80_s10 = sshll.u32 %s7249_s7, 4  ;;  %s4712_s1 = smov [#allocation13]   ;;  %s81_s10 = int_to_ptr.hbm [resolvable:$true] %s80_s10 }
   0xe   :  { %60 = dma.hbm_to_vmem [thread:$0]  %s53_s25, 8192, %s55_s28, [#allocation9], %s4707_s17, %s4707_s17, %s4708_s18  }
   0xf   :  { %s82_s11 = sshll.u32 %s4712_s1, 4  ;;  %s4713_s12 = smov 128   ;;  %s83_s11 = int_to_ptr.vmem [resolvable:$true] %s82_s11 }
  0x10   :  { %s4714_s13 = smov 8  }
  0x11   :  { %88 = dma.hbm_to_vmem [thread:$0]  %s81_s10, 2048, %s83_s11, [#allocation12], %s4713_s12, %s4713_s12, %s4714_s13  }
  0x12   :  { %4698 = dma.done.wait [#allocation6], 2048  }
  0x13   :  { %4699 = vsyncadd [#allocation6], 4294965248 }
  0x14   :  { %4700 = dma.done.wait [#allocation9], 16384  }
  0x15   :  { %4701 = vsyncadd [#allocation9], 4294950912 }
  0x16   :  { %4702 = dma.done.wait [#allocation12], 10240  }
  0x17   :  { %4703 = vsyncadd [#allocation12], 4294957056  ;;  %v131_v0 = vld [vmem:[#allocation5 + $0x60] sm:$0xff]  ;;  %v133_v1 = vld [vmem:[#allocation5 + $0x70] sm:$0xff]  ;;  %vm145_vm0 = vcmask 261120   ;;  %s4183_s1 = sshll.u32 %s7251_s9, 4  ;;  %s4184_s1 = int_to_ptr.hbm [resolvable:$true] %s4183_s1 }
  0x18   :  { %v127_v2 = vld [vmem:[#allocation5 + $0x40] sm:$0xff]  ;;  %4278 = vmatpush.msra.mxu1 %v131_v0  ;;  %4279 = vmatpush.msra.mxu3 %v131_v0  ;;  %v129_v3 = vld [vmem:[#allocation5 + $0x50] sm:$0xff]  ;;  %v4793_v9 = vld [vmem:[%s7242_s0 + $0x28] sm:$0xff] }
  0x19   :  { %264 = vmatpush.msra.mxu2 %v133_v1  ;;  %v123_v4 = vld [vmem:[#allocation5 + $0x20] sm:$0xff]  ;;  %182 = vmatpush.msra.mxu0 %v131_v0  ;;  %v125_v5 = vld [vmem:[#allocation5 + $0x30] sm:$0xff]  ;;  %v134_v11 = vld [vmem:[#allocation5 + $0x78] sm:$0xff] }
  0x1a   :  { %4280 = vmatpush.msra.mxu1 %v127_v2  ;;  %4281 = vmatpush.msra.mxu3 %v127_v2  ;;  %v119_v6 = vld [vmem:[#allocation5] sm:$0xff]  ;;  %v121_v7 = vld [vmem:[#allocation5 + $0x10] sm:$0xff]  ;;  %v132_v12 = vld [vmem:[#allocation5 + $0x68] sm:$0xff] }
  0x1b   :  { %265 = vmatpush.msra.mxu2 %v129_v3  ;;  %183 = vmatpush.msra.mxu0 %v127_v2  ;;  %v4788_v8 = vld [vmem:[%s7242_s0 + $0x20] sm:$0xff]  ;;  %v128_v14 = vld [vmem:[#allocation5 + $0x48] sm:$0xff]  ;;  %v130_v15 = vld [vmem:[#allocation5 + $0x58] sm:$0xff] }
  0x1c   :  { %4282 = vmatpush.msra.mxu1 %v123_v4  ;;  %4283 = vmatpush.msra.mxu3 %v123_v4  ;;  %v4798_v10 = vld [vmem:[%s7242_s0] sm:$0xff]  ;;  %v124_v17 = vld [vmem:[#allocation5 + $0x28] sm:$0xff]  ;;  %v126_v18 = vld [vmem:[#allocation5 + $0x38] sm:$0xff] }
  0x1d   :  { %266 = vmatpush.msra.mxu2 %v125_v5  ;;  %184 = vmatpush.msra.mxu0 %v123_v4  ;;  %v4802_v13 = vld [vmem:[#allocation8 + $0x1e0] sm:$0xff]  ;;  %v120_v20 = vld [vmem:[#allocation5 + $0x8] sm:$0xff]  ;;  %v122_v21 = vld [vmem:[#allocation5 + $0x18] sm:$0xff] }
  0x1e   :  { %4284 = vmatpush.msra.mxu1 %v119_v6  ;;  %4285 = vmatpush.msra.mxu3 %v119_v6  ;;  %v4808_v16 = vld [vmem:[#allocation8 + $0x1c0] sm:$0xff]  ;;  %v4819_v22 = vld [vmem:[%s7242_s0 + $0x30] sm:$0xff]  ;;  %v4824_v23 = vld [vmem:[%s7242_s0 + $0x8] sm:$0xff] }
  0x1f   :  { %267 = vmatpush.msra.mxu2 %v121_v7  ;;  %4202 = vmatmul.msk.f32.vlgmr.msra.gmra.mxu1 %vm145_vm0, %v4788_v8  ;;  %v4811_v19 = vld [vmem:[#allocation8 + $0x1a0] sm:$0xff]  ;;  %v4827_v24 = vld [vmem:[#allocation8 + $0x1e8] sm:$0xff]  ;;  %v4832_v26 = vld [vmem:[#allocation8 + $0x1f8] sm:$0xff] }
  0x20   :  { %4203 = vmatmul.msk.f32.vlgmr.msra.gmra.mxu3 %vm145_vm0, %v4793_v9  ;;  %4214 = vmatmul.msk.f32.vlgmr.msra.gmra.mxu2 %vm145_vm0, %v4798_v10  ;;  %v4830_v25 = vld [vmem:[#allocation8 + $0x180] sm:$0xff]  ;;  %v4838_v27 = vld [vmem:[#allocation8 + $0x1c8] sm:$0xff]  ;;  %v4843_v29 = vld [vmem:[#allocation8 + $0x1d8] sm:$0xff] }
  0x21   :  { %305 = vmatpush.msrb.mxu3 %v134_v11  ;;  %223 = vmatpush.msrb.mxu1 %v132_v12  ;;  %v414_v28 = vld [vmem:[#allocation8 + $0x160] sm:$0xff]  ;;  %v4847_v30 = vld [vmem:[#allocation8 + $0x1a8] sm:$0xff]  ;;  %v4850_v32 = vld [vmem:[#allocation8 + $0x1b8] sm:$0xff] }
  0x22   :  { %434 = vmatpush.msrb.mxu2 %v4802_v13  ;;  %185 = vmatpush.msra.mxu0 %v119_v6  ;;  %v410_v31 = vld [vmem:[#allocation8 + $0x140] sm:$0xff]  ;;  %v4854_v33 = vld [vmem:[#allocation8 + $0x188] sm:$0xff]  ;;  %v4859_v34 = vld [vmem:[%s7242_s0 + $0x38] sm:$0xff] }
  0x23   :  { %224 = vmatpush.msrb.mxu1 %v128_v14  ;;  %306 = vmatpush.msrb.mxu3 %v130_v15  ;;  %v4866_v35 = vld [vmem:[%s7242_s0 + $0x10] sm:$0xff]  ;;  %v4869_v36 = vld [vmem:[#allocation8 + $0x168] sm:$0xff]  ;;  %v406_v37 = vld [vmem:[#allocation8 + $0x120] sm:$0xff] }
  0x24   :  { %435 = vmatpush.msrb.mxu2 %v4808_v16  ;;  %4198 = vmatmul.msk.f32.vlgmr.msra.gmra.mxu0 %vm145_vm0, %v4798_v10  ;;  %v4872_v38 = vld [vmem:[#allocation8 + $0x198] sm:$0xff]  ;;  %v4879_v39 = vld [vmem:[#allocation8 + $0x148] sm:$0xff]  ;;  %v402_v40 = vld [vmem:[#allocation8 + $0x100] sm:$0xff] }
  0x25   :  { %225 = vmatpush.msrb.mxu1 %v124_v17  ;;  %307 = vmatpush.msrb.mxu3 %v126_v18  ;;  %v4884_v41 = vld [vmem:[#allocation8 + $0x178] sm:$0xff]  ;;  %v4887_v42 = vld [vmem:[#allocation8 + $0x128] sm:$0xff]  ;;  %v398_v43 = vld [vmem:[#allocation8 + $0xe0] sm:$0xff] }
  0x26   :  { %436 = vmatpush.msrb.mxu2 %v4811_v19  ;;  %650 = vmatpush.msrb.mxu0 %v4802_v13  ;;  %v4890_v44 = vld [vmem:[#allocation8 + $0x158] sm:$0xff]  ;;  %v4895_v45 = vld [vmem:[#allocation8 + $0x108] sm:$0xff]  ;;  %v394_v48 = vld [vmem:[#allocation8 + $0xc0] sm:$0xff] }
  0x27   :  { %226 = vmatpush.msrb.mxu1 %v120_v20  ;;  %308 = vmatpush.msrb.mxu3 %v122_v21  ;;  %v4901_v46 = vld [vmem:[%s7242_s0 + $0x18] sm:$0xff]  ;;  %v4907_v49 = vld [vmem:[#allocation8 + $0xe8] sm:$0xff]  ;;  %v390_v51 = vld [vmem:[#allocation8 + $0xa0] sm:$0xff] }
  0x28   :  { %4204 = vmatmul.msk.f32.gmra.mxu3 %vm145_vm0, %v4819_v22  ;;  %4206 = vmatmul.msk.f32.vlgmr.msrb.gmra.mxu1 %vm145_vm0, %v4798_v10  ;;  %v4904_v47 = vld [vmem:[#allocation8 + $0x138] sm:$0xff]  ;;  %v4918_v52 = vld [vmem:[#allocation8 + $0xc8] sm:$0xff]  ;;  %v386_v54 = vld [vmem:[#allocation8 + $0x80] sm:$0xff] }
  0x29   :  { %4215 = vmatmul.msk.f32.gmra.mxu2 %vm145_vm0, %v4824_v23  ;;  %454 = vmatpush.msra.mxu1 %v4827_v24  ;;  %v4913_v50 = vld [vmem:[#allocation8 + $0x118] sm:$0xff]  ;;  %v4924_v55 = vld [vmem:[#allocation8 + $0xa8] sm:$0xff]  ;;  %v382_v57 = vld [vmem:[#allocation8 + $0x60] sm:$0xff] }
  0x2a   :  { %437 = vmatpush.msrb.mxu2 %v4830_v25  ;;  %494 = vmatpush.msra.mxu3 %v4832_v26  ;;  %v4921_v53 = vld [vmem:[#allocation8 + $0xf8] sm:$0xff]  ;;  %v4932_v58 = vld [vmem:[#allocation8 + $0x88] sm:$0xff]  ;;  %v378_v59 = vld [vmem:[#allocation8 + $0x40] sm:$0xff] }
  0x2b   :  { %455 = vmatpush.msra.mxu1 %v4838_v27  ;;  %651 = vmatpush.msrb.mxu0 %v4808_v16  ;;  %v4928_v56 = vld [vmem:[#allocation8 + $0xd8] sm:$0xff]  ;;  %v4945_v61 = vld [vmem:[#allocation8 + $0x68] sm:$0xff]  ;;  %v374_v62 = vld [vmem:[#allocation8 + $0x20] sm:$0xff] }
  0x2c   :  { %438 = vmatpush.msrb.mxu2 %v414_v28  ;;  %495 = vmatpush.msra.mxu3 %v4843_v29  ;;  %v4943_v60 = vld [vmem:[#allocation8 + $0xb8] sm:$0xff]  ;;  %v4949_v63 = vld [vmem:[#allocation8 + $0x48] sm:$0xff]  ;;  %v370_v2 = vld [vmem:[#allocation8] sm:$0xff] }
  0x2d   :  { %456 = vmatpush.msra.mxu1 %v4847_v30  ;;  %652 = vmatpush.msrb.mxu0 %v4811_v19  ;;  %v4952_v0 = vld [vmem:[#allocation8 + $0x98] sm:$0xff]  ;;  %v4954_v1 = vld [vmem:[#allocation8 + $0x28] sm:$0xff]  ;;  %v4964_v4 = vld [vmem:[#allocation8 + $0x1f0] sm:$0xff] }
  0x2e   :  { %439 = vmatpush.msrb.mxu2 %v410_v31  ;;  %496 = vmatpush.msra.mxu3 %v4850_v32  ;;  %v4958_v3 = vld [vmem:[#allocation8 + $0x8] sm:$0xff]  ;;  %v4969_v5 = vld [vmem:[#allocation8 + $0x1d0] sm:$0xff]  ;;  %v4971_v6 = vld [vmem:[#allocation8 + $0x78] sm:$0xff] }
  0x2f   :  { %457 = vmatpush.msra.mxu1 %v4854_v33  ;;  %653 = vmatpush.msrb.mxu0 %v4830_v25  ;;  %v4973_v7 = vld [vmem:[#allocation8 + $0x58] sm:$0xff]  ;;  %v4983_v11 = vld [vmem:[#allocation8 + $0x190] sm:$0xff] }
  0x30   :  { %4205 = vmatmul.msk.f32.gmra.mxu3 %vm145_vm0, %v4859_v34  ;;  %4207 = vmatmul.msk.f32.gmra.mxu1 %vm145_vm0, %v4824_v23  ;;  %v4993_v12 = vld [vmem:[#allocation8 + $0x170] sm:$0xff]  ;;  %v4995_v14 = vld [vmem:[#allocation8 + $0x38] sm:$0xff] }
  0x31   :  { %4216 = vmatmul.msk.f32.gmra.mxu2 %vm145_vm0, %v4866_v35  ;;  %458 = vmatpush.msra.mxu1 %v4869_v36  ;;  %v4997_v15 = vld [vmem:[#allocation8 + $0x18] sm:$0xff]  ;;  %v5003_v17 = vld [vmem:[#allocation8 + $0x150] sm:$0xff] }
  0x32   :  { %440 = vmatpush.msrb.mxu2 %v406_v37  ;;  %497 = vmatpush.msra.mxu3 %v4872_v38  ;;  %v5008_v18 = vld [vmem:[#allocation8 + $0x130] sm:$0xff] }
  0x33   :  { %459 = vmatpush.msra.mxu1 %v4879_v39  ;;  %4199 = vmatmul.msk.f32.gmra.mxu0 %vm145_vm0, %v4824_v23  ;;  %v5013_v20 = vld [vmem:[#allocation8 + $0x110] sm:$0xff] }
  0x34   :  { %441 = vmatpush.msrb.mxu2 %v402_v40  ;;  %498 = vmatpush.msra.mxu3 %v4884_v41  ;;  %v5022_v21 = vld [vmem:[#allocation8 + $0xf0] sm:$0xff] }
  0x35   :  { %460 = vmatpush.msra.mxu1 %v4887_v42  ;;  %654 = vmatpush.msrb.mxu0 %v414_v28  ;;  %v5033_v28 = vld [vmem:[#allocation8 + $0xb0] sm:$0xff] }
  0x36   :  { %442 = vmatpush.msrb.mxu2 %v398_v43  ;;  %499 = vmatpush.msra.mxu3 %v4890_v44 }
  0x37   :  { %461 = vmatpush.msra.mxu1 %v4895_v45  ;;  %655 = vmatpush.msrb.mxu0 %v410_v31  ;;  %v5048_v31 = vld [vmem:[#allocation8 + $0x70] sm:$0xff] }
  0x38   :  { %4208 = vmatmul.msk.f32.gmra.mxu1 %vm145_vm0, %v4866_v35  ;;  %4222 = vmatmul.msk.f32.vlgmr.msrb.gmra.mxu3 %vm145_vm0, %v4798_v10  ;;  %v4978_v10 = vld [vmem:[#allocation8 + $0x1b0] sm:$0xff] }
  0x39   :  { %4217 = vmatmul.msk.f32.gmra.mxu2 %vm145_vm0, %v4901_v46  ;;  %500 = vmatpush.msra.mxu3 %v4904_v47 }
  0x3a   :  { %443 = vmatpush.msrb.mxu2 %v394_v48  ;;  %462 = vmatpush.msra.mxu1 %v4907_v49 }
  0x3b   :  { %501 = vmatpush.msra.mxu3 %v4913_v50  ;;  %656 = vmatpush.msrb.mxu0 %v406_v37  ;;  %v5058_v37 = vld [vmem:[#allocation8 + $0x30] sm:$0xff] }
  0x3c   :  { %444 = vmatpush.msrb.mxu2 %v390_v51  ;;  %463 = vmatpush.msra.mxu1 %v4918_v52 }
  0x3d   :  { %502 = vmatpush.msra.mxu3 %v4921_v53  ;;  %657 = vmatpush.msrb.mxu0 %v402_v40 }
  0x3e   :  { %445 = vmatpush.msrb.mxu2 %v386_v54  ;;  %464 = vmatpush.msra.mxu1 %v4924_v55 }
  0x3f   :  { %503 = vmatpush.msra.mxu3 %v4928_v56  ;;  %4200 = vmatmul.msk.f32.gmra.mxu0 %vm145_vm0, %v4866_v35 }
  0x40   :  { %4209 = vmatmul.msk.f32.gmra.mxu1 %vm145_vm0, %v4901_v46  ;;  %4223 = vmatmul.msk.f32.gmra.mxu3 %vm145_vm0, %v4824_v23  ;;  %v5028_v23 = vld [vmem:[#allocation8 + $0xd0] sm:$0xff] }
  0x41   :  { %4218 = vmatmul.msk.f32.gmra.mxu2 %vm145_vm0, %v4788_v8  ;;  %465 = vmatpush.msra.mxu1 %v4932_v58 }
  0x42   :  { %446 = vmatpush.msrb.mxu2 %v382_v57  ;;  %658 = vmatpush.msrb.mxu0 %v398_v43 }
  0x43   :  { %504 = vmatpush.msra.mxu3 %v4943_v60  ;;  %466 = vmatpush.msra.mxu1 %v4945_v61 }
  0x44   :  { %447 = vmatpush.msrb.mxu2 %v378_v59  ;;  %659 = vmatpush.msrb.mxu0 %v394_v48  ;;  %v135_v48 = vld [vmem:[%s7245_s3] sm:$0xf] }
  0x45   :  { %467 = vmatpush.msra.mxu1 %v4949_v63  ;;  %505 = vmatpush.msra.mxu3 %v4952_v0 }
  0x46   :  { %448 = vmatpush.msrb.mxu2 %v374_v62  ;;  %660 = vmatpush.msrb.mxu0 %v390_v51 }
  0x47   :  { %468 = vmatpush.msra.mxu1 %v4954_v1  ;;  %506 = vmatpush.msra.mxu3 %v4971_v6 }
  0x48   :  { %4210 = vmatmul.msk.f32.gmra.mxu1 %vm145_vm0, %v4788_v8  ;;  %4224 = vmatmul.msk.f32.gmra.mxu3 %vm145_vm0, %v4866_v35  ;;  %v7252_v35 = vmov 0.0  }
  0x49   :  { %4219 = vmatmul.msk.f32.gmra.mxu2 %vm145_vm0, %v4793_v9  ;;  %469 = vmatpush.msra.mxu1 %v4958_v3 }
  0x4a   :  { %449 = vmatpush.msrb.mxu2 %v370_v2  ;;  %661 = vmatpush.msrb.mxu0 %v386_v54 }
  0x4b   :  { %670 = vmatpush.msrb.mxu1 %v4827_v24  ;;  %507 = vmatpush.msra.mxu3 %v4973_v7 }
  0x4c   :  { %474 = vmatpush.msra.mxu2 %v4964_v4  ;;  %4201 = vmatmul.msk.f32.gmra.mxu0 %vm145_vm0, %v4901_v46 }
  0x4d   :  { %671 = vmatpush.msrb.mxu1 %v4838_v27  ;;  %662 = vmatpush.msrb.mxu0 %v382_v57 }
  0x4e   :  { %475 = vmatpush.msra.mxu2 %v4969_v5  ;;  %508 = vmatpush.msra.mxu3 %v4995_v14 }
  0x4f   :  { %672 = vmatpush.msrb.mxu1 %v4847_v30  ;;  %663 = vmatpush.msrb.mxu0 %v378_v59 }
  0x50   :  { %476 = vmatpush.msra.mxu2 %v4978_v10  ;;  %4211 = vmatmul.msk.f32.gmra.mxu1 %vm145_vm0, %v4793_v9 }
  0x51   :  { %4225 = vmatmul.msk.f32.gmra.mxu3 %vm145_vm0, %v4901_v46  ;;  %4220 = vmatmul.msk.f32.gmra.mxu2 %vm145_vm0, %v4819_v22 }
  0x52   :  { %477 = vmatpush.msra.mxu2 %v4983_v11  ;;  %673 = vmatpush.msrb.mxu1 %v4854_v33 }
  0x53   :  { %509 = vmatpush.msra.mxu3 %v4997_v15  ;;  %664 = vmatpush.msrb.mxu0 %v374_v62 }
  0x54   :  { %478 = vmatpush.msra.mxu2 %v4993_v12  ;;  %674 = vmatpush.msrb.mxu1 %v4869_v36 }
  0x55   :  { %710 = vmatpush.msrb.mxu3 %v4832_v26  ;;  %665 = vmatpush.msrb.mxu0 %v370_v2 }
  0x56   :  { %479 = vmatpush.msra.mxu2 %v5003_v17  ;;  %675 = vmatpush.msrb.mxu1 %v4879_v39 }
  0x57   :  { %711 = vmatpush.msrb.mxu3 %v4843_v29  ;;  %866 = vmatpush.msra.mxu0 %v4802_v13  ;;  %v5053_v13 = vld [vmem:[#allocation8 + $0x50] sm:$0xff] }
  0x58   :  { %480 = vmatpush.msra.mxu2 %v5008_v18  ;;  %4212 = vmatmul.msk.f32.gmra.mxu1 %vm145_vm0, %v4819_v22 }
  0x59   :  { %4226 = vmatmul.msk.f32.gmra.mxu3 %vm145_vm0, %v4788_v8  ;;  %4221 = vmatmul.msk.f32.gmra.mxu2 %vm145_vm0, %v4859_v34  ;;  %v5038_v8 = vld [vmem:[#allocation8 + $0x90] sm:$0xff] }
  0x5a   :  { %481 = vmatpush.msra.mxu2 %v5013_v20  ;;  %712 = vmatpush.msrb.mxu3 %v4850_v32 }
  0x5b   :  { %676 = vmatpush.msrb.mxu1 %v4887_v42  ;;  %867 = vmatpush.msra.mxu0 %v4808_v16 }
  0x5c   :  { %482 = vmatpush.msra.mxu2 %v5022_v21  ;;  %713 = vmatpush.msrb.mxu3 %v4872_v38 }
  0x5d   :  { %677 = vmatpush.msrb.mxu1 %v4895_v45  ;;  %868 = vmatpush.msra.mxu0 %v4811_v19 }
  0x5e   :  { %483 = vmatpush.msra.mxu2 %v5028_v23  ;;  %714 = vmatpush.msrb.mxu3 %v4884_v41 }
  0x5f   :  { %678 = vmatpush.msrb.mxu1 %v4907_v49  ;;  %869 = vmatpush.msra.mxu0 %v4830_v25 }
  0x60   :  { %484 = vmatpush.msra.mxu2 %v5033_v28  ;;  %715 = vmatpush.msrb.mxu3 %v4890_v44 }
  0x61   :  { %4213 = vmatmul.msk.f32.gmra.mxu1 %vm145_vm0, %v4859_v34  ;;  %4227 = vmatmul.msk.f32.gmra.mxu3 %vm145_vm0, %v4793_v9  ;;  %v5064_v9 = vld [vmem:[#allocation8 + $0x10] sm:$0xff] }
  0x62   :  { %485 = vmatpush.msra.mxu2 %v5038_v8  ;;  %716 = vmatpush.msrb.mxu3 %v4904_v47 }
  0x63   :  { %450 = vmatmul.f32.vlgmr.msrb.gmra.mxu2 %v7252_v35  ;;  %679 = vmatpush.msrb.mxu1 %v4918_v52 }
  0x64   :  { %486 = vmatpush.msra.mxu2 %v5048_v31  ;;  %717 = vmatpush.msrb.mxu3 %v4913_v50 }
  0x65   :  { %680 = vmatpush.msrb.mxu1 %v4924_v55 }
  0x66   :  { %487 = vmatpush.msra.mxu2 %v5053_v13  ;;  %718 = vmatpush.msrb.mxu3 %v4921_v53 }
  0x67   :  { %681 = vmatpush.msrb.mxu1 %v4932_v58 }
  0x68   :  { %488 = vmatpush.msra.mxu2 %v5058_v37  ;;  %719 = vmatpush.msrb.mxu3 %v4928_v56 }
  0x69   :  { %4228 = vmatmul.msk.f32.gmra.mxu3 %vm145_vm0, %v4819_v22  ;;  %470 = vmatmul.f32.vlgmr.msra.gmra.mxu1 %v7252_v35 }
  0x6a   :  { %489 = vmatpush.msra.mxu2 %v5064_v9  ;;  %720 = vmatpush.msrb.mxu3 %v4943_v60 }
  0x6b   :  { %490 = vmatmul.f32.vlgmr.msra.gmra.mxu2 %v7252_v35  ;;  %682 = vmatpush.msrb.mxu1 %v4945_v61 }
  0x6c   :  { %690 = vmatpush.msrb.mxu2 %v4964_v4  ;;  %721 = vmatpush.msrb.mxu3 %v4952_v0 }
  0x6d   :  { %683 = vmatpush.msrb.mxu1 %v4949_v63 }
  0x6e   :  { %691 = vmatpush.msrb.mxu2 %v4969_v5  ;;  %722 = vmatpush.msrb.mxu3 %v4971_v6 }
  0x6f   :  { %684 = vmatpush.msrb.mxu1 %v4954_v1 }
  0x70   :  { %692 = vmatpush.msrb.mxu2 %v4978_v10  ;;  %723 = vmatpush.msrb.mxu3 %v4973_v7 }
  0x71   :  { %4229 = vmatmul.msk.f32.gmra.mxu3 %vm145_vm0, %v4859_v34  ;;  %685 = vmatpush.msrb.mxu1 %v4958_v3 }
  0x72   :  { %693 = vmatpush.msrb.mxu2 %v4983_v11  ;;  %724 = vmatpush.msrb.mxu3 %v4995_v14 }
  0x73   :  { %886 = vmatpush.msra.mxu1 %v4827_v24 }
  0x74   :  { %694 = vmatpush.msrb.mxu2 %v4993_v12  ;;  %725 = vmatpush.msrb.mxu3 %v4997_v15 }
  0x75   :  { %887 = vmatpush.msra.mxu1 %v4838_v27 }
  0x76   :  { %695 = vmatpush.msrb.mxu2 %v5003_v17 }
  0x77   :  { %888 = vmatpush.msra.mxu1 %v4847_v30 }
  0x78   :  { %696 = vmatpush.msrb.mxu2 %v5008_v18 }
  0x79   :  { %510 = vmatmul.f32.vlgmr.msra.gmra.mxu3 %v7252_v35  ;;  %889 = vmatpush.msra.mxu1 %v4854_v33 }
  0x7a   :  { %697 = vmatpush.msrb.mxu2 %v5013_v20  ;;  %926 = vmatpush.msra.mxu3 %v4832_v26 }
  0x7b   :  { %890 = vmatpush.msra.mxu1 %v4869_v36 }
  0x7c   :  { %698 = vmatpush.msrb.mxu2 %v5022_v21  ;;  %927 = vmatpush.msra.mxu3 %v4843_v29 }
  0x7d   :  { %891 = vmatpush.msra.mxu1 %v4879_v39 }
  0x7e   :  { %699 = vmatpush.msrb.mxu2 %v5028_v23  ;;  %928 = vmatpush.msra.mxu3 %v4850_v32 }
  0x7f   :  { %892 = vmatpush.msra.mxu1 %v4887_v42 }
  0x80   :  { %700 = vmatpush.msrb.mxu2 %v5033_v28  ;;  %929 = vmatpush.msra.mxu3 %v4872_v38 }
  0x81   :  { %893 = vmatpush.msra.mxu1 %v4895_v45 }
  0x82   :  { %701 = vmatpush.msrb.mxu2 %v5038_v8  ;;  %930 = vmatpush.msra.mxu3 %v4884_v41 }
  0x83   :  { %894 = vmatpush.msra.mxu1 %v4907_v49 }
  0x84   :  { %702 = vmatpush.msrb.mxu2 %v5048_v31  ;;  %931 = vmatpush.msra.mxu3 %v4890_v44 }
  0x85   :  { %895 = vmatpush.msra.mxu1 %v4918_v52  ;;  %v5202_v52 = vperm.slane %v135_v48, 0 }
  0x86   :  { %703 = vmatpush.msrb.mxu2 %v5053_v13  ;;  %932 = vmatpush.msra.mxu3 %v4904_v47 }
  0x87   :  { %896 = vmatpush.msra.mxu1 %v4924_v55  ;;  %7398 = vst [vmem:[#allocation35_spill] sm:$0xff] %v5202_v52 }
  0x88   :  { %704 = vmatpush.msrb.mxu2 %v5058_v37  ;;  %933 = vmatpush.msra.mxu3 %v4913_v50 }
  0x89   :  { %897 = vmatpush.msra.mxu1 %v4932_v58 }
  0x8a   :  { %705 = vmatpush.msrb.mxu2 %v5064_v9  ;;  %934 = vmatpush.msra.mxu3 %v4921_v53  ;;  %v5204_v53 = vperm.slane %v135_v48, 1 }
  0x8b   :  { %898 = vmatpush.msra.mxu1 %v4945_v61 }
  0x8c   :  { %906 = vmatpush.msra.mxu2 %v4964_v4  ;;  %935 = vmatpush.msra.mxu3 %v4928_v56  ;;  %7399 = vst [vmem:[#allocation36_spill] sm:$0xff] %v5204_v53 }
  0x8d   :  { %899 = vmatpush.msra.mxu1 %v4949_v63 }
  0x8e   :  { %907 = vmatpush.msra.mxu2 %v4969_v5  ;;  %936 = vmatpush.msra.mxu3 %v4943_v60  ;;  %v5214_v5 = vperm.slane %v135_v48, 3 }
  0x8f   :  { %900 = vmatpush.msra.mxu1 %v4954_v1 }
  0x90   :  { %908 = vmatpush.msra.mxu2 %v4978_v10  ;;  %937 = vmatpush.msra.mxu3 %v4952_v0  ;;  %7403 = vst [vmem:[#allocation40_spill] sm:$0xff] %v5214_v5 }
  0x91   :  { %901 = vmatpush.msra.mxu1 %v4958_v3 }
  0x92   :  { %909 = vmatpush.msra.mxu2 %v4983_v11  ;;  %938 = vmatpush.msra.mxu3 %v4971_v6 }
  0x94   :  { %910 = vmatpush.msra.mxu2 %v4993_v12  ;;  %939 = vmatpush.msra.mxu3 %v4973_v7 }
  0x96   :  { %911 = vmatpush.msra.mxu2 %v5003_v17  ;;  %940 = vmatpush.msra.mxu3 %v4995_v14 }
  0x98   :  { %912 = vmatpush.msra.mxu2 %v5008_v18  ;;  %941 = vmatpush.msra.mxu3 %v4997_v15  ;;  %v5217_v18 = vperm.slane %v135_v48, 2  ;;  %v5252_v48 = vld [vmem:[#allocation8 + $0xe0] sm:$0xff] }
  0x9a   :  { %913 = vmatpush.msra.mxu2 %v5013_v20  ;;  %7404 = vst [vmem:[#allocation41_spill] sm:$0xff] %v5217_v18 }
  0x9c   :  { %914 = vmatpush.msra.mxu2 %v5022_v21  ;;  %v5146_v16 = vpop.f32.mrf.mxu1 }
  0x9d   :  { %7382 = vst [vmem:[#allocation19_spill] sm:$0xff] %v5146_v16 }
  0x9e   :  { %915 = vmatpush.msra.mxu2 %v5028_v23 }
  0xa0   :  { %916 = vmatpush.msra.mxu2 %v5033_v28 }
  0xa1   :  { %v187_v51 = vpop.f32.mrf.mxu0 }
  0xa2   :  { %917 = vmatpush.msra.mxu2 %v5038_v8  ;;  %v188_v54 = vadd.f32 %v187_v51, %v5202_v52 }
  0xa3   :  { %v5152_v19 = vpop.f32.mrf.mxu3  ;;  %v5154_v22 = vpop.f32.mrf.mxu2 }
  0xa4   :  { %918 = vmatpush.msra.mxu2 %v5048_v31  ;;  %7383 = vst [vmem:[#allocation20_spill] sm:$0xff] %v5152_v19  ;;  %v270_v31 = vadd.f32 %v5154_v22, %v5217_v18 }
  0xa5   :  { %v228_v24 = vpop.f32.mrf.mxu1 }
  0xa6   :  { %919 = vmatpush.msra.mxu2 %v5053_v13  ;;  %v229_v56 = vadd.f32 %v228_v24, %v5204_v53 }
  0xa8   :  { %920 = vmatpush.msra.mxu2 %v5058_v37 }
  0xaa   :  { %921 = vmatpush.msra.mxu2 %v5064_v9 }
  0xab   :  { %v5159_v25 = vpop.f32.mrf.mxu3 }
  0xac   :  { %7384 = vst [vmem:[#allocation21_spill] sm:$0xff] %v5159_v25  ;;  %v5161_v26 = vpop.f32.mrf.mxu2  ;;  %v5385_v25 = vld [vmem:[#allocation8 + $0xf8] sm:$0xff] }
  0xad   :  { %v5163_v27 = vpop.f32.mrf.mxu1 }
  0xb3   :  { %v5165_v29 = vpop.f32.mrf.mxu3 }
  0xb4   :  { %7385 = vst [vmem:[#allocation22_spill] sm:$0xff] %v5165_v29  ;;  %v5167_v30 = vpop.f32.mrf.mxu2  ;;  %v5365_v29 = vld [vmem:[#allocation8 + $0x138] sm:$0xff] }
  0xb5   :  { %v5169_v32 = vpop.f32.mrf.mxu1  ;;  %7419 = vst [vmem:[#allocation54_spill] sm:$0xff] %v5365_v29 }
  0xbb   :  { %v310_v33 = vpop.f32.mrf.mxu3 }
  0xbc   :  { %v5171_v34 = vpop.f32.mrf.mxu2  ;;  %v311_v10 = vadd.f32 %v310_v33, %v5214_v5 }
  0xbd   :  { %7386 = vst [vmem:[#allocation23_spill] sm:$0xff] %v5171_v34  ;;  %v5173_v36 = vpop.f32.mrf.mxu1  ;;  %v5407_v34 = vld [vmem:[#allocation8 + $0xb0] sm:$0xff] }
  0xbe   :  { %7387 = vst [vmem:[#allocation24_spill] sm:$0xff] %v5173_v36  ;;  %v5431_v36 = vld [vmem:[#allocation8 + $0x78] sm:$0xff] }
  0xbf   :  { %7423 = vst [vmem:[#allocation58_spill] sm:$0xff] %v5431_v36 }
  0xc3   :  { %v5175_v38 = vpop.f32.mrf.mxu3 }
  0xc4   :  { %v5177_v39 = vpop.f32.mrf.mxu2 }
  0xc5   :  { %7388 = vst [vmem:[#allocation25_spill] sm:$0xff] %v5177_v39  ;;  %v5179_v40 = vpop.f32.mrf.mxu1  ;;  %v5395_v39 = vld [vmem:[#allocation8 + $0xc8] sm:$0xff] }
  0xc6   :  { %7389 = vst [vmem:[#allocation26_spill] sm:$0xff] %v5179_v40  ;;  %v5399_v40 = vld [vmem:[#allocation8 + $0xd8] sm:$0xff] }
  0xcb   :  { %v5181_v41 = vpop.f32.mrf.mxu3 }
  0xcc   :  { %v5183_v42 = vpop.f32.mrf.mxu2 }
  0xcd   :  { %7390 = vst [vmem:[#allocation27_spill] sm:$0xff] %v5183_v42  ;;  %v5185_v43 = vpop.f32.mrf.mxu1  ;;  %v235_v42 = vadd.f32 %v5169_v32, %v5204_v53 }
  0xce   :  { %7391 = vst [vmem:[#allocation28_spill] sm:$0xff] %v5185_v43 }
  0xd4   :  { %v5187_v44 = vpop.f32.mrf.mxu3  ;;  %v5189_v45 = vpop.f32.mrf.mxu2 }
  0xd5   :  { %7392 = vst [vmem:[#allocation29_spill] sm:$0xff] %v5187_v44  ;;  %v5191_v46 = vpop.f32.mrf.mxu1  ;;  %v5409_v44 = vld [vmem:[#allocation8 + $0xb8] sm:$0xff] }
  0xd6   :  { %7393 = vst [vmem:[#allocation30_spill] sm:$0xff] %v5189_v45  ;;  %v5375_v45 = vld [vmem:[#allocation8 + $0x118] sm:$0xff] }
  0xd7   :  { %7394 = vst [vmem:[#allocation31_spill] sm:$0xff] %v5191_v46  ;;  %v5383_v46 = vld [vmem:[#allocation8 + $0xf0] sm:$0xff] }
  0xdc   :  { %v5193_v47 = vpop.f32.mrf.mxu3  ;;  %v5198_v49 = vpop.f32.mrf.mxu2 }
  0xdd   :  { %7395 = vst [vmem:[#allocation32_spill] sm:$0xff] %v5193_v47  ;;  %v5397_v47 = vld [vmem:[#allocation8 + $0xd0] sm:$0xff] }
  0xde   :  { %7396 = vst [vmem:[#allocation33_spill] sm:$0xff] %v5198_v49  ;;  %v5200_v50 = vpop.f32.mrf.mxu1 }
  0xdf   :  { %7397 = vst [vmem:[#allocation34_spill] sm:$0xff] %v5200_v50 }
  0xe4   :  { %v5207_v55 = vpop.f32.mrf.mxu3 }
  0xe5   :  { %7400 = vst [vmem:[#allocation37_spill] sm:$0xff] %v5207_v55 }
  0xe6   :  { %v451_v57 = vpop.f32.mrf.mxu2  ;;  %v471_v58 = vpop.f32.mrf.mxu1 }
  0xe7   :  { %v514_v59 = vadd.f32 %v451_v57, %v188_v54  ;;  %v515_v60 = vadd.f32 %v471_v58, %v229_v56 }
  0xe9   :  { %v4230_v61 = vmul.f32 -1.442695, %v514_v59  ;;  %v4231_v62 = vmul.f32 -1.442695, %v515_v60 }
  0xeb   :  { %4298 = vpow2.f32 %v4230_v61 }
  0xec   :  { %4300 = vpow2.f32 %v4231_v62  ;;  %v5210_v63 = vpop.f32.mrf.mxu3 }
  0xed   :  { %7401 = vst [vmem:[#allocation38_spill] sm:$0xff] %v5210_v63  ;;  %v5381_v63 = vld [vmem:[#allocation8 + $0xe8] sm:$0xff] }
  0xee   :  { %v491_v28 = vpop.f32.mrf.mxu2 }
  0xef   :  { %v516_v9 = vadd.f32 %v491_v28, %v270_v31 }
  0xf1   :  { %v4299_v0 = vpop.eup %4298 }
  0xf2   :  { %v4301_v1 = vpop.eup %4300  ;;  %v521_v2 = vadd.f32 1.0, %v4299_v0 }
  0xf3   :  { %v540_v3 = vadd.f32 1.0, %v4301_v1 }
  0xf4   :  { %4302 = vrcp.f32 %v521_v2  ;;  %v5212_v4 = vpop.f32.mrf.mxu3  ;;  %vm527_vm1 = vweird.f32 %v521_v2  ;;  %v533_v24 = vand.u32 2147483648, %v521_v2  ;;  %v531_v51 = vand.u32 2147483647, %v521_v2 }
  0xf5   :  { %7402 = vst [vmem:[#allocation39_spill] sm:$0xff] %v5212_v4  ;;  %4304 = vrcp.f32 %v540_v3  ;;  %v552_v37 = vand.u32 2147483648, %v540_v3  ;;  %vm546_vm4 = vweird.f32 %v540_v3  ;;  %v550_v54 = vand.u32 2147483647, %v540_v3 }
  0xf6   :  { %v534_v22 = vor.u32 1.1754944e-38, %v533_v24  ;;  %vm532_vm7 = vcmp.eq.f32.partialorder %v531_v51, 8.507059e+37  ;;  %v5246_v24 = vld [vmem:[#allocation8 + $0x120] sm:$0xff]  ;;  %v232_v51 = vadd.f32 %v5163_v27, %v5204_v53  ;;  %v314_v27 = vadd.f32 %v5175_v38, %v5214_v5 }
  0xf7   :  { %v553_v58 = vor.u32 1.1754944e-38, %v552_v37  ;;  %vm551_vm8 = vcmp.eq.f32.partialorder %v550_v54, 8.507059e+37  ;;  %v5240_v37 = vld [vmem:[#allocation8 + $0x160] sm:$0xff] }
  0xf8   :  { %870 = vmatpush.msra.mxu0 %v5240_v37 }
  0xfa   :  { %v4303_v6 = vpop.eup %4302 }
  0xfb   :  { %v4305_v7 = vpop.eup %4304  ;;  %v523_v11 = vmul.f32 %v4303_v6, %v521_v2  ;;  %vm528_vm2 = vweird.f32 %v4303_v6 }
  0xfc   :  { %v542_v12 = vmul.f32 %v4305_v7, %v540_v3  ;;  %v511_v14 = vpop.f32.mrf.mxu3  ;;  %vm547_vm3 = vweird.f32 %v4305_v7  ;;  %vm5221_vm5 = vmor %vm527_vm1, %vm528_vm2 }
  0xfd   :  { %v524_v15 = vsub.f32 1.0, %v523_v11  ;;  %v517_v17 = vadd.f32 %v511_v14, %v311_v10  ;;  %vm548_vm6 = vmor %vm546_vm4, %vm547_vm3 }
  0xfe   :  { %v543_v20 = vsub.f32 1.0, %v542_v12 }
  0xff   :  { %v4232_v21 = vmul.f32 -1.442695, %v517_v17  ;;  %v525_v8 = vmul.f32 %v4303_v6, %v524_v15 }
 0x100   :  { %v544_v23 = vmul.f32 %v4305_v7, %v543_v20 }
 0x101   :  { %4306 = vpow2.f32 %v4232_v21  ;;  %v526_v33 = vadd.f32 %v4303_v6, %v525_v8  ;;  %v190_v8 = vpop.f32.mrf.mxu0 }
 0x102   :  { %v545_v13 = vadd.f32 %v4305_v7, %v544_v23  ;;  %4308 = vtanh.f32 %v516_v9  ;;  %v5243_v9 = vld [vmem:[#allocation8 + $0x140] sm:$0xff]  ;;  %v191_v54 = vadd.f32 %v190_v8, %v5202_v52 }
 0x103   :  { %v530_v60 = vsel %vm5221_vm5, %v4303_v6, %v526_v33  ;;  %871 = vmatpush.msra.mxu0 %v5243_v9  ;;  %v5249_v33 = vld [vmem:[#allocation8 + $0x100] sm:$0xff] }
 0x104   :  { %v549_v57 = vsel %vm548_vm6, %v4305_v7, %v545_v13  ;;  %v535_v62 = vsel %vm532_vm7, %v534_v22, %v530_v60  ;;  %v5261_v60 = vld [vmem:[#allocation8 + $0xa0] sm:$0xff] }
 0x105   :  { %v554_v61 = vsel %vm551_vm8, %v553_v58, %v549_v57  ;;  %872 = vmatpush.msra.mxu0 %v5246_v24  ;;  %v5258_v58 = vld [vmem:[#allocation8 + $0xc0] sm:$0xff] }
 0x106   :  { %v576_v0 = vmul.f32 0.0, %v554_v61 }
 0x107   :  { %v4307_v56 = vpop.eup %4306  ;;  %873 = vmatpush.msra.mxu0 %v5249_v33 }
 0x108   :  { %v560_v59 = vadd.f32 1.0, %v4307_v56  ;;  %v4309_v1 = vpop.eup %4308 }
 0x109   :  { %v577_v10 = vmul.f32 %v4309_v1, %v535_v62  ;;  %v5236_v31 = vpop.f32.mrf.mxu0  ;;  %874 = vmatpush.msra.mxu0 %v5252_v48  ;;  %v5269_v1 = vld [vmem:[#allocation8 + $0x60] sm:$0xff] }
 0x10a   :  { %4310 = vrcp.f32 %v560_v59  ;;  %v572_v12 = vand.u32 2147483648, %v560_v59  ;;  %v570_v15 = vand.u32 2147483647, %v560_v59  ;;  %vm566_vm10 = vweird.f32 %v560_v59 }
 0x10b   :  { %v5227_v3 = vadd.f32 %v577_v10, %v576_v0  ;;  %875 = vmatpush.msra.mxu0 %v5258_v58  ;;  %v5264_v0 = vld [vmem:[#allocation8 + $0x80] sm:$0xff]  ;;  %v194_v55 = vadd.f32 %v5236_v31, %v5202_v52  ;;  %v5405_v31 = vld [vmem:[#allocation8 + $0xa8] sm:$0xff] }
 0x10c   :  { %v573_v17 = vor.u32 1.1754944e-38, %v572_v12  ;;  %vm571_vm12 = vcmp.eq.f32.partialorder %v570_v15, 8.507059e+37  ;;  %v5275_v12 = vld [vmem:[#allocation8 + $0x20] sm:$0xff] }
 0x10d   :  { %4312 = vtanh.f32 %v5227_v3  ;;  %876 = vmatpush.msra.mxu0 %v5261_v60  ;;  %v5278_v15 = vld [vmem:[#allocation8] sm:$0xff] }
 0x10f   :  { %877 = vmatpush.msra.mxu0 %v5264_v0 }
 0x110   :  { %v4311_v2 = vpop.eup %4310 }
 0x111   :  { %v562_v11 = vmul.f32 %v4311_v2, %v560_v59  ;;  %vm567_vm9 = vweird.f32 %v4311_v2  ;;  %v5238_v13 = vpop.f32.mrf.mxu0  ;;  %878 = vmatpush.msra.mxu0 %v5269_v1 }
 0x112   :  { %vm568_vm11 = vmor %vm566_vm10, %vm567_vm9  ;;  %7408 = vst [vmem:[#allocation43_spill] sm:$0xff] %v5238_v13 }
 0x113   :  { %v563_v7 = vsub.f32 1.0, %v562_v11  ;;  %v4313_v21 = vpop.eup %4312  ;;  %v5272_v11 = vld [vmem:[#allocation8 + $0x40] sm:$0xff] }
 0x114   :  { %7409 = vst [vmem:[#allocation44_spill] sm:$0xff] %v5272_v11  ;;  %879 = vmatpush.msra.mxu0 %v5272_v11 }
 0x115   :  { %v564_v14 = vmul.f32 %v4311_v2, %v563_v7 }
 0x116   :  { %880 = vmatpush.msra.mxu0 %v5275_v12 }
 0x117   :  { %v565_v6 = vadd.f32 %v4311_v2, %v564_v14 }
 0x118   :  { %881 = vmatpush.msra.mxu0 %v5278_v15 }
 0x119   :  { %v569_v20 = vsel %vm568_vm11, %v4311_v2, %v565_v6 }
 0x11a   :  { %v574_v23 = vsel %vm571_vm12, %v573_v17, %v569_v20 }
 0x11b   :  { %v5230_v28 = vmul.f32 %v4313_v21, %v574_v23  ;;  %v273_v23 = vadd.f32 %v5161_v26, %v5217_v18 }
 0x11d   :  { %7407 = vst [vmem:[#allocation42_spill] sm:$0xff] %v5230_v28  ;;  %666 = vmatmul.f32.vlgmr.msrb.gmra.mxu0 %v5230_v28  ;;  %686 = vmatmul.f32.vlgmr.msrb.gmra.mxu1 %v5230_v28 }
 0x11e   :  { %706 = vmatmul.f32.vlgmr.msrb.gmra.mxu2 %v5230_v28  ;;  %726 = vmatmul.f32.vlgmr.msrb.gmra.mxu3 %v5230_v28  ;;  %v5373_v28 = vld [vmem:[#allocation8 + $0x110] sm:$0xff] }
 0x19a   :  { %v667_v56 = vpop.f32.mrf.mxu0  ;;  %v687_v57 = vpop.f32.mrf.mxu1 }
 0x19b   :  { %v730_v22 = vadd.f32 %v667_v56, %v191_v54  ;;  %v731_v59 = vadd.f32 %v687_v57, %v232_v51 }
 0x19d   :  { %v4233_v61 = vmul.f32 -1.442695, %v730_v22  ;;  %v4234_v62 = vmul.f32 -1.442695, %v731_v59 }
 0x19f   :  { %4314 = vpow2.f32 %v4233_v61 }
 0x1a0   :  { %4316 = vpow2.f32 %v4234_v62 }
 0x1a1   :  { %v727_v10 = vpop.f32.mrf.mxu3  ;;  %v707_v20 = vpop.f32.mrf.mxu2 }
 0x1a2   :  { %v733_v2 = vadd.f32 %v727_v10, %v314_v27  ;;  %v732_v54 = vadd.f32 %v707_v20, %v273_v23 }
 0x1a4   :  { %v4235_v7 = vmul.f32 -1.442695, %v733_v2 }
 0x1a5   :  { %v4315_v14 = vpop.eup %4314 }
 0x1a6   :  { %v4317_v38 = vpop.eup %4316  ;;  %v737_v6 = vadd.f32 1.0, %v4315_v14  ;;  %4318 = vpow2.f32 %v4235_v7 }
 0x1a7   :  { %v756_v17 = vadd.f32 1.0, %v4317_v38 }
 0x1a8   :  { %4320 = vrcp.f32 %v737_v6  ;;  %v749_v62 = vand.u32 2147483648, %v737_v6  ;;  %v747_v2 = vand.u32 2147483647, %v737_v6  ;;  %vm743_vm15 = vweird.f32 %v737_v6 }
 0x1a9   :  { %4322 = vrcp.f32 %v756_v17  ;;  %v768_v27 = vand.u32 2147483648, %v756_v17  ;;  %v766_v14 = vand.u32 2147483647, %v756_v17  ;;  %vm762_vm0 = vweird.f32 %v756_v17 }
 0x1aa   :  { %v750_v20 = vor.u32 1.1754944e-38, %v749_v62  ;;  %vm748_vm3 = vcmp.eq.f32.partialorder %v747_v2, 8.507059e+37 }
 0x1ab   :  { %vm767_vm4 = vcmp.eq.f32.partialorder %v766_v14, 8.507059e+37 }
 0x1ac   :  { %v4319_v21 = vpop.eup %4318 }
 0x1ad   :  { %v776_v8 = vadd.f32 1.0, %v4319_v21 }
 0x1ae   :  { %v4321_v51 = vpop.eup %4320 }
 0x1af   :  { %v4323_v56 = vpop.eup %4322  ;;  %v739_v57 = vmul.f32 %v4321_v51, %v737_v6  ;;  %4324 = vrcp.f32 %v776_v8  ;;  %vm744_vm13 = vweird.f32 %v4321_v51  ;;  %v788_v62 = vand.u32 2147483648, %v776_v8 }
 0x1b0   :  { %v758_v22 = vmul.f32 %v4323_v56, %v756_v17  ;;  %4326 = vtanh.f32 %v732_v54  ;;  %vm763_vm14 = vweird.f32 %v4323_v56  ;;  %vm745_vm1 = vmor %vm743_vm15, %vm744_vm13  ;;  %vm782_vm6 = vweird.f32 %v776_v8 }
 0x1b1   :  { %v740_v59 = vsub.f32 1.0, %v739_v57  ;;  %vm764_vm2 = vmor %vm762_vm0, %vm763_vm14  ;;  %v769_v57 = vor.u32 1.1754944e-38, %v768_v27  ;;  %v789_v2 = vor.u32 1.1754944e-38, %v788_v62  ;;  %v5345_v62 = vld [vmem:[#allocation8 + $0x178] sm:$0xff] }
 0x1b2   :  { %v759_v61 = vsub.f32 1.0, %v758_v22 }
 0x1b3   :  { %v741_v10 = vmul.f32 %v4321_v51, %v740_v59 }
 0x1b4   :  { %v760_v7 = vmul.f32 %v4323_v56, %v759_v61 }
 0x1b5   :  { %v4325_v38 = vpop.eup %4324  ;;  %v742_v26 = vadd.f32 %v4321_v51, %v741_v10 }
 0x1b6   :  { %v761_v21 = vadd.f32 %v4323_v56, %v760_v7  ;;  %v778_v23 = vmul.f32 %v4325_v38, %v776_v8  ;;  %v4327_v54 = vpop.eup %4326  ;;  %vm783_vm5 = vweird.f32 %v4325_v38 }
 0x1b7   :  { %v746_v22 = vsel %vm745_vm1, %v4321_v51, %v742_v26  ;;  %v786_v51 = vand.u32 2147483647, %v776_v8  ;;  %vm784_vm7 = vmor %vm782_vm6, %vm783_vm5  ;;  %v5307_v8 = vld [vmem:[#allocation8 + $0x1c8] sm:$0xff]  ;;  %v5313_v26 = vld [vmem:[#allocation8 + $0x1d8] sm:$0xff] }
 0x1b8   :  { %v751_v35 = vsel %vm748_vm3, %v750_v20, %v746_v22  ;;  %v765_v59 = vsel %vm764_vm2, %v4323_v56, %v761_v21  ;;  %v779_v49 = vsub.f32 1.0, %v778_v23  ;;  %7415 = vst [vmem:[#allocation50_spill] sm:$0xff] %v5307_v8  ;;  %v5317_v20 = vld [vmem:[#allocation8 + $0x1a0] sm:$0xff]  ;;  %v5319_v21 = vld [vmem:[#allocation8 + $0x1a8] sm:$0xff]  ;;  %v5321_v23 = vld [vmem:[#allocation8 + $0x1b0] sm:$0xff] }
 0x1b9   :  { %v770_v61 = vsel %vm767_vm4, %v769_v57, %v765_v59  ;;  %v793_v4 = vmul.f32 %v4327_v54, %v751_v35  ;;  %vm787_vm8 = vcmp.eq.f32.partialorder %v786_v51, 8.507059e+37  ;;  %v5293_v35 = vld [vmem:[#allocation8 + $0x1e0] sm:$0xff]  ;;  %v5325_v57 = vld [vmem:[#allocation8 + $0x1b8] sm:$0xff]  ;;  %v5331_v54 = vld [vmem:[#allocation8 + $0x188] sm:$0xff] }
 0x1ba   :  { %v792_v50 = vmul.f32 %v770_v61, %v5227_v3  ;;  %v780_v10 = vmul.f32 %v4325_v38, %v779_v49  ;;  %7411 = vst [vmem:[#allocation46_spill] sm:$0xff] %v5293_v35  ;;  %v5295_v49 = vld [vmem:[#allocation8 + $0x1e8] sm:$0xff]  ;;  %1082 = vmatpush.msrb.mxu0 %v5293_v35  ;;  %v5305_v3 = vld [vmem:[#allocation8 + $0x1c0] sm:$0xff]  ;;  %v5333_v59 = vld [vmem:[#allocation8 + $0x190] sm:$0xff] }
 0x1bb   :  { %1102 = vmatpush.msrb.mxu1 %v5295_v49  ;;  %7414 = vst [vmem:[#allocation49_spill] sm:$0xff] %v5305_v3  ;;  %v5329_v22 = vld [vmem:[#allocation8 + $0x180] sm:$0xff]  ;;  %v5337_v61 = vld [vmem:[#allocation8 + $0x198] sm:$0xff]  ;;  %v5351_v51 = vld [vmem:[#allocation8 + $0x148] sm:$0xff] }
 0x1bc   :  { %v5284_v6 = vadd.f32 %v793_v4, %v792_v50  ;;  %v781_v17 = vadd.f32 %v4325_v38, %v780_v10  ;;  %v5297_v50 = vld [vmem:[#allocation8 + $0x1f0] sm:$0xff]  ;;  %v5301_v4 = vld [vmem:[#allocation8 + $0x1f8] sm:$0xff]  ;;  %1083 = vmatpush.msrb.mxu0 %v5305_v3  ;;  %7416 = vst [vmem:[#allocation51_spill] sm:$0xff] %v5331_v54  ;;  %v5341_v10 = vld [vmem:[#allocation8 + $0x168] sm:$0xff] }
 0x1bd   :  { %7412 = vst [vmem:[#allocation47_spill] sm:$0xff] %v5297_v50  ;;  %1122 = vmatpush.msrb.mxu2 %v5297_v50  ;;  %1142 = vmatpush.msrb.mxu3 %v5301_v4 }
 0x1be   :  { %4328 = vtanh.f32 %v5284_v6  ;;  %v785_v27 = vsel %vm784_vm7, %v4325_v38, %v781_v17  ;;  %7413 = vst [vmem:[#allocation48_spill] sm:$0xff] %v5301_v4  ;;  %v5309_v38 = vld [vmem:[#allocation8 + $0x1d0] sm:$0xff]  ;;  %1103 = vmatpush.msrb.mxu1 %v5307_v8  ;;  %1084 = vmatpush.msrb.mxu0 %v5317_v20 }
 0x1bf   :  { %v790_v7 = vsel %vm787_vm8, %v789_v2, %v785_v27  ;;  %1123 = vmatpush.msrb.mxu2 %v5309_v38  ;;  %1143 = vmatpush.msrb.mxu3 %v5313_v26  ;;  %7417 = vst [vmem:[#allocation52_spill] sm:$0xff] %v5333_v59  ;;  %v5343_v17 = vld [vmem:[#allocation8 + $0x170] sm:$0xff]  ;;  %v5355_v2 = vld [vmem:[#allocation8 + $0x158] sm:$0xff] }
 0x1c0   :  { %1104 = vmatpush.msrb.mxu1 %v5319_v21  ;;  %1085 = vmatpush.msrb.mxu0 %v5329_v22  ;;  %v5353_v27 = vld [vmem:[#allocation8 + $0x150] sm:$0xff] }
 0x1c1   :  { %1124 = vmatpush.msrb.mxu2 %v5321_v23  ;;  %1144 = vmatpush.msrb.mxu3 %v5325_v57 }
 0x1c2   :  { %1105 = vmatpush.msrb.mxu1 %v5331_v54  ;;  %1086 = vmatpush.msrb.mxu0 %v5240_v37 }
 0x1c3   :  { %1125 = vmatpush.msrb.mxu2 %v5333_v59  ;;  %1145 = vmatpush.msrb.mxu3 %v5337_v61 }
 0x1c4   :  { %v4329_v56 = vpop.eup %4328  ;;  %1106 = vmatpush.msrb.mxu1 %v5341_v10  ;;  %1087 = vmatpush.msrb.mxu0 %v5243_v9 }
 0x1c5   :  { %v5287_v14 = vmul.f32 %v4329_v56, %v790_v7  ;;  %1126 = vmatpush.msrb.mxu2 %v5343_v17  ;;  %1146 = vmatpush.msrb.mxu3 %v5345_v62  ;;  %v5361_v56 = vld [vmem:[#allocation8 + $0x128] sm:$0xff]  ;;  %v5363_v7 = vld [vmem:[#allocation8 + $0x130] sm:$0xff] }
 0x1c6   :  { %1107 = vmatpush.msrb.mxu1 %v5351_v51  ;;  %7418 = vst [vmem:[#allocation53_spill] sm:$0xff] %v5363_v7  ;;  %1088 = vmatpush.msrb.mxu0 %v5246_v24 }
 0x1c7   :  { %7410 = vst [vmem:[#allocation45_spill] sm:$0xff] %v5287_v14  ;;  %882 = vmatmul.f32.vlgmr.msra.gmra.mxu0 %v5287_v14  ;;  %902 = vmatmul.f32.vlgmr.msra.gmra.mxu1 %v5287_v14 }
 0x1c8   :  { %922 = vmatmul.f32.vlgmr.msra.gmra.mxu2 %v5287_v14  ;;  %942 = vmatmul.f32.vlgmr.msra.gmra.mxu3 %v5287_v14  ;;  %v5371_v14 = vld [vmem:[#allocation8 + $0x108] sm:$0xff] }
 0x1c9   :  { %1127 = vmatpush.msrb.mxu2 %v5353_v27  ;;  %1147 = vmatpush.msrb.mxu3 %v5355_v2 }
 0x1ca   :  { %1108 = vmatpush.msrb.mxu1 %v5361_v56  ;;  %1089 = vmatpush.msrb.mxu0 %v5249_v33 }
 0x1cb   :  { %1128 = vmatpush.msrb.mxu2 %v5363_v7  ;;  %1148 = vmatpush.msrb.mxu3 %v5365_v29 }
 0x1cc   :  { %1109 = vmatpush.msrb.mxu1 %v5371_v14  ;;  %1090 = vmatpush.msrb.mxu0 %v5252_v48 }
 0x1cd   :  { %1129 = vmatpush.msrb.mxu2 %v5373_v28  ;;  %1149 = vmatpush.msrb.mxu3 %v5375_v45 }
 0x1ce   :  { %1110 = vmatpush.msrb.mxu1 %v5381_v63  ;;  %1091 = vmatpush.msrb.mxu0 %v5258_v58 }
 0x1cf   :  { %1130 = vmatpush.msrb.mxu2 %v5383_v46  ;;  %1150 = vmatpush.msrb.mxu3 %v5385_v25 }
 0x1d0   :  { %1111 = vmatpush.msrb.mxu1 %v5395_v39  ;;  %1092 = vmatpush.msrb.mxu0 %v5261_v60 }
 0x1d1   :  { %1131 = vmatpush.msrb.mxu2 %v5397_v47  ;;  %1151 = vmatpush.msrb.mxu3 %v5399_v40 }
 0x1d2   :  { %1112 = vmatpush.msrb.mxu1 %v5405_v31  ;;  %1093 = vmatpush.msrb.mxu0 %v5264_v0 }
 0x1d3   :  { %1132 = vmatpush.msrb.mxu2 %v5407_v34  ;;  %1152 = vmatpush.msrb.mxu3 %v5409_v44 }
 0x1d4   :  { %1094 = vmatpush.msrb.mxu0 %v5269_v1 }
 0x1d6   :  { %1095 = vmatpush.msrb.mxu0 %v5272_v11  ;;  %v5457_v11 = vld [vmem:[#allocation8 + $0x10] sm:$0xff] }
 0x1d8   :  { %1096 = vmatpush.msrb.mxu0 %v5275_v12 }
 0x1da   :  { %1097 = vmatpush.msrb.mxu0 %v5278_v15 }
 0x1dc   :  { %1298 = vmatpush.msra.mxu0 %v5293_v35 }
 0x1de   :  { %1299 = vmatpush.msra.mxu0 %v5305_v3 }
 0x1e0   :  { %1300 = vmatpush.msra.mxu0 %v5317_v20 }
 0x1e2   :  { %1301 = vmatpush.msra.mxu0 %v5329_v22 }
 0x1e4   :  { %1302 = vmatpush.msra.mxu0 %v5240_v37 }
 0x1e6   :  { %1303 = vmatpush.msra.mxu0 %v5243_v9 }
 0x1e8   :  { %1304 = vmatpush.msra.mxu0 %v5246_v24 }
 0x1ea   :  { %1305 = vmatpush.msra.mxu0 %v5249_v33 }
 0x1ec   :  { %1306 = vmatpush.msra.mxu0 %v5252_v48 }
 0x1ee   :  { %1307 = vmatpush.msra.mxu0 %v5258_v58 }
 0x1f0   :  { %1308 = vmatpush.msra.mxu0 %v5261_v60 }
 0x1f2   :  { %1309 = vmatpush.msra.mxu0 %v5264_v0  ;;  %v7431_v0 = vld [vmem:[#allocation44_spill] sm:$0xff] }
 0x1f4   :  { %1310 = vmatpush.msra.mxu0 %v5269_v1  ;;  %v7436_v1 = vld [vmem:[#allocation46_spill] sm:$0xff] }
 0x1f6   :  { %1311 = vmatpush.msra.mxu0 %v7431_v0 }
 0x1f8   :  { %1312 = vmatpush.msra.mxu0 %v5275_v12  ;;  %v7437_v12 = vld [vmem:[#allocation47_spill] sm:$0xff] }
 0x1fa   :  { %1313 = vmatpush.msra.mxu0 %v5278_v15  ;;  %v7441_v15 = vld [vmem:[#allocation51_spill] sm:$0xff] }
 0x244   :  { %v883_v43 = vpop.f32.mrf.mxu0  ;;  %v903_v19 = vpop.f32.mrf.mxu1 }
 0x245   :  { %v946_v32 = vadd.f32 %v883_v43, %v194_v55  ;;  %v947_v16 = vadd.f32 %v903_v19, %v235_v42  ;;  %v5415_v19 = vld [vmem:[#allocation8 + $0x88] sm:$0xff]  ;;  %v5417_v42 = vld [vmem:[#allocation8 + $0x90] sm:$0xff]  ;;  %v5419_v43 = vld [vmem:[#allocation8 + $0x98] sm:$0xff] }
 0x246   :  { %7420 = vst [vmem:[#allocation55_spill] sm:$0xff] %v5419_v43  ;;  %1113 = vmatpush.msrb.mxu1 %v5415_v19  ;;  %1133 = vmatpush.msrb.mxu2 %v5417_v42  ;;  %v5427_v55 = vld [vmem:[#allocation8 + $0x68] sm:$0xff] }
 0x247   :  { %v4236_v13 = vmul.f32 -1.442695, %v946_v32  ;;  %v4237_v52 = vmul.f32 -1.442695, %v947_v16  ;;  %v317_v16 = vadd.f32 %v5181_v41, %v5214_v5  ;;  %1153 = vmatpush.msrb.mxu3 %v5419_v43  ;;  %7421 = vst [vmem:[#allocation56_spill] sm:$0xff] %v5427_v55  ;;  %v5429_v32 = vld [vmem:[#allocation8 + $0x70] sm:$0xff] }
 0x248   :  { %7422 = vst [vmem:[#allocation57_spill] sm:$0xff] %v5429_v32  ;;  %1114 = vmatpush.msrb.mxu1 %v5427_v55  ;;  %1134 = vmatpush.msrb.mxu2 %v5429_v32  ;;  %v5437_v41 = vld [vmem:[#allocation8 + $0x48] sm:$0xff]  ;;  %v5441_v5 = vld [vmem:[#allocation8 + $0x58] sm:$0xff] }
 0x249   :  { %4330 = vpow2.f32 %v4236_v13  ;;  %1154 = vmatpush.msrb.mxu3 %v5431_v36  ;;  %7424 = vst [vmem:[#allocation59_spill] sm:$0xff] %v5437_v41  ;;  %v5451_v36 = vld [vmem:[#allocation8 + $0x38] sm:$0xff]  ;;  %v5455_v55 = vld [vmem:[#allocation8 + $0x8] sm:$0xff] }
 0x24a   :  { %4332 = vpow2.f32 %v4237_v52  ;;  %v5439_v52 = vld [vmem:[#allocation8 + $0x50] sm:$0xff]  ;;  %7426 = vst [vmem:[#allocation61_spill] sm:$0xff] %v5441_v5  ;;  %1115 = vmatpush.msrb.mxu1 %v5437_v41 }
 0x24b   :  { %v943_v53 = vpop.f32.mrf.mxu3  ;;  %7425 = vst [vmem:[#allocation60_spill] sm:$0xff] %v5439_v52  ;;  %1135 = vmatpush.msrb.mxu2 %v5439_v52  ;;  %1155 = vmatpush.msrb.mxu3 %v5441_v5 }
 0x24c   :  { %v949_v13 = vadd.f32 %v943_v53, %v317_v16  ;;  %v5447_v53 = vld [vmem:[#allocation8 + $0x28] sm:$0xff]  ;;  %v5449_v16 = vld [vmem:[#allocation8 + $0x30] sm:$0xff] }
 0x24d   :  { %1116 = vmatpush.msrb.mxu1 %v5447_v53  ;;  %1136 = vmatpush.msrb.mxu2 %v5449_v16  ;;  %v7427_v60 = vld [vmem:[#allocation55_spill] sm:$0xff] }
 0x24e   :  { %v4238_v43 = vmul.f32 -1.442695, %v949_v13  ;;  %v5459_v13 = vld [vmem:[#allocation8 + $0x18] sm:$0xff]  ;;  %1156 = vmatpush.msrb.mxu3 %v5451_v36 }
 0x24f   :  { %v4331_v32 = vpop.eup %4330  ;;  %1117 = vmatpush.msrb.mxu1 %v5455_v55  ;;  %1137 = vmatpush.msrb.mxu2 %v5457_v11 }
 0x250   :  { %v4333_v52 = vpop.eup %4332  ;;  %v5461_v41 = vadd.f32 1.0, %v4331_v32  ;;  %4334 = vpow2.f32 %v4238_v43  ;;  %1157 = vmatpush.msrb.mxu3 %v5459_v13  ;;  %v923_v43 = vpop.f32.mrf.mxu2 }
 0x251   :  { %v5465_v5 = vadd.f32 1.0, %v4333_v52  ;;  %1318 = vmatpush.msra.mxu1 %v5295_v49  ;;  %1338 = vmatpush.msra.mxu2 %v5297_v50  ;;  %v276_v52 = vadd.f32 %v5167_v30, %v5217_v18 }
 0x252   :  { %4336 = vrcp.f32 %v5461_v41  ;;  %1358 = vmatpush.msra.mxu3 %v5301_v4  ;;  %vm959_vm11 = vweird.f32 %v5461_v41 }
 0x253   :  { %4338 = vrcp.f32 %v5465_v5  ;;  %1319 = vmatpush.msra.mxu1 %v5307_v8  ;;  %1339 = vmatpush.msra.mxu2 %v5309_v38  ;;  %v948_v50 = vadd.f32 %v923_v43, %v276_v52  ;;  %v965_v52 = vand.u32 2147483648, %v5461_v41  ;;  %v984_v18 = vand.u32 2147483648, %v5465_v5 }
 0x254   :  { %1359 = vmatpush.msra.mxu3 %v5313_v26  ;;  %vm978_vm12 = vweird.f32 %v5465_v5 }
 0x255   :  { %1320 = vmatpush.msra.mxu1 %v5319_v21  ;;  %1340 = vmatpush.msra.mxu2 %v5321_v23  ;;  %v966_v9 = vor.u32 1.1754944e-38, %v965_v52 }
 0x256   :  { %v4335_v32 = vpop.eup %4334  ;;  %1360 = vmatpush.msra.mxu3 %v5325_v57 }
 0x257   :  { %v5483_v35 = vadd.f32 1.0, %v4335_v32  ;;  %1321 = vmatpush.msra.mxu1 %v5331_v54  ;;  %1341 = vmatpush.msra.mxu2 %v5333_v59  ;;  %v963_v59 = vand.u32 2147483647, %v5461_v41 }
 0x258   :  { %v4337_v4 = vpop.eup %4336  ;;  %1361 = vmatpush.msra.mxu3 %v5337_v61 }
 0x259   :  { %v4339_v8 = vpop.eup %4338  ;;  %v955_v3 = vmul.f32 %v4337_v4, %v5461_v41  ;;  %4340 = vrcp.f32 %v5483_v35  ;;  %1322 = vmatpush.msra.mxu1 %v5341_v10  ;;  %1342 = vmatpush.msra.mxu2 %v5343_v17  ;;  %vm960_vm9 = vweird.f32 %v4337_v4  ;;  %vm964_vm15 = vcmp.eq.f32.partialorder %v963_v59, 8.507059e+37 }
 0x25a   :  { %v974_v30 = vmul.f32 %v4339_v8, %v5465_v5  ;;  %4342 = vtanh.f32 %v948_v50  ;;  %1362 = vmatpush.msra.mxu3 %v5345_v62  ;;  %vm979_vm10 = vweird.f32 %v4339_v8  ;;  %vm961_vm13 = vmor %vm959_vm11, %vm960_vm9  ;;  %v1004_v58 = vand.u32 2147483648, %v5483_v35 }
 0x25b   :  { %v956_v43 = vsub.f32 1.0, %v955_v3  ;;  %1323 = vmatpush.msra.mxu1 %v5351_v51  ;;  %v982_v3 = vand.u32 2147483647, %v5465_v5  ;;  %1343 = vmatpush.msra.mxu2 %v5353_v27  ;;  %vm980_vm14 = vmor %vm978_vm12, %vm979_vm10  ;;  %vm998_vm2 = vweird.f32 %v5483_v35 }
 0x25c   :  { %v975_v32 = vsub.f32 1.0, %v974_v30  ;;  %1363 = vmatpush.msra.mxu3 %v5355_v2  ;;  %v1005_v59 = vor.u32 1.1754944e-38, %v1004_v58 }
 0x25d   :  { %v957_v54 = vmul.f32 %v4337_v4, %v956_v43  ;;  %1324 = vmatpush.msra.mxu1 %v5361_v56  ;;  %1344 = vmatpush.msra.mxu2 %v5363_v7  ;;  %vm983_vm0 = vcmp.eq.f32.partialorder %v982_v3, 8.507059e+37  ;;  %v7430_v3 = vld [vmem:[#allocation58_spill] sm:$0xff] }
 0x25e   :  { %v976_v37 = vmul.f32 %v4339_v8, %v975_v32  ;;  %1364 = vmatpush.msra.mxu3 %v5365_v29 }
 0x25f   :  { %v5508_v50 = vpop.eup %4340  ;;  %v958_v30 = vadd.f32 %v4337_v4, %v957_v54  ;;  %v985_v54 = vor.u32 1.1754944e-38, %v984_v18  ;;  %1325 = vmatpush.msra.mxu1 %v5371_v14  ;;  %1345 = vmatpush.msra.mxu2 %v5373_v28 }
 0x260   :  { %v977_v43 = vadd.f32 %v4339_v8, %v976_v37  ;;  %v994_v32 = vmul.f32 %v5508_v50, %v5483_v35  ;;  %v4343_v5 = vpop.eup %4342  ;;  %1365 = vmatpush.msra.mxu3 %v5375_v45  ;;  %vm999_vm1 = vweird.f32 %v5508_v50 }
 0x261   :  { %v962_v41 = vsel %vm961_vm13, %v4337_v4, %v958_v30  ;;  %1326 = vmatpush.msra.mxu1 %v5381_v63  ;;  %1346 = vmatpush.msra.mxu2 %v5383_v46  ;;  %vm1000_vm3 = vmor %vm998_vm2, %vm999_vm1 }
 0x262   :  { %v967_v24 = vsel %vm964_vm15, %v966_v9, %v962_v41  ;;  %v981_v52 = vsel %vm980_vm14, %v4339_v8, %v977_v43  ;;  %v995_v37 = vsub.f32 1.0, %v994_v32  ;;  %1366 = vmatpush.msra.mxu3 %v5385_v25  ;;  %v7428_v8 = vld [vmem:[#allocation56_spill] sm:$0xff]  ;;  %v7434_v32 = vld [vmem:[#allocation61_spill] sm:$0xff] }
 0x263   :  { %v986_v7 = vsel %vm983_vm0, %v985_v54, %v981_v52  ;;  %v1009_v29 = vmul.f32 %v4343_v5, %v967_v24  ;;  %1327 = vmatpush.msra.mxu1 %v5395_v39  ;;  %1347 = vmatpush.msra.mxu2 %v5397_v47  ;;  %v7433_v43 = vld [vmem:[#allocation60_spill] sm:$0xff]  ;;  %v7439_v41 = vld [vmem:[#allocation49_spill] sm:$0xff]  ;;  %v7440_v5 = vld [vmem:[#allocation50_spill] sm:$0xff] }
 0x264   :  { %v1008_v18 = vmul.f32 %v986_v7, %v5284_v6  ;;  %v996_v33 = vmul.f32 %v5508_v50, %v995_v37  ;;  %1367 = vmatpush.msra.mxu3 %v5399_v40  ;;  %v7429_v7 = vld [vmem:[#allocation57_spill] sm:$0xff]  ;;  %v7438_v54 = vld [vmem:[#allocation48_spill] sm:$0xff] }
 0x265   :  { %1328 = vmatpush.msra.mxu1 %v5405_v31  ;;  %1348 = vmatpush.msra.mxu2 %v5407_v34 }
 0x266   :  { %v5532_v4 = vadd.f32 %v1009_v29, %v1008_v18  ;;  %v997_v48 = vadd.f32 %v5508_v50, %v996_v33  ;;  %1368 = vmatpush.msra.mxu3 %v5409_v44  ;;  %v1002_v29 = vand.u32 2147483647, %v5483_v35  ;;  %v7432_v35 = vld [vmem:[#allocation59_spill] sm:$0xff] }
 0x267   :  { %1329 = vmatpush.msra.mxu1 %v5415_v19  ;;  %1349 = vmatpush.msra.mxu2 %v5417_v42 }
 0x268   :  { %4344 = vtanh.f32 %v5532_v4  ;;  %1369 = vmatpush.msra.mxu3 %v7427_v60  ;;  %v1001_v6 = vsel %vm1000_vm3, %v5508_v50, %v997_v48  ;;  %vm1003_vm4 = vcmp.eq.f32.partialorder %v1002_v29, 8.507059e+37 }
 0x269   :  { %1330 = vmatpush.msra.mxu1 %v7428_v8  ;;  %1350 = vmatpush.msra.mxu2 %v7429_v7  ;;  %v1006_v9 = vsel %vm1003_vm4, %v1005_v59, %v1001_v6 }
 0x26a   :  { %1370 = vmatpush.msra.mxu3 %v7430_v3 }
 0x26b   :  { %1331 = vmatpush.msra.mxu1 %v7432_v35  ;;  %1351 = vmatpush.msra.mxu2 %v7433_v43 }
 0x26c   :  { %1371 = vmatpush.msra.mxu3 %v7434_v32 }
 0x26d   :  { %1332 = vmatpush.msra.mxu1 %v5447_v53  ;;  %1352 = vmatpush.msra.mxu2 %v5449_v16 }
 0x26e   :  { %v4345_v30 = vpop.eup %4344  ;;  %1372 = vmatpush.msra.mxu3 %v5451_v36 }
 0x26f   :  { %v5559_v50 = vmul.f32 %v4345_v30, %v1006_v9  ;;  %1333 = vmatpush.msra.mxu1 %v5455_v55  ;;  %1353 = vmatpush.msra.mxu2 %v5457_v11 }
 0x270   :  { %1373 = vmatpush.msra.mxu3 %v5459_v13 }
 0x271   :  { %7435 = vst [vmem:[#allocation55_spill] sm:$0xff] %v5559_v50  ;;  %1098 = vmatmul.f32.vlgmr.msrb.gmra.mxu0 %v5559_v50  ;;  %1118 = vmatmul.f32.vlgmr.msrb.gmra.mxu1 %v5559_v50 }
 0x272   :  { %1138 = vmatmul.f32.vlgmr.msrb.gmra.mxu2 %v5559_v50  ;;  %1158 = vmatmul.f32.vlgmr.msrb.gmra.mxu3 %v5559_v50  ;;  %v5835_v50 = vld [vmem:[#allocation8 + $0x78] sm:$0xff] }
 0x273   :  { %1514 = vmatpush.msrb.mxu0 %v7436_v1  ;;  %1534 = vmatpush.msrb.mxu1 %v5295_v49  ;;  %v7442_v49 = vld [vmem:[#allocation52_spill] sm:$0xff]  ;;  %7465 = vst [vmem:[#allocation60_spill] sm:$0xff] %v5835_v50 }
 0x274   :  { %1554 = vmatpush.msrb.mxu2 %v7437_v12  ;;  %1574 = vmatpush.msrb.mxu3 %v7438_v54 }
 0x275   :  { %1515 = vmatpush.msrb.mxu0 %v7439_v41  ;;  %1535 = vmatpush.msrb.mxu1 %v7440_v5 }
 0x276   :  { %1555 = vmatpush.msrb.mxu2 %v5309_v38  ;;  %1575 = vmatpush.msrb.mxu3 %v5313_v26  ;;  %v7443_v38 = vld [vmem:[#allocation53_spill] sm:$0xff]  ;;  %v7444_v26 = vld [vmem:[#allocation54_spill] sm:$0xff] }
 0x277   :  { %1516 = vmatpush.msrb.mxu0 %v5317_v20  ;;  %1536 = vmatpush.msrb.mxu1 %v5319_v21  ;;  %v7450_v21 = vld [vmem:[#allocation29_spill] sm:$0xff] }
 0x278   :  { %1556 = vmatpush.msrb.mxu2 %v5321_v23  ;;  %1576 = vmatpush.msrb.mxu3 %v5325_v57 }
 0x279   :  { %1517 = vmatpush.msrb.mxu0 %v5329_v22  ;;  %1537 = vmatpush.msrb.mxu1 %v7441_v15 }
 0x27a   :  { %1557 = vmatpush.msrb.mxu2 %v7442_v49  ;;  %1577 = vmatpush.msrb.mxu3 %v5337_v61 }
 0x27b   :  { %1538 = vmatpush.msrb.mxu1 %v5341_v10 }
 0x27c   :  { %1558 = vmatpush.msrb.mxu2 %v5343_v17  ;;  %1578 = vmatpush.msrb.mxu3 %v5345_v62 }
 0x27d   :  { %1539 = vmatpush.msrb.mxu1 %v5351_v51 }
 0x27e   :  { %1559 = vmatpush.msrb.mxu2 %v5353_v27  ;;  %1579 = vmatpush.msrb.mxu3 %v5355_v2  ;;  %v7451_v2 = vld [vmem:[#allocation41_spill] sm:$0xff] }
 0x27f   :  { %1540 = vmatpush.msrb.mxu1 %v5361_v56  ;;  %v7452_v56 = vld [vmem:[#allocation23_spill] sm:$0xff] }
 0x280   :  { %1560 = vmatpush.msrb.mxu2 %v7443_v38  ;;  %1580 = vmatpush.msrb.mxu3 %v7444_v26 }
 0x281   :  { %1541 = vmatpush.msrb.mxu1 %v5371_v14 }
 0x282   :  { %1561 = vmatpush.msrb.mxu2 %v5373_v28  ;;  %1581 = vmatpush.msrb.mxu3 %v5375_v45 }
 0x283   :  { %1542 = vmatpush.msrb.mxu1 %v5381_v63 }
 0x284   :  { %1562 = vmatpush.msrb.mxu2 %v5383_v46  ;;  %1582 = vmatpush.msrb.mxu3 %v5385_v25  ;;  %v7445_v25 = vld [vmem:[#allocation36_spill] sm:$0xff] }
 0x285   :  { %1543 = vmatpush.msrb.mxu1 %v5395_v39 }
 0x286   :  { %1563 = vmatpush.msrb.mxu2 %v5397_v47  ;;  %1583 = vmatpush.msrb.mxu3 %v5399_v40  ;;  %v7447_v40 = vld [vmem:[#allocation35_spill] sm:$0xff] }
 0x287   :  { %1544 = vmatpush.msrb.mxu1 %v5405_v31  ;;  %v279_v31 = vadd.f32 %v7452_v56, %v7451_v2 }
 0x288   :  { %1564 = vmatpush.msrb.mxu2 %v5407_v34  ;;  %1584 = vmatpush.msrb.mxu3 %v5409_v44  ;;  %v7446_v34 = vld [vmem:[#allocation24_spill] sm:$0xff]  ;;  %v7448_v44 = vld [vmem:[#allocation43_spill] sm:$0xff] }
 0x289   :  { %1545 = vmatpush.msrb.mxu1 %v5415_v19  ;;  %v238_v39 = vadd.f32 %v7446_v34, %v7445_v25  ;;  %v197_v45 = vadd.f32 %v7448_v44, %v7447_v40 }
 0x28a   :  { %1565 = vmatpush.msrb.mxu2 %v5417_v42  ;;  %1585 = vmatpush.msrb.mxu3 %v7427_v60 }
 0x28b   :  { %1546 = vmatpush.msrb.mxu1 %v7428_v8 }
 0x28c   :  { %1566 = vmatpush.msrb.mxu2 %v7429_v7  ;;  %1586 = vmatpush.msrb.mxu3 %v7430_v3 }
 0x28d   :  { %1547 = vmatpush.msrb.mxu1 %v7432_v35 }
 0x28e   :  { %1567 = vmatpush.msrb.mxu2 %v7433_v43  ;;  %1587 = vmatpush.msrb.mxu3 %v7434_v32 }
 0x28f   :  { %1548 = vmatpush.msrb.mxu1 %v5447_v53 }
 0x290   :  { %1568 = vmatpush.msrb.mxu2 %v5449_v16  ;;  %1588 = vmatpush.msrb.mxu3 %v5451_v36  ;;  %v7449_v36 = vld [vmem:[#allocation40_spill] sm:$0xff] }
 0x291   :  { %1549 = vmatpush.msrb.mxu1 %v5455_v55  ;;  %v320_v23 = vadd.f32 %v7450_v21, %v7449_v36 }
 0x292   :  { %1569 = vmatpush.msrb.mxu2 %v5457_v11  ;;  %1589 = vmatpush.msrb.mxu3 %v5459_v13 }
 0x2ee   :  { %v1099_v46 = vpop.f32.mrf.mxu0  ;;  %v1119_v47 = vpop.f32.mrf.mxu1 }
 0x2ef   :  { %v1162_v63 = vadd.f32 %v1099_v46, %v197_v45  ;;  %v1163_v28 = vadd.f32 %v1119_v47, %v238_v39  ;;  %v5646_v45 = vld [vmem:[#allocation8 + $0x140] sm:$0xff] }
 0x2f0   :  { %v5649_v46 = vld [vmem:[#allocation8 + $0x120] sm:$0xff] }
 0x2f1   :  { %v4239_v14 = vmul.f32 -1.442695, %v1162_v63  ;;  %v4240_v20 = vmul.f32 -1.442695, %v1163_v28  ;;  %v5652_v47 = vld [vmem:[#allocation8 + $0x100] sm:$0xff] }
 0x2f2   :  { %v5655_v63 = vld [vmem:[#allocation8 + $0xe0] sm:$0xff] }
 0x2f3   :  { %4346 = vpow2.f32 %v4239_v14  ;;  %v7454_v28 = vld [vmem:[#allocation19_spill] sm:$0xff] }
 0x2f4   :  { %4348 = vpow2.f32 %v4240_v20  ;;  %v200_v14 = vadd.f32 %v7454_v28, %v7447_v40  ;;  %v7455_v20 = vld [vmem:[#allocation26_spill] sm:$0xff] }
 0x2f5   :  { %v1159_v11 = vpop.f32.mrf.mxu3  ;;  %v1139_v51 = vpop.f32.mrf.mxu2  ;;  %v241_v21 = vadd.f32 %v7455_v20, %v7445_v25 }
 0x2f6   :  { %v1165_v57 = vadd.f32 %v1159_v11, %v320_v23  ;;  %v1164_v55 = vadd.f32 %v1139_v51, %v279_v31  ;;  %v5668_v51 = vld [vmem:[#allocation8 + $0x80] sm:$0xff] }
 0x2f7   :  { %v5673_v31 = vld [vmem:[#allocation8 + $0x60] sm:$0xff] }
 0x2f8   :  { %v4241_v22 = vmul.f32 -1.442695, %v1165_v57  ;;  %v5662_v57 = vld [vmem:[#allocation8 + $0xc0] sm:$0xff] }
 0x2f9   :  { %v4347_v61 = vpop.eup %4346 }
 0x2fa   :  { %v4349_v10 = vpop.eup %4348  ;;  %v1169_v17 = vadd.f32 1.0, %v4347_v61  ;;  %4350 = vpow2.f32 %v4241_v22 }
 0x2fb   :  { %v1188_v62 = vadd.f32 1.0, %v4349_v10  ;;  %v5665_v10 = vld [vmem:[#allocation8 + $0xa0] sm:$0xff] }
 0x2fc   :  { %4352 = vrcp.f32 %v1169_v17  ;;  %v1181_v37 = vand.u32 2147483648, %v1169_v17  ;;  %v1179_v48 = vand.u32 2147483647, %v1169_v17  ;;  %vm1175_vm7 = vweird.f32 %v1169_v17 }
 0x2fd   :  { %4354 = vrcp.f32 %v1188_v62  ;;  %v1200_v18 = vand.u32 2147483648, %v1188_v62  ;;  %v1198_v29 = vand.u32 2147483647, %v1188_v62  ;;  %vm1194_vm8 = vweird.f32 %v1188_v62 }
 0x2fe   :  { %v1182_v8 = vor.u32 1.1754944e-38, %v1181_v37  ;;  %vm1180_vm11 = vcmp.eq.f32.partialorder %v1179_v48, 8.507059e+37 }
 0x2ff   :  { %v1201_v3 = vor.u32 1.1754944e-38, %v1200_v18  ;;  %vm1199_vm12 = vcmp.eq.f32.partialorder %v1198_v29, 8.507059e+37 }
 0x300   :  { %v4351_v27 = vpop.eup %4350 }
 0x301   :  { %v1208_v19 = vadd.f32 1.0, %v4351_v27  ;;  %v7456_v27 = vld [vmem:[#allocation32_spill] sm:$0xff] }
 0x302   :  { %v4353_v42 = vpop.eup %4352  ;;  %v323_v56 = vadd.f32 %v7456_v27, %v7449_v36 }
 0x303   :  { %v4355_v53 = vpop.eup %4354  ;;  %v1171_v16 = vmul.f32 %v4353_v42, %v1169_v17  ;;  %4356 = vrcp.f32 %v1208_v19  ;;  %vm1176_vm5 = vweird.f32 %v4353_v42  ;;  %v1220_v15 = vand.u32 2147483648, %v1208_v19 }
 0x304   :  { %v1190_v13 = vmul.f32 %v4355_v53, %v1188_v62  ;;  %4358 = vtanh.f32 %v1164_v55  ;;  %vm1195_vm6 = vweird.f32 %v4355_v53  ;;  %vm1177_vm9 = vmor %vm1175_vm7, %vm1176_vm5  ;;  %vm1214_vm14 = vweird.f32 %v1208_v19  ;;  %v5676_v55 = vld [vmem:[#allocation8 + $0x40] sm:$0xff] }
 0x305   :  { %v1172_v24 = vsub.f32 1.0, %v1171_v16  ;;  %vm1196_vm10 = vmor %vm1194_vm8, %vm1195_vm6  ;;  %v1218_v49 = vand.u32 2147483647, %v1208_v19  ;;  %v1221_v26 = vor.u32 1.1754944e-38, %v1220_v15  ;;  %7457 = vst [vmem:[#allocation57_spill] sm:$0xff] %v5676_v55  ;;  %v5679_v16 = vld [vmem:[#allocation8 + $0x20] sm:$0xff] }
 0x306   :  { %v1191_v52 = vsub.f32 1.0, %v1190_v13 }
 0x307   :  { %v1173_v33 = vmul.f32 %v4353_v42, %v1172_v24  ;;  %vm1219_vm0 = vcmp.eq.f32.partialorder %v1218_v49, 8.507059e+37  ;;  %v5682_v24 = vld [vmem:[#allocation8] sm:$0xff] }
 0x308   :  { %v1192_v58 = vmul.f32 %v4355_v53, %v1191_v52 }
 0x309   :  { %v4357_v60 = vpop.eup %4356  ;;  %v1174_v6 = vadd.f32 %v4353_v42, %v1173_v33 }
 0x30a   :  { %v1193_v59 = vadd.f32 %v4355_v53, %v1192_v58  ;;  %v1210_v7 = vmul.f32 %v4357_v60, %v1208_v19  ;;  %v4359_v35 = vpop.eup %4358  ;;  %vm1215_vm13 = vweird.f32 %v4357_v60  ;;  %v7458_v58 = vld [vmem:[#allocation25_spill] sm:$0xff] }
 0x30b   :  { %v1178_v0 = vsel %vm1177_vm9, %v4353_v42, %v1174_v6  ;;  %vm1216_vm15 = vmor %vm1214_vm14, %vm1215_vm13  ;;  %v282_v29 = vadd.f32 %v7458_v58, %v7451_v2  ;;  %v5713_v58 = vld [vmem:[#allocation8 + $0x1d0] sm:$0xff] }
 0x30c   :  { %v1183_v30 = vsel %vm1180_vm11, %v1182_v8, %v1178_v0  ;;  %v1197_v9 = vsel %vm1196_vm10, %v4355_v53, %v1193_v59  ;;  %v1211_v43 = vsub.f32 1.0, %v1210_v7 }
 0x30d   :  { %v1202_v32 = vsel %vm1199_vm12, %v1201_v3, %v1197_v9  ;;  %v1225_v1 = vmul.f32 %v4359_v35, %v1183_v30 }
 0x30e   :  { %v1224_v12 = vmul.f32 %v1202_v32, %v5532_v4  ;;  %v1212_v54 = vmul.f32 %v4357_v60, %v1211_v43  ;;  %v5643_v4 = vld [vmem:[#allocation8 + $0x160] sm:$0xff] }
 0x30f   :  { %1518 = vmatpush.msrb.mxu0 %v5643_v4 }
 0x310   :  { %v5634_v41 = vadd.f32 %v1225_v1, %v1224_v12  ;;  %v1213_v5 = vadd.f32 %v4357_v60, %v1212_v54 }
 0x311   :  { %1519 = vmatpush.msrb.mxu0 %v5646_v45 }
 0x312   :  { %4360 = vtanh.f32 %v5634_v41  ;;  %v1217_v38 = vsel %vm1216_vm15, %v4357_v60, %v1213_v5 }
 0x313   :  { %v1222_v39 = vsel %vm1219_vm0, %v1221_v26, %v1217_v38  ;;  %1520 = vmatpush.msrb.mxu0 %v5649_v46 }
 0x315   :  { %1521 = vmatpush.msrb.mxu0 %v5652_v47 }
 0x317   :  { %1522 = vmatpush.msrb.mxu0 %v5655_v63 }
 0x318   :  { %v4361_v34 = vpop.eup %4360 }
 0x319   :  { %v5637_v44 = vmul.f32 %v4361_v34, %v1222_v39  ;;  %1523 = vmatpush.msrb.mxu0 %v5662_v57 }
 0x31b   :  { %7453 = vst [vmem:[#allocation56_spill] sm:$0xff] %v5637_v44  ;;  %1314 = vmatmul.f32.vlgmr.msra.gmra.mxu0 %v5637_v44  ;;  %1334 = vmatmul.f32.vlgmr.msra.gmra.mxu1 %v5637_v44 }
 0x31c   :  { %1354 = vmatmul.f32.vlgmr.msra.gmra.mxu2 %v5637_v44  ;;  %1374 = vmatmul.f32.vlgmr.msra.gmra.mxu3 %v5637_v44  ;;  %v5833_v44 = vld [vmem:[#allocation8 + $0x70] sm:$0xff] }
 0x31d   :  { %1524 = vmatpush.msrb.mxu0 %v5665_v10  ;;  %7464 = vst [vmem:[#allocation59_spill] sm:$0xff] %v5833_v44 }
 0x31f   :  { %1525 = vmatpush.msrb.mxu0 %v5668_v51 }
 0x321   :  { %1526 = vmatpush.msrb.mxu0 %v5673_v31 }
 0x323   :  { %1527 = vmatpush.msrb.mxu0 %v5676_v55 }
 0x325   :  { %1528 = vmatpush.msrb.mxu0 %v5679_v16 }
 0x327   :  { %1529 = vmatpush.msrb.mxu0 %v5682_v24 }
 0x398   :  { %v1315_v23 = vpop.f32.mrf.mxu0  ;;  %v1335_v11 = vpop.f32.mrf.mxu1 }
 0x399   :  { %v1378_v22 = vadd.f32 %v1315_v23, %v200_v14  ;;  %v1379_v61 = vadd.f32 %v1335_v11, %v241_v21 }
 0x39b   :  { %v4242_v17 = vmul.f32 -1.442695, %v1378_v22  ;;  %v4243_v62 = vmul.f32 -1.442695, %v1379_v61 }
 0x39d   :  { %4362 = vpow2.f32 %v4242_v17 }
 0x39e   :  { %4364 = vpow2.f32 %v4243_v62 }
 0x39f   :  { %v1375_v19 = vpop.f32.mrf.mxu3  ;;  %v1355_v33 = vpop.f32.mrf.mxu2 }
 0x3a0   :  { %v1381_v42 = vadd.f32 %v1375_v19, %v323_v56  ;;  %v1380_v8 = vadd.f32 %v1355_v33, %v282_v29  ;;  %v5709_v33 = vld [vmem:[#allocation8 + $0x1c0] sm:$0xff]  ;;  %v5717_v29 = vld [vmem:[#allocation8 + $0x1d8] sm:$0xff] }
 0x3a2   :  { %v4244_v53 = vmul.f32 -1.442695, %v1381_v42 }
 0x3a3   :  { %v4363_v13 = vpop.eup %4362 }
 0x3a4   :  { %v4365_v52 = vpop.eup %4364  ;;  %v1385_v37 = vadd.f32 1.0, %v4363_v13  ;;  %4366 = vpow2.f32 %v4244_v53 }
 0x3a5   :  { %v1404_v18 = vadd.f32 1.0, %v4365_v52  ;;  %v5699_v52 = vld [vmem:[#allocation8 + $0x1e8] sm:$0xff] }
 0x3a6   :  { %4368 = vrcp.f32 %v1385_v37  ;;  %v1397_v30 = vand.u32 2147483648, %v1385_v37  ;;  %v1395_v32 = vand.u32 2147483647, %v1385_v37  ;;  %vm1391_vm3 = vweird.f32 %v1385_v37  ;;  %1750 = vmatpush.msra.mxu1 %v5699_v52 }
 0x3a7   :  { %4370 = vrcp.f32 %v1404_v18  ;;  %v1416_v9 = vand.u32 2147483648, %v1404_v18  ;;  %v1414_v12 = vand.u32 2147483647, %v1404_v18  ;;  %vm1410_vm4 = vweird.f32 %v1404_v18 }
 0x3a8   :  { %v1398_v15 = vor.u32 1.1754944e-38, %v1397_v30  ;;  %vm1396_vm7 = vcmp.eq.f32.partialorder %v1395_v32, 8.507059e+37  ;;  %v5745_v30 = vld [vmem:[#allocation8 + $0x168] sm:$0xff] }
 0x3a9   :  { %v1417_v26 = vor.u32 1.1754944e-38, %v1416_v9  ;;  %vm1415_vm8 = vcmp.eq.f32.partialorder %v1414_v12, 8.507059e+37  ;;  %v5747_v9 = vld [vmem:[#allocation8 + $0x170] sm:$0xff]  ;;  %v5755_v32 = vld [vmem:[#allocation8 + $0x148] sm:$0xff]  ;;  %v5759_v12 = vld [vmem:[#allocation8 + $0x158] sm:$0xff] }
 0x3aa   :  { %v4367_v48 = vpop.eup %4366 }
 0x3ab   :  { %v1424_v60 = vadd.f32 1.0, %v4367_v48  ;;  %v5711_v48 = vld [vmem:[#allocation8 + $0x1c8] sm:$0xff] }
 0x3ac   :  { %v4369_v6 = vpop.eup %4368  ;;  %1751 = vmatpush.msra.mxu1 %v5711_v48 }
 0x3ad   :  { %v4371_v59 = vpop.eup %4370  ;;  %v1387_v7 = vmul.f32 %v4369_v6, %v1385_v37  ;;  %4372 = vrcp.f32 %v1424_v60  ;;  %vm1392_vm1 = vweird.f32 %v4369_v6  ;;  %v1436_v62 = vand.u32 2147483648, %v1424_v60  ;;  %v5701_v37 = vld [vmem:[#allocation8 + $0x1f0] sm:$0xff] }
 0x3ae   :  { %v1406_v3 = vmul.f32 %v4371_v59, %v1404_v18  ;;  %4374 = vtanh.f32 %v1380_v8  ;;  %vm1411_vm2 = vweird.f32 %v4371_v59  ;;  %vm1393_vm5 = vmor %vm1391_vm3, %vm1392_vm1  ;;  %vm1430_vm10 = vweird.f32 %v1424_v60  ;;  %v5705_v18 = vld [vmem:[#allocation8 + $0x1f8] sm:$0xff]  ;;  %1770 = vmatpush.msra.mxu2 %v5701_v37  ;;  %v5725_v8 = vld [vmem:[#allocation8 + $0x1b0] sm:$0xff] }
 0x3af   :  { %v1388_v0 = vsub.f32 1.0, %v1387_v7  ;;  %vm1412_vm6 = vmor %vm1410_vm4, %vm1411_vm2  ;;  %v1434_v27 = vand.u32 2147483647, %v1424_v60  ;;  %v1437_v19 = vor.u32 1.1754944e-38, %v1436_v62  ;;  %1790 = vmatpush.msra.mxu3 %v5705_v18  ;;  %v5733_v7 = vld [vmem:[#allocation8 + $0x180] sm:$0xff]  ;;  %v5801_v62 = vld [vmem:[#allocation8 + $0xd0] sm:$0xff] }
 0x3b0   :  { %v1407_v35 = vsub.f32 1.0, %v1406_v3  ;;  %1771 = vmatpush.msra.mxu2 %v5713_v58  ;;  %v5735_v3 = vld [vmem:[#allocation8 + $0x188] sm:$0xff] }
 0x3b1   :  { %v1389_v43 = vmul.f32 %v4369_v6, %v1388_v0  ;;  %vm1435_vm12 = vcmp.eq.f32.partialorder %v1434_v27, 8.507059e+37  ;;  %1791 = vmatpush.msra.mxu3 %v5717_v29  ;;  %v5737_v0 = vld [vmem:[#allocation8 + $0x190] sm:$0xff]  ;;  %v5803_v27 = vld [vmem:[#allocation8 + $0xd8] sm:$0xff] }
 0x3b2   :  { %v1408_v1 = vmul.f32 %v4371_v59, %v1407_v35  ;;  %1772 = vmatpush.msra.mxu2 %v5725_v8  ;;  %v5741_v35 = vld [vmem:[#allocation8 + $0x198] sm:$0xff] }
 0x3b3   :  { %v4373_v54 = vpop.eup %4372  ;;  %v1390_v5 = vadd.f32 %v4369_v6, %v1389_v43  ;;  %v5749_v43 = vld [vmem:[#allocation8 + $0x178] sm:$0xff] }
 0x3b4   :  { %v1409_v49 = vadd.f32 %v4371_v59, %v1408_v1  ;;  %v1426_v38 = vmul.f32 %v4373_v54, %v1424_v60  ;;  %v4375_v39 = vpop.eup %4374  ;;  %vm1431_vm9 = vweird.f32 %v4373_v54  ;;  %v5721_v60 = vld [vmem:[#allocation8 + $0x1a0] sm:$0xff]  ;;  %1773 = vmatpush.msra.mxu2 %v5737_v0  ;;  %v5757_v1 = vld [vmem:[#allocation8 + $0x150] sm:$0xff] }
 0x3b5   :  { %v1394_v34 = vsel %vm1393_vm5, %v4369_v6, %v1390_v5  ;;  %vm1432_vm11 = vmor %vm1430_vm10, %vm1431_vm9  ;;  %v5723_v6 = vld [vmem:[#allocation8 + $0x1a8] sm:$0xff]  ;;  %v5767_v5 = vld [vmem:[#allocation8 + $0x130] sm:$0xff] }
 0x3b6   :  { %v1399_v28 = vsel %vm1396_vm7, %v1398_v15, %v1394_v34  ;;  %v1413_v14 = vsel %vm1412_vm6, %v4371_v59, %v1409_v49  ;;  %v1427_v20 = vsub.f32 1.0, %v1426_v38  ;;  %1752 = vmatpush.msra.mxu1 %v5723_v6  ;;  %v5729_v59 = vld [vmem:[#allocation8 + $0x1b8] sm:$0xff]  ;;  %1774 = vmatpush.msra.mxu2 %v5747_v9  ;;  %v5775_v49 = vld [vmem:[#allocation8 + $0x108] sm:$0xff]  ;;  %v5777_v38 = vld [vmem:[#allocation8 + $0x110] sm:$0xff] }
 0x3b7   :  { %v1418_v21 = vsel %vm1415_vm8, %v1417_v26, %v1413_v14  ;;  %v1441_v23 = vmul.f32 %v4375_v39, %v1399_v28  ;;  %1792 = vmatpush.msra.mxu3 %v5729_v59  ;;  %v5769_v15 = vld [vmem:[#allocation8 + $0x138] sm:$0xff]  ;;  %v5785_v34 = vld [vmem:[#allocation8 + $0xe8] sm:$0xff]  ;;  %v5787_v39 = vld [vmem:[#allocation8 + $0xf0] sm:$0xff] }
 0x3b8   :  { %v1440_v11 = vmul.f32 %v1418_v21, %v5634_v41  ;;  %v1428_v22 = vmul.f32 %v4373_v54, %v1427_v20  ;;  %v5697_v41 = vld [vmem:[#allocation8 + $0x1e0] sm:$0xff]  ;;  %1753 = vmatpush.msra.mxu1 %v5735_v3  ;;  %1775 = vmatpush.msra.mxu2 %v5757_v1  ;;  %v5779_v26 = vld [vmem:[#allocation8 + $0x118] sm:$0xff]  ;;  %v7460_v14 = vld [vmem:[#allocation20_spill] sm:$0xff] }
 0x3b9   :  { %1730 = vmatpush.msra.mxu0 %v5697_v41  ;;  %1793 = vmatpush.msra.mxu3 %v5741_v35  ;;  %v5789_v28 = vld [vmem:[#allocation8 + $0xf8] sm:$0xff]  ;;  %v203_v20 = vadd.f32 %v7460_v14, %v7447_v40  ;;  %v7461_v21 = vld [vmem:[#allocation28_spill] sm:$0xff] }
 0x3ba   :  { %v5688_v61 = vadd.f32 %v1441_v23, %v1440_v11  ;;  %v1429_v17 = vadd.f32 %v4373_v54, %v1428_v22  ;;  %1754 = vmatpush.msra.mxu1 %v5745_v30  ;;  %1776 = vmatpush.msra.mxu2 %v5767_v5  ;;  %v244_v23 = vadd.f32 %v7461_v21, %v7445_v25  ;;  %v5813_v14 = vld [vmem:[#allocation8 + $0xb8] sm:$0xff] }
 0x3bb   :  { %1731 = vmatpush.msra.mxu0 %v5709_v33  ;;  %1794 = vmatpush.msra.mxu3 %v5749_v43 }
 0x3bc   :  { %4376 = vtanh.f32 %v5688_v61  ;;  %v1433_v56 = vsel %vm1432_vm11, %v4373_v54, %v1429_v17  ;;  %1755 = vmatpush.msra.mxu1 %v5755_v32  ;;  %v5765_v54 = vld [vmem:[#allocation8 + $0x128] sm:$0xff]  ;;  %1777 = vmatpush.msra.mxu2 %v5777_v38 }
 0x3bd   :  { %v1438_v53 = vsel %vm1435_vm12, %v1437_v19, %v1433_v56  ;;  %1732 = vmatpush.msra.mxu0 %v5721_v60  ;;  %1795 = vmatpush.msra.mxu3 %v5759_v12  ;;  %v5799_v17 = vld [vmem:[#allocation8 + $0xc8] sm:$0xff] }
 0x3be   :  { %1756 = vmatpush.msra.mxu1 %v5765_v54  ;;  %1778 = vmatpush.msra.mxu2 %v5787_v39 }
 0x3bf   :  { %1733 = vmatpush.msra.mxu0 %v5733_v7  ;;  %1796 = vmatpush.msra.mxu3 %v5769_v15 }
 0x3c0   :  { %1757 = vmatpush.msra.mxu1 %v5775_v49  ;;  %1779 = vmatpush.msra.mxu2 %v5801_v62 }
 0x3c1   :  { %1734 = vmatpush.msra.mxu0 %v5643_v4  ;;  %1797 = vmatpush.msra.mxu3 %v5779_v26 }
 0x3c2   :  { %v4377_v42 = vpop.eup %4376  ;;  %1758 = vmatpush.msra.mxu1 %v5785_v34 }
 0x3c3   :  { %v5691_v13 = vmul.f32 %v4377_v42, %v1438_v53  ;;  %1735 = vmatpush.msra.mxu0 %v5646_v45  ;;  %1798 = vmatpush.msra.mxu3 %v5789_v28  ;;  %v5809_v42 = vld [vmem:[#allocation8 + $0xa8] sm:$0xff]  ;;  %v5811_v53 = vld [vmem:[#allocation8 + $0xb0] sm:$0xff] }
 0x3c4   :  { %1759 = vmatpush.msra.mxu1 %v5799_v17  ;;  %1780 = vmatpush.msra.mxu2 %v5811_v53 }
 0x3c5   :  { %7459 = vst [vmem:[#allocation58_spill] sm:$0xff] %v5691_v13  ;;  %1530 = vmatmul.f32.vlgmr.msrb.gmra.mxu0 %v5691_v13  ;;  %1550 = vmatmul.f32.vlgmr.msrb.gmra.mxu1 %v5691_v13 }
 0x3c6   :  { %1570 = vmatmul.f32.vlgmr.msrb.gmra.mxu2 %v5691_v13  ;;  %1590 = vmatmul.f32.vlgmr.msrb.gmra.mxu3 %v5691_v13 }
 0x3c7   :  { %1736 = vmatpush.msra.mxu0 %v5649_v46  ;;  %1799 = vmatpush.msra.mxu3 %v5803_v27 }
 0x3c8   :  { %1760 = vmatpush.msra.mxu1 %v5809_v42 }
 0x3c9   :  { %1737 = vmatpush.msra.mxu0 %v5652_v47  ;;  %1800 = vmatpush.msra.mxu3 %v5813_v14 }
 0x3cb   :  { %1738 = vmatpush.msra.mxu0 %v5655_v63 }
 0x3cd   :  { %1739 = vmatpush.msra.mxu0 %v5662_v57 }
 0x3cf   :  { %1740 = vmatpush.msra.mxu0 %v5665_v10 }
 0x3d1   :  { %1741 = vmatpush.msra.mxu0 %v5668_v51 }
 0x3d3   :  { %1742 = vmatpush.msra.mxu0 %v5673_v31 }
 0x3d5   :  { %1743 = vmatpush.msra.mxu0 %v5676_v55  ;;  %v5861_v55 = vld [vmem:[#allocation8 + $0x10] sm:$0xff] }
 0x3d6   :  { %7469 = vst [vmem:[#allocation48_spill] sm:$0xff] %v5861_v55 }
 0x3d7   :  { %1744 = vmatpush.msra.mxu0 %v5679_v16 }
 0x3d9   :  { %1745 = vmatpush.msra.mxu0 %v5682_v24 }
 0x3db   :  { %1946 = vmatpush.msrb.mxu0 %v5697_v41 }
 0x3dd   :  { %1947 = vmatpush.msrb.mxu0 %v5709_v33 }
 0x3df   :  { %1948 = vmatpush.msrb.mxu0 %v5721_v60 }
 0x3e1   :  { %1949 = vmatpush.msrb.mxu0 %v5733_v7 }
 0x3e3   :  { %1950 = vmatpush.msrb.mxu0 %v5643_v4 }
 0x3e5   :  { %1951 = vmatpush.msrb.mxu0 %v5646_v45 }
 0x3e7   :  { %1952 = vmatpush.msrb.mxu0 %v5649_v46 }
 0x3e9   :  { %1953 = vmatpush.msrb.mxu0 %v5652_v47 }
 0x3eb   :  { %1954 = vmatpush.msrb.mxu0 %v5655_v63 }
 0x3ed   :  { %1955 = vmatpush.msrb.mxu0 %v5662_v57 }
 0x3ef   :  { %1956 = vmatpush.msrb.mxu0 %v5665_v10 }
 0x3f1   :  { %1957 = vmatpush.msrb.mxu0 %v5668_v51  ;;  %v7474_v51 = vld [vmem:[#allocation57_spill] sm:$0xff] }
 0x3f3   :  { %1958 = vmatpush.msrb.mxu0 %v5673_v31  ;;  %v7478_v31 = vld [vmem:[#allocation48_spill] sm:$0xff] }
 0x3f5   :  { %1959 = vmatpush.msrb.mxu0 %v7474_v51  ;;  %v2127_v51 = vld [vmem:[#allocation10 + $0xc8] sm:$0xff] }
 0x3f7   :  { %1960 = vmatpush.msrb.mxu0 %v5679_v16  ;;  %v2162_v16 = vld [vmem:[#allocation10 + $0x1e0] sm:$0xff] }
 0x3f9   :  { %1961 = vmatpush.msrb.mxu0 %v5682_v24  ;;  %v2161_v24 = vld [vmem:[#allocation10 + $0x1d8] sm:$0xff] }
 0x442   :  { %v1531_v11 = vpop.f32.mrf.mxu0  ;;  %v1551_v22 = vpop.f32.mrf.mxu1 }
 0x443   :  { %v1594_v56 = vadd.f32 %v1531_v11, %v203_v20  ;;  %v1595_v19 = vadd.f32 %v1551_v22, %v244_v23  ;;  %v5819_v20 = vld [vmem:[#allocation8 + $0x88] sm:$0xff]  ;;  %v5821_v23 = vld [vmem:[#allocation8 + $0x90] sm:$0xff]  ;;  %v5823_v11 = vld [vmem:[#allocation8 + $0x98] sm:$0xff] }
 0x444   :  { %1761 = vmatpush.msra.mxu1 %v5819_v20  ;;  %v7462_v22 = vld [vmem:[#allocation37_spill] sm:$0xff]  ;;  %1781 = vmatpush.msra.mxu2 %v5821_v23 }
 0x445   :  { %v4245_v21 = vmul.f32 -1.442695, %v1594_v56  ;;  %v4246_v13 = vmul.f32 -1.442695, %v1595_v19  ;;  %v326_v56 = vadd.f32 %v7462_v22, %v7449_v36  ;;  %1801 = vmatpush.msra.mxu3 %v5823_v11  ;;  %v5831_v19 = vld [vmem:[#allocation8 + $0x68] sm:$0xff]  ;;  %v5843_v22 = vld [vmem:[#allocation8 + $0x50] sm:$0xff] }
 0x446   :  { %7463 = vst [vmem:[#allocation44_spill] sm:$0xff] %v5831_v19  ;;  %1762 = vmatpush.msra.mxu1 %v5831_v19  ;;  %1782 = vmatpush.msra.mxu2 %v5833_v44  ;;  %v5845_v36 = vld [vmem:[#allocation8 + $0x58] sm:$0xff]  ;;  %v5859_v19 = vld [vmem:[#allocation8 + $0x8] sm:$0xff] }
 0x447   :  { %4378 = vpow2.f32 %v4245_v21  ;;  %1802 = vmatpush.msra.mxu3 %v5835_v50  ;;  %7467 = vst [vmem:[#allocation46_spill] sm:$0xff] %v5843_v22  ;;  %v5855_v50 = vld [vmem:[#allocation8 + $0x38] sm:$0xff] }
 0x448   :  { %4380 = vpow2.f32 %v4246_v13  ;;  %v5841_v13 = vld [vmem:[#allocation8 + $0x48] sm:$0xff]  ;;  %7468 = vst [vmem:[#allocation47_spill] sm:$0xff] %v5845_v36  ;;  %1783 = vmatpush.msra.mxu2 %v5843_v22 }
 0x449   :  { %v1591_v25 = vpop.f32.mrf.mxu3  ;;  %7466 = vst [vmem:[#allocation61_spill] sm:$0xff] %v5841_v13  ;;  %1763 = vmatpush.msra.mxu1 %v5841_v13  ;;  %1803 = vmatpush.msra.mxu3 %v5845_v36 }
 0x44a   :  { %v1597_v21 = vadd.f32 %v1591_v25, %v326_v56  ;;  %v5851_v25 = vld [vmem:[#allocation8 + $0x28] sm:$0xff]  ;;  %v5853_v56 = vld [vmem:[#allocation8 + $0x30] sm:$0xff] }
 0x44b   :  { %1764 = vmatpush.msra.mxu1 %v5851_v25  ;;  %1784 = vmatpush.msra.mxu2 %v5853_v56 }
 0x44c   :  { %v4247_v40 = vmul.f32 -1.442695, %v1597_v21  ;;  %v5863_v21 = vld [vmem:[#allocation8 + $0x18] sm:$0xff]  ;;  %1804 = vmatpush.msra.mxu3 %v5855_v50 }
 0x44d   :  { %v4379_v44 = vpop.eup %4378  ;;  %1765 = vmatpush.msra.mxu1 %v5859_v19  ;;  %1785 = vmatpush.msra.mxu2 %v5861_v55 }
 0x44e   :  { %v4381_v22 = vpop.eup %4380  ;;  %v5865_v13 = vadd.f32 1.0, %v4379_v44  ;;  %4382 = vpow2.f32 %v4247_v40  ;;  %1805 = vmatpush.msra.mxu3 %v5863_v21  ;;  %v1571_v40 = vpop.f32.mrf.mxu2 }
 0x44f   :  { %v5869_v36 = vadd.f32 1.0, %v4381_v22  ;;  %1966 = vmatpush.msrb.mxu1 %v5699_v52  ;;  %1986 = vmatpush.msrb.mxu2 %v5701_v37  ;;  %v7470_v22 = vld [vmem:[#allocation27_spill] sm:$0xff] }
 0x450   :  { %4384 = vrcp.f32 %v5865_v13  ;;  %2006 = vmatpush.msrb.mxu3 %v5705_v18  ;;  %v285_v55 = vadd.f32 %v7470_v22, %v7451_v2  ;;  %vm1607_vm15 = vweird.f32 %v5865_v13  ;;  %v2146_v22 = vld [vmem:[#allocation10 + $0x160] sm:$0xff] }
 0x451   :  { %4386 = vrcp.f32 %v5869_v36  ;;  %1967 = vmatpush.msrb.mxu1 %v5711_v48  ;;  %1987 = vmatpush.msrb.mxu2 %v5713_v58  ;;  %v1632_v60 = vand.u32 2147483648, %v5869_v36  ;;  %vm1626_vm0 = vweird.f32 %v5869_v36 }
 0x452   :  { %2007 = vmatpush.msrb.mxu3 %v5717_v29  ;;  %v1596_v37 = vadd.f32 %v1571_v40, %v285_v55  ;;  %v1613_v29 = vand.u32 2147483648, %v5865_v13  ;;  %v2152_v40 = vld [vmem:[#allocation10 + $0x190] sm:$0xff] }
 0x453   :  { %1968 = vmatpush.msrb.mxu1 %v5723_v6  ;;  %1988 = vmatpush.msrb.mxu2 %v5725_v8  ;;  %v1611_v8 = vand.u32 2147483647, %v5865_v13 }
 0x454   :  { %v4383_v44 = vpop.eup %4382  ;;  %2008 = vmatpush.msrb.mxu3 %v5729_v59  ;;  %v1630_v59 = vand.u32 2147483647, %v5869_v36  ;;  %v1614_v45 = vor.u32 1.1754944e-38, %v1613_v29  ;;  %v2149_v29 = vld [vmem:[#allocation10 + $0x178] sm:$0xff] }
 0x455   :  { %v5887_v41 = vadd.f32 1.0, %v4383_v44  ;;  %1969 = vmatpush.msrb.mxu1 %v5735_v3  ;;  %1989 = vmatpush.msrb.mxu2 %v5737_v0  ;;  %vm1612_vm3 = vcmp.eq.f32.partialorder %v1611_v8, 8.507059e+37  ;;  %v2153_v44 = vld [vmem:[#allocation10 + $0x198] sm:$0xff]  ;;  %v2142_v8 = vld [vmem:[#allocation10 + $0x140] sm:$0xff] }
 0x456   :  { %v4385_v52 = vpop.eup %4384  ;;  %2009 = vmatpush.msrb.mxu3 %v5741_v35  ;;  %vm1631_vm4 = vcmp.eq.f32.partialorder %v1630_v59, 8.507059e+37  ;;  %v2144_v59 = vld [vmem:[#allocation10 + $0x150] sm:$0xff] }
 0x457   :  { %v4387_v18 = vpop.eup %4386  ;;  %v1603_v33 = vmul.f32 %v4385_v52, %v5865_v13  ;;  %4388 = vrcp.f32 %v5887_v41  ;;  %1970 = vmatpush.msrb.mxu1 %v5745_v30  ;;  %1990 = vmatpush.msrb.mxu2 %v5747_v9  ;;  %vm1608_vm13 = vweird.f32 %v4385_v52  ;;  %v1633_v30 = vor.u32 1.1754944e-38, %v1632_v60  ;;  %v2156_v13 = vld [vmem:[#allocation10 + $0x1b0] sm:$0xff] }
 0x458   :  { %v1622_v48 = vmul.f32 %v4387_v18, %v5869_v36  ;;  %4390 = vtanh.f32 %v1596_v37  ;;  %2010 = vmatpush.msrb.mxu3 %v5749_v43  ;;  %vm1627_vm14 = vweird.f32 %v4387_v18  ;;  %vm1609_vm1 = vmor %vm1607_vm15, %vm1608_vm13  ;;  %v1652_v57 = vand.u32 2147483648, %v5887_v41  ;;  %v7479_v37 = vld [vmem:[#allocation35_spill] sm:$0xff] }
 0x459   :  { %v1604_v55 = vsub.f32 1.0, %v1603_v33  ;;  %1971 = vmatpush.msrb.mxu1 %v5755_v32  ;;  %1991 = vmatpush.msrb.mxu2 %v5757_v1  ;;  %vm1628_vm2 = vmor %vm1626_vm0, %vm1627_vm14  ;;  %vm1646_vm6 = vweird.f32 %v5887_v41 }
 0x45a   :  { %v1623_v58 = vsub.f32 1.0, %v1622_v48  ;;  %2011 = vmatpush.msrb.mxu3 %v5759_v12  ;;  %v7481_v48 = vld [vmem:[#allocation36_spill] sm:$0xff] }
 0x45b   :  { %v1605_v6 = vmul.f32 %v4385_v52, %v1604_v55  ;;  %1972 = vmatpush.msrb.mxu1 %v5765_v54  ;;  %1992 = vmatpush.msrb.mxu2 %v5767_v5  ;;  %v7482_v55 = vld [vmem:[#allocation31_spill] sm:$0xff] }
 0x45c   :  { %v1624_v4 = vmul.f32 %v4387_v18, %v1623_v58  ;;  %2012 = vmatpush.msrb.mxu3 %v5769_v15  ;;  %v7471_v15 = vld [vmem:[#allocation44_spill] sm:$0xff]  ;;  %v247_v58 = vadd.f32 %v7482_v55, %v7481_v48  ;;  %v2109_v55 = vld [vmem:[#allocation10 + $0x38] sm:$0xff] }
 0x45d   :  { %v5912_v7 = vpop.eup %4388  ;;  %v1606_v3 = vadd.f32 %v4385_v52, %v1605_v6  ;;  %1973 = vmatpush.msrb.mxu1 %v5775_v49  ;;  %1993 = vmatpush.msrb.mxu2 %v5777_v38  ;;  %v1653_v49 = vor.u32 1.1754944e-38, %v1652_v57  ;;  %v7472_v38 = vld [vmem:[#allocation59_spill] sm:$0xff] }
 0x45e   :  { %v1625_v0 = vadd.f32 %v4387_v18, %v1624_v4  ;;  %v1642_v35 = vmul.f32 %v5912_v7, %v5887_v41  ;;  %v4391_v36 = vpop.eup %4390  ;;  %2013 = vmatpush.msrb.mxu3 %v5779_v26  ;;  %vm1647_vm5 = vweird.f32 %v5912_v7  ;;  %v7473_v26 = vld [vmem:[#allocation60_spill] sm:$0xff]  ;;  %v2130_v57 = vld [vmem:[#allocation10 + $0xe0] sm:$0xff] }
 0x45f   :  { %v1610_v9 = vsel %vm1609_vm1, %v4385_v52, %v1606_v3  ;;  %1974 = vmatpush.msrb.mxu1 %v5785_v34  ;;  %1994 = vmatpush.msrb.mxu2 %v5787_v39  ;;  %vm1648_vm7 = vmor %vm1646_vm6, %vm1647_vm5  ;;  %v7475_v34 = vld [vmem:[#allocation61_spill] sm:$0xff]  ;;  %v2143_v4 = vld [vmem:[#allocation10 + $0x148] sm:$0xff] }
 0x460   :  { %v1615_v46 = vsel %vm1612_vm3, %v1614_v45, %v1610_v9  ;;  %v1629_v43 = vsel %vm1628_vm2, %v4387_v18, %v1625_v0  ;;  %v1643_v32 = vsub.f32 1.0, %v1642_v35  ;;  %2014 = vmatpush.msrb.mxu3 %v5789_v28  ;;  %v2148_v52 = vld [vmem:[#allocation10 + $0x170] sm:$0xff]  ;;  %v2145_v45 = vld [vmem:[#allocation10 + $0x158] sm:$0xff]  ;;  %v2138_v0 = vld [vmem:[#allocation10 + $0x120] sm:$0xff] }
 0x461   :  { %v1634_v1 = vsel %vm1631_vm4, %v1633_v30, %v1629_v43  ;;  %v1657_v12 = vmul.f32 %v4391_v36, %v1615_v46  ;;  %1975 = vmatpush.msrb.mxu1 %v5799_v17  ;;  %1995 = vmatpush.msrb.mxu2 %v5801_v62  ;;  %v7476_v17 = vld [vmem:[#allocation46_spill] sm:$0xff]  ;;  %v7477_v62 = vld [vmem:[#allocation47_spill] sm:$0xff]  ;;  %v7480_v18 = vld [vmem:[#allocation21_spill] sm:$0xff] }
 0x462   :  { %v1656_v54 = vmul.f32 %v1634_v1, %v5688_v61  ;;  %v1644_v47 = vmul.f32 %v5912_v7, %v1643_v32  ;;  %2015 = vmatpush.msrb.mxu3 %v5803_v27  ;;  %v1650_v61 = vand.u32 2147483647, %v5887_v41  ;;  %v2147_v41 = vld [vmem:[#allocation10 + $0x168] sm:$0xff]  ;;  %v206_v33 = vadd.f32 %v7480_v18, %v7479_v37  ;;  %v2140_v30 = vld [vmem:[#allocation10 + $0x130] sm:$0xff]  ;;  %v2141_v46 = vld [vmem:[#allocation10 + $0x138] sm:$0xff] }
 0x463   :  { %1976 = vmatpush.msrb.mxu1 %v5809_v42  ;;  %1996 = vmatpush.msrb.mxu2 %v5811_v53  ;;  %v2163_v42 = vld [vmem:[#allocation10 + $0x1e8] sm:$0xff]  ;;  %v2164_v53 = vld [vmem:[#allocation10 + $0x1f0] sm:$0xff]  ;;  %v2134_v43 = vld [vmem:[#allocation10 + $0x100] sm:$0xff] }
 0x464   :  { %v5936_v5 = vadd.f32 %v1657_v12, %v1656_v54  ;;  %v1645_v63 = vadd.f32 %v5912_v7, %v1644_v47  ;;  %2016 = vmatpush.msrb.mxu3 %v5813_v14  ;;  %vm1651_vm8 = vcmp.eq.f32.partialorder %v1650_v61, 8.507059e+37  ;;  %v2158_v14 = vld [vmem:[#allocation10 + $0x1c0] sm:$0xff]  ;;  %v2139_v35 = vld [vmem:[#allocation10 + $0x128] sm:$0xff]  ;;  %v2136_v1 = vld [vmem:[#allocation10 + $0x110] sm:$0xff] }
 0x465   :  { %1977 = vmatpush.msrb.mxu1 %v5819_v20  ;;  %1997 = vmatpush.msrb.mxu2 %v5821_v23  ;;  %v2159_v20 = vld [vmem:[#allocation10 + $0x1c8] sm:$0xff]  ;;  %v2160_v23 = vld [vmem:[#allocation10 + $0x1d0] sm:$0xff]  ;;  %v2137_v12 = vld [vmem:[#allocation10 + $0x118] sm:$0xff] }
 0x466   :  { %4392 = vtanh.f32 %v5936_v5  ;;  %2017 = vmatpush.msrb.mxu3 %v5823_v11  ;;  %v1649_v10 = vsel %vm1648_vm7, %v5912_v7, %v1645_v63  ;;  %v2154_v11 = vld [vmem:[#allocation10 + $0x1a0] sm:$0xff]  ;;  %v2135_v32 = vld [vmem:[#allocation10 + $0x108] sm:$0xff]  ;;  %v7484_v47 = vld [vmem:[#allocation38_spill] sm:$0xff] }
 0x467   :  { %1978 = vmatpush.msrb.mxu1 %v7471_v15  ;;  %1998 = vmatpush.msrb.mxu2 %v7472_v38  ;;  %v1654_v28 = vsel %vm1651_vm8, %v1653_v49, %v1649_v10  ;;  %v7483_v54 = vld [vmem:[#allocation40_spill] sm:$0xff]  ;;  %v2132_v10 = vld [vmem:[#allocation10 + $0xf0] sm:$0xff]  ;;  %v2133_v49 = vld [vmem:[#allocation10 + $0xf8] sm:$0xff] }
 0x468   :  { %2018 = vmatpush.msrb.mxu3 %v7473_v26  ;;  %v329_v63 = vadd.f32 %v7484_v47, %v7483_v54  ;;  %v2131_v61 = vld [vmem:[#allocation10 + $0xe8] sm:$0xff]  ;;  %v2126_v26 = vld [vmem:[#allocation10 + $0xc0] sm:$0xff] }
 0x469   :  { %1979 = vmatpush.msrb.mxu1 %v7475_v34  ;;  %1999 = vmatpush.msrb.mxu2 %v7476_v17  ;;  %v2128_v34 = vld [vmem:[#allocation10 + $0xd0] sm:$0xff]  ;;  %v2122_v17 = vld [vmem:[#allocation10 + $0xa0] sm:$0xff]  ;;  %v2107_v18 = vld [vmem:[#allocation10 + $0x28] sm:$0xff] }
 0x46a   :  { %2019 = vmatpush.msrb.mxu3 %v7477_v62  ;;  %v2123_v62 = vld [vmem:[#allocation10 + $0xa8] sm:$0xff] }
 0x46b   :  { %1980 = vmatpush.msrb.mxu1 %v5851_v25  ;;  %2000 = vmatpush.msrb.mxu2 %v5853_v56  ;;  %v2157_v25 = vld [vmem:[#allocation10 + $0x1b8] sm:$0xff]  ;;  %v2150_v56 = vld [vmem:[#allocation10 + $0x180] sm:$0xff] }
 0x46c   :  { %v4393_v39 = vpop.eup %4392  ;;  %2020 = vmatpush.msrb.mxu3 %v5855_v50  ;;  %v2165_v50 = vld [vmem:[#allocation10 + $0x1f8] sm:$0xff] }
 0x46d   :  { %v5963_v27 = vmul.f32 %v4393_v39, %v1654_v28  ;;  %1981 = vmatpush.msrb.mxu1 %v5859_v19  ;;  %2001 = vmatpush.msrb.mxu2 %v7478_v31  ;;  %v2155_v19 = vld [vmem:[#allocation10 + $0x1a8] sm:$0xff]  ;;  %v2129_v39 = vld [vmem:[#allocation10 + $0xd8] sm:$0xff]  ;;  %v2124_v31 = vld [vmem:[#allocation10 + $0xb0] sm:$0xff] }
 0x46e   :  { %2021 = vmatpush.msrb.mxu3 %v5863_v21  ;;  %v2151_v21 = vld [vmem:[#allocation10 + $0x188] sm:$0xff] }
 0x46f   :  { %1746 = vmatmul.f32.vlgmr.msra.gmra.mxu0 %v5963_v27  ;;  %1766 = vmatmul.f32.vlgmr.msra.gmra.mxu1 %v5963_v27 }
 0x470   :  { %1786 = vmatmul.f32.vlgmr.msra.gmra.mxu2 %v5963_v27  ;;  %1806 = vmatmul.f32.vlgmr.msra.gmra.mxu3 %v5963_v27 }
 0x471   :  { %2176 = vmatpush.msra.mxu0 %v2162_v16  ;;  %2217 = vmatpush.msra.mxu1 %v2163_v42  ;;  %v2125_v42 = vld [vmem:[#allocation10 + $0xb8] sm:$0xff] }
 0x472   :  { %2258 = vmatpush.msra.mxu2 %v2164_v53  ;;  %2299 = vmatpush.msra.mxu3 %v2165_v50  ;;  %v2118_v53 = vld [vmem:[#allocation10 + $0x80] sm:$0xff]  ;;  %v2119_v50 = vld [vmem:[#allocation10 + $0x88] sm:$0xff] }
 0x473   :  { %2177 = vmatpush.msra.mxu0 %v2158_v14  ;;  %2218 = vmatpush.msra.mxu1 %v2159_v20 }
 0x474   :  { %2259 = vmatpush.msra.mxu2 %v2160_v23  ;;  %2300 = vmatpush.msra.mxu3 %v2161_v24  ;;  %v2120_v23 = vld [vmem:[#allocation10 + $0x90] sm:$0xff]  ;;  %v2121_v24 = vld [vmem:[#allocation10 + $0x98] sm:$0xff] }
 0x475   :  { %2178 = vmatpush.msra.mxu0 %v2154_v11  ;;  %2219 = vmatpush.msra.mxu1 %v2155_v19  ;;  %v2114_v19 = vld [vmem:[#allocation10 + $0x60] sm:$0xff] }
 0x476   :  { %2260 = vmatpush.msra.mxu2 %v2156_v13  ;;  %2301 = vmatpush.msra.mxu3 %v2157_v25  ;;  %v2115_v13 = vld [vmem:[#allocation10 + $0x68] sm:$0xff]  ;;  %v2116_v25 = vld [vmem:[#allocation10 + $0x70] sm:$0xff] }
 0x477   :  { %2179 = vmatpush.msra.mxu0 %v2150_v56  ;;  %2220 = vmatpush.msra.mxu1 %v2151_v21  ;;  %v2117_v56 = vld [vmem:[#allocation10 + $0x78] sm:$0xff]  ;;  %v2110_v21 = vld [vmem:[#allocation10 + $0x40] sm:$0xff] }
 0x478   :  { %2261 = vmatpush.msra.mxu2 %v2152_v40  ;;  %2302 = vmatpush.msra.mxu3 %v2153_v44  ;;  %v2111_v40 = vld [vmem:[#allocation10 + $0x48] sm:$0xff]  ;;  %v2112_v44 = vld [vmem:[#allocation10 + $0x50] sm:$0xff] }
 0x479   :  { %2180 = vmatpush.msra.mxu0 %v2146_v22  ;;  %2221 = vmatpush.msra.mxu1 %v2147_v41  ;;  %v2113_v22 = vld [vmem:[#allocation10 + $0x58] sm:$0xff]  ;;  %v2106_v41 = vld [vmem:[#allocation10 + $0x20] sm:$0xff] }
 0x47a   :  { %2262 = vmatpush.msra.mxu2 %v2148_v52  ;;  %2303 = vmatpush.msra.mxu3 %v2149_v29  ;;  %v7485_v29 = vld [vmem:[#allocation30_spill] sm:$0xff] }
 0x47b   :  { %2181 = vmatpush.msra.mxu0 %v2142_v8  ;;  %2222 = vmatpush.msra.mxu1 %v2143_v4  ;;  %v2103_v8 = vld [vmem:[#allocation10 + $0x8] sm:$0xff] }
 0x47c   :  { %2263 = vmatpush.msra.mxu2 %v2144_v59  ;;  %2304 = vmatpush.msra.mxu3 %v2145_v45  ;;  %v2104_v59 = vld [vmem:[#allocation10 + $0x10] sm:$0xff] }
 0x47d   :  { %2182 = vmatpush.msra.mxu0 %v2138_v0  ;;  %2223 = vmatpush.msra.mxu1 %v2139_v35 }
 0x47e   :  { %2264 = vmatpush.msra.mxu2 %v2140_v30  ;;  %2305 = vmatpush.msra.mxu3 %v2141_v46 }
 0x47f   :  { %2183 = vmatpush.msra.mxu0 %v2134_v43  ;;  %2224 = vmatpush.msra.mxu1 %v2135_v32 }
 0x480   :  { %2265 = vmatpush.msra.mxu2 %v2136_v1  ;;  %2306 = vmatpush.msra.mxu3 %v2137_v12 }
 0x481   :  { %2184 = vmatpush.msra.mxu0 %v2130_v57  ;;  %2225 = vmatpush.msra.mxu1 %v2131_v61 }
 0x482   :  { %2266 = vmatpush.msra.mxu2 %v2132_v10  ;;  %2307 = vmatpush.msra.mxu3 %v2133_v49 }
 0x483   :  { %2185 = vmatpush.msra.mxu0 %v2126_v26  ;;  %2226 = vmatpush.msra.mxu1 %v2127_v51 }
 0x484   :  { %2267 = vmatpush.msra.mxu2 %v2128_v34  ;;  %2308 = vmatpush.msra.mxu3 %v2129_v39 }
 0x485   :  { %2186 = vmatpush.msra.mxu0 %v2122_v17  ;;  %2227 = vmatpush.msra.mxu1 %v2123_v62 }
 0x486   :  { %2268 = vmatpush.msra.mxu2 %v2124_v31  ;;  %2309 = vmatpush.msra.mxu3 %v2125_v42 }
 0x487   :  { %2187 = vmatpush.msra.mxu0 %v2118_v53  ;;  %2228 = vmatpush.msra.mxu1 %v2119_v50 }
 0x488   :  { %2269 = vmatpush.msra.mxu2 %v2120_v23  ;;  %2310 = vmatpush.msra.mxu3 %v2121_v24 }
 0x489   :  { %2188 = vmatpush.msra.mxu0 %v2114_v19  ;;  %2229 = vmatpush.msra.mxu1 %v2115_v13  ;;  %v7487_v19 = vld [vmem:[#allocation45_spill] sm:$0xff]  ;;  %v7488_v13 = vld [vmem:[#allocation55_spill] sm:$0xff] }
 0x48a   :  { %2270 = vmatpush.msra.mxu2 %v2116_v25  ;;  %2311 = vmatpush.msra.mxu3 %v2117_v56  ;;  %v6015_v25 = vld [vmem:[#allocation11 + $0x1e0] sm:$0xff]  ;;  %v6017_v56 = vld [vmem:[#allocation11 + $0x1e8] sm:$0xff] }
 0x48b   :  { %2189 = vmatpush.msra.mxu0 %v2110_v21  ;;  %2230 = vmatpush.msra.mxu1 %v2111_v40  ;;  %v6019_v21 = vld [vmem:[#allocation11 + $0x1c0] sm:$0xff]  ;;  %v6023_v40 = vld [vmem:[#allocation11 + $0x1c8] sm:$0xff] }
 0x48c   :  { %2271 = vmatpush.msra.mxu2 %v2112_v44  ;;  %2312 = vmatpush.msra.mxu3 %v2113_v22  ;;  %v6025_v44 = vld [vmem:[#allocation11 + $0x1f8] sm:$0xff]  ;;  %v6028_v22 = vld [vmem:[#allocation11 + $0x1a0] sm:$0xff] }
 0x48d   :  { %2190 = vmatpush.msra.mxu0 %v2106_v41  ;;  %2231 = vmatpush.msra.mxu1 %v2107_v18  ;;  %v6030_v41 = vld [vmem:[#allocation11 + $0x1a8] sm:$0xff] }
 0x48e   :  { %2313 = vmatpush.msra.mxu3 %v2109_v55  ;;  %v7489_v18 = vld [vmem:[#allocation56_spill] sm:$0xff]  ;;  %v6051_v55 = vld [vmem:[#allocation11 + $0x1f0] sm:$0xff] }
 0x48f   :  { %2232 = vmatpush.msra.mxu1 %v2103_v8  ;;  %v6063_v8 = vld [vmem:[#allocation11 + $0x188] sm:$0xff] }
 0x4ec   :  { %v1747_v60 = vpop.f32.mrf.mxu0  ;;  %v1767_v6 = vpop.f32.mrf.mxu1 }
 0x4ed   :  { %v1810_v7 = vadd.f32 %v1747_v60, %v206_v33  ;;  %v1811_v3 = vadd.f32 %v1767_v6, %v247_v58  ;;  %v2108_v33 = vld [vmem:[#allocation10 + $0x30] sm:$0xff]  ;;  %v288_v60 = vadd.f32 %v7485_v29, %v7451_v2  ;;  %v2102_v6 = vld [vmem:[#allocation10] sm:$0xff]  ;;  %v6057_v29 = vld [vmem:[#allocation11 + $0x1b8] sm:$0xff] }
 0x4ee   :  { %2272 = vmatpush.msra.mxu2 %v2108_v33  ;;  %2191 = vmatpush.msra.mxu0 %v2102_v6  ;;  %v7490_v33 = vld [vmem:[#allocation58_spill] sm:$0xff]  ;;  %v6061_v6 = vld [vmem:[#allocation11 + $0x180] sm:$0xff] }
 0x4ef   :  { %v4248_v9 = vmul.f32 -1.442695, %v1810_v7  ;;  %v4249_v36 = vmul.f32 -1.442695, %v1811_v3  ;;  %v2105_v7 = vld [vmem:[#allocation10 + $0x18] sm:$0xff] }
 0x4f0   :  { %2273 = vmatpush.msra.mxu2 %v2104_v59  ;;  %2314 = vmatpush.msra.mxu3 %v2105_v7  ;;  %v6073_v59 = vld [vmem:[#allocation11 + $0x198] sm:$0xff]  ;;  %v6075_v7 = vld [vmem:[#allocation11 + $0x190] sm:$0xff] }
 0x4f1   :  { %4394 = vpow2.f32 %v4248_v9 }
 0x4f2   :  { %4396 = vpow2.f32 %v4249_v36 }
 0x4f3   :  { %v1807_v15 = vpop.f32.mrf.mxu3  ;;  %v1787_v52 = vpop.f32.mrf.mxu2 }
 0x4f4   :  { %v1813_v38 = vadd.f32 %v1807_v15, %v329_v63  ;;  %v1812_v45 = vadd.f32 %v1787_v52, %v288_v60  ;;  %v6032_v52 = vld [vmem:[#allocation11 + $0x1d8] sm:$0xff]  ;;  %v6059_v60 = vld [vmem:[#allocation11 + $0x1b0] sm:$0xff] }
 0x4f6   :  { %v4250_v28 = vmul.f32 -1.442695, %v1813_v38 }
 0x4f7   :  { %v4395_v16 = vpop.eup %4394 }
 0x4f8   :  { %v4397_v14 = vpop.eup %4396  ;;  %v5983_v20 = vadd.f32 1.0, %v4395_v16  ;;  %4398 = vpow2.f32 %v4250_v28 }
 0x4f9   :  { %v5985_v11 = vadd.f32 1.0, %v4397_v14 }
 0x4fa   :  { %4400 = vrcp.f32 %v5983_v20  ;;  %v1829_v46 = vand.u32 2147483648, %v5983_v20  ;;  %v1827_v1 = vand.u32 2147483647, %v5983_v20  ;;  %vm1823_vm11 = vweird.f32 %v5983_v20 }
 0x4fb   :  { %4402 = vrcp.f32 %v5985_v11  ;;  %v1848_v43 = vand.u32 2147483648, %v5985_v11  ;;  %v1846_v47 = vand.u32 2147483647, %v5985_v11  ;;  %vm1842_vm12 = vweird.f32 %v5985_v11 }
 0x4fc   :  { %v1830_v61 = vor.u32 1.1754944e-38, %v1829_v46  ;;  %vm1828_vm15 = vcmp.eq.f32.partialorder %v1827_v1, 8.507059e+37  ;;  %v6093_v46 = vld [vmem:[#allocation11 + $0x148] sm:$0xff] }
 0x4fd   :  { %v1849_v49 = vor.u32 1.1754944e-38, %v1848_v43  ;;  %vm1847_vm0 = vcmp.eq.f32.partialorder %v1846_v47, 8.507059e+37  ;;  %v6095_v43 = vld [vmem:[#allocation11 + $0x158] sm:$0xff] }
 0x4fe   :  { %v4399_v58 = vpop.eup %4398 }
 0x4ff   :  { %v1856_v4 = vadd.f32 1.0, %v4399_v58  ;;  %v6054_v58 = vld [vmem:[#allocation11 + $0x1d0] sm:$0xff] }
 0x500   :  { %v4401_v3 = vpop.eup %4400 }
 0x501   :  { %v4403_v0 = vpop.eup %4402  ;;  %v1819_v35 = vmul.f32 %v4401_v3, %v5983_v20  ;;  %4404 = vrcp.f32 %v1856_v4  ;;  %vm1824_vm9 = vweird.f32 %v4401_v3  ;;  %v1868_v53 = vand.u32 2147483648, %v1856_v4 }
 0x502   :  { %v1838_v30 = vmul.f32 %v4403_v0, %v5985_v11  ;;  %4406 = vtanh.f32 %v1812_v45  ;;  %vm1843_vm10 = vweird.f32 %v4403_v0  ;;  %vm1825_vm13 = vmor %vm1823_vm11, %vm1824_vm9  ;;  %vm1862_vm2 = vweird.f32 %v1856_v4  ;;  %v6083_v45 = vld [vmem:[#allocation11 + $0x170] sm:$0xff] }
 0x503   :  { %v1820_v9 = vsub.f32 1.0, %v1819_v35  ;;  %vm1844_vm14 = vmor %vm1842_vm12, %vm1843_vm10  ;;  %v1866_v50 = vand.u32 2147483647, %v1856_v4  ;;  %v1869_v20 = vor.u32 1.1754944e-38, %v1868_v53 }
 0x504   :  { %v1839_v36 = vsub.f32 1.0, %v1838_v30  ;;  %v7492_v30 = vld [vmem:[#allocation34_spill] sm:$0xff] }
 0x505   :  { %v1821_v32 = vmul.f32 %v4401_v3, %v1820_v9  ;;  %vm1867_vm4 = vcmp.eq.f32.partialorder %v1866_v50, 8.507059e+37  ;;  %v250_v9 = vadd.f32 %v7492_v30, %v7481_v48  ;;  %v6106_v48 = vld [vmem:[#allocation11 + $0x138] sm:$0xff]  ;;  %v6141_v50 = vld [vmem:[#allocation11 + $0xa0] sm:$0xff] }
 0x506   :  { %v1840_v12 = vmul.f32 %v4403_v0, %v1839_v36  ;;  %v6091_v36 = vld [vmem:[#allocation11 + $0x140] sm:$0xff] }
 0x507   :  { %v4405_v63 = vpop.eup %4404  ;;  %v1822_v57 = vadd.f32 %v4401_v3, %v1821_v32 }
 0x508   :  { %v1841_v10 = vadd.f32 %v4403_v0, %v1840_v12  ;;  %v1858_v15 = vmul.f32 %v4405_v63, %v1856_v4  ;;  %v4407_v26 = vpop.eup %4406  ;;  %vm1863_vm1 = vweird.f32 %v4405_v63  ;;  %v6071_v4 = vld [vmem:[#allocation11 + $0x168] sm:$0xff]  ;;  %v6099_v12 = vld [vmem:[#allocation11 + $0x150] sm:$0xff] }
 0x509   :  { %v1826_v38 = vsel %vm1825_vm13, %v4401_v3, %v1822_v57  ;;  %vm1864_vm3 = vmor %vm1862_vm2, %vm1863_vm1  ;;  %v6081_v3 = vld [vmem:[#allocation11 + $0x178] sm:$0xff]  ;;  %v6103_v57 = vld [vmem:[#allocation11 + $0x128] sm:$0xff] }
 0x50a   :  { %v1831_v51 = vsel %vm1828_vm15, %v1830_v61, %v1826_v38  ;;  %v1845_v34 = vsel %vm1844_vm14, %v4403_v0, %v1841_v10  ;;  %v1859_v39 = vsub.f32 1.0, %v1858_v15  ;;  %v7491_v0 = vld [vmem:[#allocation22_spill] sm:$0xff]  ;;  %v6111_v61 = vld [vmem:[#allocation11 + $0x130] sm:$0xff]  ;;  %v6115_v38 = vld [vmem:[#allocation11 + $0x108] sm:$0xff] }
 0x50b   :  { %v1850_v28 = vsel %vm1847_vm0, %v1849_v49, %v1845_v34  ;;  %v1873_v17 = vmul.f32 %v4407_v26, %v1831_v51  ;;  %v209_v35 = vadd.f32 %v7491_v0, %v7479_v37  ;;  %v6101_v37 = vld [vmem:[#allocation11 + $0x120] sm:$0xff]  ;;  %v6123_v51 = vld [vmem:[#allocation11 + $0xe8] sm:$0xff]  ;;  %v6125_v34 = vld [vmem:[#allocation11 + $0x118] sm:$0xff] }
 0x50c   :  { %v1872_v62 = vmul.f32 %v1850_v28, %v5936_v5  ;;  %v1860_v31 = vmul.f32 %v4405_v63, %v1859_v39  ;;  %v7486_v5 = vld [vmem:[#allocation42_spill] sm:$0xff]  ;;  %v6113_v49 = vld [vmem:[#allocation11 + $0x100] sm:$0xff]  ;;  %v6130_v28 = vld [vmem:[#allocation11 + $0xc8] sm:$0xff] }
 0x50d   :  { %v6121_v26 = vld [vmem:[#allocation11 + $0xe0] sm:$0xff] }
 0x50e   :  { %v6000_v16 = vadd.f32 %v1873_v17, %v1872_v62  ;;  %v1861_v42 = vadd.f32 %v4405_v63, %v1860_v31  ;;  %v6128_v39 = vld [vmem:[#allocation11 + $0xc0] sm:$0xff]  ;;  %v6132_v17 = vld [vmem:[#allocation11 + $0xf8] sm:$0xff] }
 0x50f   :  { %v7493_v62 = vld [vmem:[#allocation39_spill] sm:$0xff] }
 0x510   :  { %4408 = vtanh.f32 %v6000_v16  ;;  %v1865_v14 = vsel %vm1864_vm3, %v4405_v63, %v1861_v42  ;;  %v332_v31 = vadd.f32 %v7493_v62, %v7483_v54  ;;  %v6138_v42 = vld [vmem:[#allocation11 + $0xd8] sm:$0xff]  ;;  %v6167_v0 = vld [vmem:[#allocation11 + $0x60] sm:$0xff] }
 0x511   :  { %v1870_v24 = vsel %vm1867_vm4, %v1869_v20, %v1865_v14  ;;  %v6143_v14 = vld [vmem:[#allocation11 + $0xa8] sm:$0xff]  ;;  %v6145_v20 = vld [vmem:[#allocation11 + $0x110] sm:$0xff]  ;;  %v6149_v54 = vld [vmem:[#allocation11 + $0xb8] sm:$0xff]  ;;  %7496 = vst [vmem:[#allocation51_spill] sm:$0xff] %v6167_v0 }
 0x512   :  { %v6195_v62 = vld [vmem:[#allocation11 + $0x20] sm:$0xff] }
 0x513   :  { %7502 = vst [vmem:[#allocation29_spill] sm:$0xff] %v6195_v62 }
 0x516   :  { %v4409_v23 = vpop.eup %4408 }
 0x517   :  { %v1876_v11 = vmul.f32 %v4409_v23, %v1870_v24  ;;  %v6151_v24 = vld [vmem:[#allocation11 + $0xf0] sm:$0xff] }
 0x519   :  { %1962 = vmatmul.f32.vlgmr.msrb.gmra.mxu0 %v1876_v11  ;;  %1982 = vmatmul.f32.vlgmr.msrb.gmra.mxu1 %v1876_v11 }
 0x51a   :  { %2002 = vmatmul.f32.vlgmr.msrb.gmra.mxu2 %v1876_v11  ;;  %2022 = vmatmul.f32.vlgmr.msrb.gmra.mxu3 %v1876_v11 }
 0x51b   :  { %2440 = vmatpush.msrb.mxu0 %v6015_v25  ;;  %2460 = vmatpush.msrb.mxu1 %v6017_v56 }
 0x51c   :  { %2500 = vmatpush.msrb.mxu3 %v6025_v44  ;;  %2480 = vmatpush.msrb.mxu2 %v6051_v55 }
 0x51d   :  { %2441 = vmatpush.msrb.mxu0 %v6019_v21  ;;  %2461 = vmatpush.msrb.mxu1 %v6023_v40 }
 0x51e   :  { %2501 = vmatpush.msrb.mxu3 %v6032_v52  ;;  %2481 = vmatpush.msrb.mxu2 %v6054_v58 }
 0x51f   :  { %2442 = vmatpush.msrb.mxu0 %v6028_v22  ;;  %2462 = vmatpush.msrb.mxu1 %v6030_v41 }
 0x520   :  { %2502 = vmatpush.msrb.mxu3 %v6057_v29  ;;  %2482 = vmatpush.msrb.mxu2 %v6059_v60 }
 0x521   :  { %2192 = vmatmul.f32.vlgmr.msra.gmra.mxu0 %v7486_v5  ;;  %2233 = vmatmul.f32.vlgmr.msra.gmra.mxu1 %v7486_v5 }
 0x522   :  { %2274 = vmatmul.f32.vlgmr.msra.gmra.mxu2 %v7486_v5  ;;  %2315 = vmatmul.f32.vlgmr.msra.gmra.mxu3 %v7486_v5  ;;  %v6157_v5 = vld [vmem:[#allocation11 + $0x88] sm:$0xff] }
 0x523   :  { %2443 = vmatpush.msrb.mxu0 %v6061_v6  ;;  %2463 = vmatpush.msrb.mxu1 %v6063_v8  ;;  %7494 = vst [vmem:[#allocation49_spill] sm:$0xff] %v6157_v5 }
 0x524   :  { %2503 = vmatpush.msrb.mxu3 %v6073_v59  ;;  %2483 = vmatpush.msrb.mxu2 %v6075_v7 }
 0x525   :  { %2464 = vmatpush.msrb.mxu1 %v6071_v4 }
 0x526   :  { %2504 = vmatpush.msrb.mxu3 %v6081_v3  ;;  %2484 = vmatpush.msrb.mxu2 %v6083_v45 }
 0x527   :  { %2465 = vmatpush.msrb.mxu1 %v6093_v46 }
 0x528   :  { %2505 = vmatpush.msrb.mxu3 %v6095_v43  ;;  %2485 = vmatpush.msrb.mxu2 %v6099_v12 }
 0x529   :  { %2195 = vmatmul.f32.gmra.mxu0 %v7487_v19  ;;  %2236 = vmatmul.f32.gmra.mxu1 %v7487_v19 }
 0x52a   :  { %2277 = vmatmul.f32.gmra.mxu2 %v7487_v19  ;;  %2318 = vmatmul.f32.gmra.mxu3 %v7487_v19 }
 0x52b   :  { %2466 = vmatpush.msrb.mxu1 %v6103_v57  ;;  %2506 = vmatpush.msrb.mxu3 %v6106_v48 }
 0x52c   :  { %2486 = vmatpush.msrb.mxu2 %v6111_v61 }
 0x52d   :  { %2467 = vmatpush.msrb.mxu1 %v6115_v38  ;;  %2507 = vmatpush.msrb.mxu3 %v6125_v34 }
 0x52e   :  { %2487 = vmatpush.msrb.mxu2 %v6145_v20 }
 0x52f   :  { %2468 = vmatpush.msrb.mxu1 %v6123_v51  ;;  %2508 = vmatpush.msrb.mxu3 %v6132_v17 }
 0x530   :  { %2488 = vmatpush.msrb.mxu2 %v6151_v24 }
 0x531   :  { %2198 = vmatmul.f32.gmra.mxu0 %v7488_v13  ;;  %2239 = vmatmul.f32.gmra.mxu1 %v7488_v13 }
 0x532   :  { %2280 = vmatmul.f32.gmra.mxu2 %v7488_v13  ;;  %2321 = vmatmul.f32.gmra.mxu3 %v7488_v13  ;;  %v6161_v13 = vld [vmem:[#allocation11 + $0x98] sm:$0xff] }
 0x533   :  { %2469 = vmatpush.msrb.mxu1 %v6130_v28  ;;  %2509 = vmatpush.msrb.mxu3 %v6138_v42  ;;  %7495 = vst [vmem:[#allocation50_spill] sm:$0xff] %v6161_v13 }
 0x535   :  { %2470 = vmatpush.msrb.mxu1 %v6143_v14  ;;  %2510 = vmatpush.msrb.mxu3 %v6149_v54 }
 0x537   :  { %2471 = vmatpush.msrb.mxu1 %v6157_v5  ;;  %2511 = vmatpush.msrb.mxu3 %v6161_v13  ;;  %v6219_v13 = vld [vmem:[#allocation11 + $0x18] sm:$0xff] }
 0x538   :  { %7509 = vst [vmem:[#allocation25_spill] sm:$0xff] %v6219_v13 }
 0x539   :  { %2201 = vmatmul.f32.gmra.mxu0 %v7489_v18  ;;  %2242 = vmatmul.f32.gmra.mxu1 %v7489_v18 }
 0x53a   :  { %2283 = vmatmul.f32.gmra.mxu2 %v7489_v18  ;;  %2324 = vmatmul.f32.gmra.mxu3 %v7489_v18  ;;  %v6163_v18 = vld [vmem:[#allocation11 + $0xd0] sm:$0xff] }
 0x53b   :  { %2489 = vmatpush.msrb.mxu2 %v6163_v18 }
 0x541   :  { %2204 = vmatmul.f32.gmra.mxu0 %v7490_v33  ;;  %2245 = vmatmul.f32.gmra.mxu1 %v7490_v33 }
 0x542   :  { %2286 = vmatmul.f32.gmra.mxu2 %v7490_v33  ;;  %2327 = vmatmul.f32.gmra.mxu3 %v7490_v33 }
 0x549   :  { %2207 = vmatmul.f32.gmra.mxu0 %v5963_v27  ;;  %2248 = vmatmul.f32.gmra.mxu1 %v5963_v27 }
 0x54a   :  { %2289 = vmatmul.f32.gmra.mxu2 %v5963_v27  ;;  %2330 = vmatmul.f32.gmra.mxu3 %v5963_v27  ;;  %v6066_v27 = vld [vmem:[#allocation11 + $0x160] sm:$0xff] }
 0x54b   :  { %2444 = vmatpush.msrb.mxu0 %v6066_v27 }
 0x54d   :  { %2445 = vmatpush.msrb.mxu0 %v6091_v36 }
 0x54f   :  { %2446 = vmatpush.msrb.mxu0 %v6101_v37 }
 0x551   :  { %2210 = vmatmul.f32.gmra.mxu0 %v1876_v11  ;;  %2251 = vmatmul.f32.gmra.mxu1 %v1876_v11 }
 0x552   :  { %2292 = vmatmul.f32.gmra.mxu2 %v1876_v11  ;;  %2333 = vmatmul.f32.gmra.mxu3 %v1876_v11  ;;  %v6155_v11 = vld [vmem:[#allocation11 + $0x80] sm:$0xff] }
 0x553   :  { %2447 = vmatpush.msrb.mxu0 %v6113_v49 }
 0x555   :  { %2448 = vmatpush.msrb.mxu0 %v6121_v26 }
 0x557   :  { %2449 = vmatpush.msrb.mxu0 %v6128_v39 }
 0x559   :  { %2450 = vmatpush.msrb.mxu0 %v6141_v50 }
 0x55b   :  { %2451 = vmatpush.msrb.mxu0 %v6155_v11 }
 0x55d   :  { %2452 = vmatpush.msrb.mxu0 %v6167_v0 }
 0x596   :  { %v1963_v32 = vpop.f32.mrf.mxu0  ;;  %v1983_v1 = vpop.f32.mrf.mxu1 }
 0x597   :  { %v2026_v47 = vadd.f32 %v1963_v32, %v209_v35  ;;  %v2027_v63 = vadd.f32 %v1983_v1, %v250_v9  ;;  %v6169_v35 = vld [vmem:[#allocation11 + $0x68] sm:$0xff]  ;;  %v6175_v32 = vld [vmem:[#allocation11 + $0xb0] sm:$0xff]  ;;  %v6177_v1 = vld [vmem:[#allocation11 + $0x78] sm:$0xff] }
 0x598   :  { %7497 = vst [vmem:[#allocation52_spill] sm:$0xff] %v6169_v35  ;;  %2472 = vmatpush.msrb.mxu1 %v6169_v35  ;;  %2490 = vmatpush.msrb.mxu2 %v6175_v32  ;;  %v7507_v35 = vld [vmem:[#allocation33_spill] sm:$0xff] }
 0x599   :  { %v4251_v10 = vmul.f32 -1.442695, %v2026_v47  ;;  %v4252_v15 = vmul.f32 -1.442695, %v2027_v63  ;;  %7498 = vst [vmem:[#allocation53_spill] sm:$0xff] %v6177_v1  ;;  %v6183_v63 = vld [vmem:[#allocation11 + $0x40] sm:$0xff]  ;;  %2512 = vmatpush.msrb.mxu3 %v6177_v1  ;;  %v291_v0 = vadd.f32 %v7507_v35, %v7451_v2 }
 0x59a   :  { %7499 = vst [vmem:[#allocation54_spill] sm:$0xff] %v6183_v63  ;;  %2453 = vmatpush.msrb.mxu0 %v6183_v63  ;;  %v6217_v63 = vld [vmem:[#allocation11 + $0x38] sm:$0xff]  ;;  %v6227_v2 = vld [vmem:[#allocation11 + $0x30] sm:$0xff] }
 0x59b   :  { %4410 = vpow2.f32 %v4251_v10  ;;  %v6185_v10 = vld [vmem:[#allocation11 + $0x48] sm:$0xff]  ;;  %7508 = vst [vmem:[#allocation32_spill] sm:$0xff] %v6217_v63 }
 0x59c   :  { %4412 = vpow2.f32 %v4252_v15  ;;  %7500 = vst [vmem:[#allocation24_spill] sm:$0xff] %v6185_v10  ;;  %v6190_v15 = vld [vmem:[#allocation11 + $0x90] sm:$0xff]  ;;  %2473 = vmatpush.msrb.mxu1 %v6185_v10  ;;  %2454 = vmatpush.msrb.mxu0 %v6195_v62 }
 0x59d   :  { %v2023_v53 = vpop.f32.mrf.mxu3  ;;  %7501 = vst [vmem:[#allocation43_spill] sm:$0xff] %v6190_v15  ;;  %2491 = vmatpush.msrb.mxu2 %v6190_v15  ;;  %v6215_v10 = vld [vmem:[#allocation11 + $0x50] sm:$0xff] }
 0x59e   :  { %v2029_v23 = vadd.f32 %v2023_v53, %v332_v31  ;;  %v6197_v31 = vld [vmem:[#allocation11 + $0x28] sm:$0xff]  ;;  %v6199_v53 = vld [vmem:[#allocation11 + $0x58] sm:$0xff] }
 0x59f   :  { %7503 = vst [vmem:[#allocation41_spill] sm:$0xff] %v6197_v31  ;;  %2513 = vmatpush.msrb.mxu3 %v6199_v53  ;;  %2474 = vmatpush.msrb.mxu1 %v6197_v31 }
 0x5a0   :  { %v4253_v19 = vmul.f32 -1.442695, %v2029_v23  ;;  %7504 = vst [vmem:[#allocation23_spill] sm:$0xff] %v6199_v53  ;;  %v6203_v23 = vld [vmem:[#allocation11 + $0x70] sm:$0xff] }
 0x5a1   :  { %v4411_v33 = vpop.eup %4410  ;;  %2492 = vmatpush.msrb.mxu2 %v6203_v23  ;;  %2514 = vmatpush.msrb.mxu3 %v6217_v63  ;;  %v6234_v63 = vld [vmem:[#allocation11 + $0x10] sm:$0xff] }
 0x5a2   :  { %v4413_v30 = vpop.eup %4412  ;;  %v6171_v9 = vadd.f32 1.0, %v4411_v33  ;;  %4414 = vpow2.f32 %v4253_v19  ;;  %v2003_v19 = vpop.f32.mrf.mxu2  ;;  %v6207_v33 = vld [vmem:[#allocation11] sm:$0xff] }
 0x5a3   :  { %v6179_v47 = vadd.f32 1.0, %v4413_v30  ;;  %7505 = vst [vmem:[#allocation19_spill] sm:$0xff] %v6207_v33  ;;  %v6209_v30 = vld [vmem:[#allocation11 + $0x8] sm:$0xff]  ;;  %v2028_v5 = vadd.f32 %v2003_v19, %v291_v0  ;;  %2455 = vmatpush.msrb.mxu0 %v6207_v33  ;;  %2493 = vmatpush.msrb.mxu2 %v6215_v10 }
 0x5a4   :  { %4416 = vrcp.f32 %v6171_v9  ;;  %7506 = vst [vmem:[#allocation26_spill] sm:$0xff] %v6209_v30  ;;  %2475 = vmatpush.msrb.mxu1 %v6209_v30  ;;  %2515 = vmatpush.msrb.mxu3 %v6219_v13  ;;  %v2045_v30 = vand.u32 2147483648, %v6171_v9  ;;  %vm2039_vm7 = vweird.f32 %v6171_v9 }
 0x5a5   :  { %4418 = vrcp.f32 %v6179_v47  ;;  %2656 = vmatpush.msra.mxu0 %v6015_v25  ;;  %2494 = vmatpush.msrb.mxu2 %v6227_v2  ;;  %v2064_v13 = vand.u32 2147483648, %v6179_v47  ;;  %v2043_v25 = vand.u32 2147483647, %v6171_v9  ;;  %vm2058_vm8 = vweird.f32 %v6179_v47 }
 0x5a6   :  { %2676 = vmatpush.msra.mxu1 %v6017_v56  ;;  %2716 = vmatpush.msra.mxu3 %v6025_v44  ;;  %v2062_v44 = vand.u32 2147483647, %v6179_v47 }
 0x5a7   :  { %2657 = vmatpush.msra.mxu0 %v6019_v21  ;;  %2495 = vmatpush.msrb.mxu2 %v6234_v63  ;;  %vm2044_vm11 = vcmp.eq.f32.partialorder %v2043_v25, 8.507059e+37 }
 0x5a8   :  { %v4415_v1 = vpop.eup %4414  ;;  %2677 = vmatpush.msra.mxu1 %v6023_v40  ;;  %2717 = vmatpush.msra.mxu3 %v6032_v52  ;;  %v2046_v52 = vor.u32 1.1754944e-38, %v2045_v30  ;;  %vm2063_vm12 = vcmp.eq.f32.partialorder %v2062_v44, 8.507059e+37 }
 0x5a9   :  { %v6221_v15 = vadd.f32 1.0, %v4415_v1  ;;  %2696 = vmatpush.msra.mxu2 %v6051_v55  ;;  %2658 = vmatpush.msra.mxu0 %v6028_v22  ;;  %v2065_v22 = vor.u32 1.1754944e-38, %v2064_v13 }
 0x5aa   :  { %v4417_v53 = vpop.eup %4416  ;;  %2678 = vmatpush.msra.mxu1 %v6030_v41  ;;  %2718 = vmatpush.msra.mxu3 %v6057_v29 }
 0x5ab   :  { %v4419_v35 = vpop.eup %4418  ;;  %v2035_v31 = vmul.f32 %v4417_v53, %v6171_v9  ;;  %4420 = vrcp.f32 %v6221_v15  ;;  %vm2040_vm5 = vweird.f32 %v4417_v53  ;;  %2697 = vmatpush.msra.mxu2 %v6054_v58  ;;  %2659 = vmatpush.msra.mxu0 %v6061_v6  ;;  %vm2078_vm14 = vweird.f32 %v6221_v15 }
 0x5ac   :  { %v2054_v1 = vmul.f32 %v4419_v35, %v6179_v47  ;;  %4422 = vtanh.f32 %v2028_v5  ;;  %vm2059_vm6 = vweird.f32 %v4419_v35  ;;  %vm2041_vm9 = vmor %vm2039_vm7, %vm2040_vm5  ;;  %2679 = vmatpush.msra.mxu1 %v6063_v8  ;;  %2719 = vmatpush.msra.mxu3 %v6073_v59  ;;  %v2082_v25 = vand.u32 2147483647, %v6221_v15 }
 0x5ad   :  { %v2036_v0 = vsub.f32 1.0, %v2035_v31  ;;  %vm2060_vm10 = vmor %vm2058_vm8, %vm2059_vm6  ;;  %2698 = vmatpush.msra.mxu2 %v6059_v60  ;;  %2660 = vmatpush.msra.mxu0 %v6066_v27 }
 0x5ae   :  { %v2055_v19 = vsub.f32 1.0, %v2054_v1  ;;  %2680 = vmatpush.msra.mxu1 %v6071_v4  ;;  %2720 = vmatpush.msra.mxu3 %v6081_v3  ;;  %vm2083_vm0 = vcmp.eq.f32.partialorder %v2082_v25, 8.507059e+37 }
 0x5af   :  { %v2037_v33 = vmul.f32 %v4417_v53, %v2036_v0  ;;  %2699 = vmatpush.msra.mxu2 %v6075_v7  ;;  %2661 = vmatpush.msra.mxu0 %v6091_v36 }
 0x5b0   :  { %v2056_v56 = vmul.f32 %v4419_v35, %v2055_v19  ;;  %2681 = vmatpush.msra.mxu1 %v6093_v46  ;;  %2721 = vmatpush.msra.mxu3 %v6095_v43 }
 0x5b1   :  { %v6250_v21 = vpop.eup %4420  ;;  %v2038_v40 = vadd.f32 %v4417_v53, %v2037_v33  ;;  %2700 = vmatpush.msra.mxu2 %v6083_v45  ;;  %2662 = vmatpush.msra.mxu0 %v6101_v37 }
 0x5b2   :  { %v2057_v5 = vadd.f32 %v4419_v35, %v2056_v56  ;;  %v2074_v31 = vmul.f32 %v6250_v21, %v6221_v15  ;;  %v4423_v41 = vpop.eup %4422  ;;  %vm2079_vm13 = vweird.f32 %v6250_v21  ;;  %2682 = vmatpush.msra.mxu1 %v6103_v57  ;;  %2722 = vmatpush.msra.mxu3 %v6106_v48 }
 0x5b3   :  { %v2042_v9 = vsel %vm2041_vm9, %v4417_v53, %v2038_v40  ;;  %2701 = vmatpush.msra.mxu2 %v6099_v12  ;;  %2663 = vmatpush.msra.mxu0 %v6113_v49  ;;  %vm2080_vm15 = vmor %vm2078_vm14, %vm2079_vm13 }
 0x5b4   :  { %v2047_v47 = vsel %vm2044_vm11, %v2046_v52, %v2042_v9  ;;  %v2061_v33 = vsel %vm2060_vm10, %v4419_v35, %v2057_v5  ;;  %v2075_v30 = vsub.f32 1.0, %v2074_v31  ;;  %2683 = vmatpush.msra.mxu1 %v6115_v38  ;;  %2723 = vmatpush.msra.mxu3 %v6125_v34  ;;  %v7510_v52 = vld [vmem:[#allocation49_spill] sm:$0xff]  ;;  %v7511_v5 = vld [vmem:[#allocation50_spill] sm:$0xff]  ;;  %v7512_v31 = vld [vmem:[#allocation43_spill] sm:$0xff] }
 0x5b5   :  { %v2066_v1 = vsel %vm2063_vm12, %v2065_v22, %v2061_v33  ;;  %v2089_v0 = vmul.f32 %v4423_v41, %v2047_v47  ;;  %2702 = vmatpush.msra.mxu2 %v6111_v61  ;;  %2664 = vmatpush.msra.mxu0 %v6121_v26  ;;  %v7513_v22 = vld [vmem:[#allocation51_spill] sm:$0xff]  ;;  %v7514_v9 = vld [vmem:[#allocation52_spill] sm:$0xff]  ;;  %v7515_v41 = vld [vmem:[#allocation53_spill] sm:$0xff] }
 0x5b6   :  { %v2088_v13 = vmul.f32 %v2066_v1, %v6000_v16  ;;  %v2076_v53 = vmul.f32 %v6250_v21, %v2075_v30  ;;  %v2084_v16 = vand.u32 2147483648, %v6221_v15  ;;  %2684 = vmatpush.msra.mxu1 %v6123_v51  ;;  %2724 = vmatpush.msra.mxu3 %v6132_v17  ;;  %v7516_v47 = vld [vmem:[#allocation54_spill] sm:$0xff]  ;;  %v7517_v33 = vld [vmem:[#allocation24_spill] sm:$0xff]  ;;  %v7518_v30 = vld [vmem:[#allocation23_spill] sm:$0xff]  ;;  %v7519_v1 = vmov 0.0  }
 0x5b7   :  { %2703 = vmatpush.msra.mxu2 %v6145_v20  ;;  %2665 = vmatpush.msra.mxu0 %v6128_v39 }
 0x5b8   :  { %v2090_v35 = vadd.f32 %v2089_v0, %v2088_v13  ;;  %v2077_v19 = vadd.f32 %v6250_v21, %v2076_v53  ;;  %v2085_v44 = vor.u32 1.1754944e-38, %v2084_v16  ;;  %2685 = vmatpush.msra.mxu1 %v6130_v28  ;;  %2725 = vmatpush.msra.mxu3 %v6138_v42  ;;  %v7520_v0 = vld [vmem:[#allocation41_spill] sm:$0xff]  ;;  %v7521_v13 = vld [vmem:[#allocation32_spill] sm:$0xff]  ;;  %v7522_v53 = vld [vmem:[#allocation19_spill] sm:$0xff] }
 0x5b9   :  { %2704 = vmatpush.msra.mxu2 %v6151_v24  ;;  %2666 = vmatpush.msra.mxu0 %v6141_v50 }
 0x5ba   :  { %4424 = vtanh.f32 %v2090_v35  ;;  %v2081_v56 = vsel %vm2080_vm15, %v6250_v21, %v2077_v19  ;;  %2686 = vmatpush.msra.mxu1 %v6143_v14  ;;  %2726 = vmatpush.msra.mxu3 %v6149_v54  ;;  %v7523_v35 = vld [vmem:[#allocation26_spill] sm:$0xff]  ;;  %v7524_v19 = vld [vmem:[#allocation25_spill] sm:$0xff] }
 0x5bb   :  { %v2086_v40 = vsel %vm2083_vm0, %v2085_v44, %v2081_v56  ;;  %2705 = vmatpush.msra.mxu2 %v6163_v18  ;;  %2667 = vmatpush.msra.mxu0 %v6155_v11 }
 0x5bc   :  { %2687 = vmatpush.msra.mxu1 %v7510_v52  ;;  %2727 = vmatpush.msra.mxu3 %v7511_v5 }
 0x5bd   :  { %2706 = vmatpush.msra.mxu2 %v6175_v32  ;;  %2668 = vmatpush.msra.mxu0 %v7513_v22 }
 0x5be   :  { %2688 = vmatpush.msra.mxu1 %v7514_v9  ;;  %2728 = vmatpush.msra.mxu3 %v7515_v41 }
 0x5bf   :  { %2707 = vmatpush.msra.mxu2 %v7512_v31  ;;  %2669 = vmatpush.msra.mxu0 %v7516_v47 }
 0x5c0   :  { %v4425_v15 = vpop.eup %4424  ;;  %2689 = vmatpush.msra.mxu1 %v7517_v33  ;;  %2729 = vmatpush.msra.mxu3 %v7518_v30 }
 0x5c1   :  { %v2092_v21 = vmul.f32 %v4425_v15, %v2086_v40  ;;  %2708 = vmatpush.msra.mxu2 %v6203_v23  ;;  %2670 = vmatpush.msra.mxu0 %v6195_v62 }
 0x5c2   :  { %2690 = vmatpush.msra.mxu1 %v7520_v0  ;;  %2730 = vmatpush.msra.mxu3 %v7521_v13 }
 0x5c3   :  { %2213 = vmatmul.f32.gmra.mxu0 %v2092_v21  ;;  %2254 = vmatmul.f32.gmra.mxu1 %v2092_v21 }
 0x5c4   :  { %2295 = vmatmul.f32.gmra.mxu2 %v2092_v21  ;;  %2336 = vmatmul.f32.gmra.mxu3 %v2092_v21 }
 0x5c5   :  { %2709 = vmatpush.msra.mxu2 %v6215_v10  ;;  %2671 = vmatpush.msra.mxu0 %v7522_v53 }
 0x5c6   :  { %2691 = vmatpush.msra.mxu1 %v7523_v35  ;;  %2731 = vmatpush.msra.mxu3 %v7524_v19 }
 0x5c7   :  { %2710 = vmatpush.msra.mxu2 %v6227_v2 }
 0x5c9   :  { %2711 = vmatpush.msra.mxu2 %v6234_v63 }
 0x5cb   :  { %2456 = vmatmul.f32.vlgmr.msrb.gmra.mxu0 %v7519_v1  ;;  %2476 = vmatmul.f32.vlgmr.msrb.gmra.mxu1 %v7519_v1 }
 0x5cc   :  { %2496 = vmatmul.f32.vlgmr.msrb.gmra.mxu2 %v7519_v1  ;;  %2516 = vmatmul.f32.vlgmr.msrb.gmra.mxu3 %v7519_v1 }
 0x5cd   :  { %2912 = vmatpush.msrb.mxu2 %v6051_v55  ;;  %v2193_v55 = vpop.f32.mrf.mxu0 }
 0x5cf   :  { %2913 = vmatpush.msrb.mxu2 %v6054_v58  ;;  %v2234_v58 = vpop.f32.mrf.mxu1 }
 0x5d1   :  { %2914 = vmatpush.msrb.mxu2 %v6059_v60  ;;  %v2316_v60 = vpop.f32.mrf.mxu3 }
 0x5d3   :  { %2915 = vmatpush.msrb.mxu2 %v6075_v7 }
 0x5d5   :  { %2916 = vmatpush.msrb.mxu2 %v6083_v45  ;;  %v6342_v7 = vpop.f32.mrf.mxu0 }
 0x5d7   :  { %2917 = vmatpush.msrb.mxu2 %v6099_v12  ;;  %v6344_v45 = vpop.f32.mrf.mxu1  ;;  %v2275_v12 = vpop.f32.mrf.mxu2 }
 0x5d9   :  { %2918 = vmatpush.msrb.mxu2 %v6111_v61  ;;  %v6346_v61 = vpop.f32.mrf.mxu3 }
 0x5db   :  { %2919 = vmatpush.msrb.mxu2 %v6145_v20 }
 0x5dd   :  { %2920 = vmatpush.msrb.mxu2 %v6151_v24  ;;  %v6348_v20 = vpop.f32.mrf.mxu0 }
 0x5de   :  { %7525 = vst [vmem:[#allocation20_spill] sm:$0xff] %v6348_v20 }
 0x5df   :  { %2921 = vmatpush.msrb.mxu2 %v6163_v18  ;;  %v6350_v24 = vpop.f32.mrf.mxu1  ;;  %v6352_v18 = vpop.f32.mrf.mxu2 }
 0x5e0   :  { %7526 = vst [vmem:[#allocation28_spill] sm:$0xff] %v6350_v24 }
 0x5e1   :  { %2922 = vmatpush.msrb.mxu2 %v6175_v32  ;;  %7527 = vst [vmem:[#allocation37_spill] sm:$0xff] %v6352_v18  ;;  %v6354_v32 = vpop.f32.mrf.mxu3 }
 0x5e2   :  { %7528 = vst [vmem:[#allocation27_spill] sm:$0xff] %v6354_v32 }
 0x5e3   :  { %2923 = vmatpush.msrb.mxu2 %v7512_v31 }
 0x5e5   :  { %2924 = vmatpush.msrb.mxu2 %v6203_v23 }
 0x5e7   :  { %2925 = vmatpush.msrb.mxu2 %v6215_v10  ;;  %v6356_v10 = vpop.f32.mrf.mxu0  ;;  %v6360_v23 = vpop.f32.mrf.mxu2 }
 0x5e8   :  { %7529 = vst [vmem:[#allocation44_spill] sm:$0xff] %v6356_v10 }
 0x5e9   :  { %2926 = vmatpush.msrb.mxu2 %v6227_v2  ;;  %7531 = vst [vmem:[#allocation60_spill] sm:$0xff] %v6360_v23  ;;  %v6362_v2 = vpop.f32.mrf.mxu3 }
 0x5ea   :  { %7532 = vst [vmem:[#allocation57_spill] sm:$0xff] %v6362_v2 }
 0x5eb   :  { %2927 = vmatpush.msrb.mxu2 %v6234_v63  ;;  %v6358_v63 = vpop.f32.mrf.mxu1 }
 0x5ec   :  { %7530 = vst [vmem:[#allocation59_spill] sm:$0xff] %v6358_v63 }
 0x5ef   :  { %v6364_v16 = vpop.f32.mrf.mxu0  ;;  %v6368_v56 = vpop.f32.mrf.mxu2 }
 0x5f0   :  { %7533 = vst [vmem:[#allocation61_spill] sm:$0xff] %v6364_v16 }
 0x5f1   :  { %7535 = vst [vmem:[#allocation47_spill] sm:$0xff] %v6368_v56  ;;  %v6370_v44 = vpop.f32.mrf.mxu3 }
 0x5f2   :  { %7536 = vst [vmem:[#allocation48_spill] sm:$0xff] %v6370_v44  ;;  %v2166_v44 = vld [vmem:[%s7248_s6] sm:$0xf] }
 0x5f3   :  { %v6366_v25 = vpop.f32.mrf.mxu1  ;;  %v6405_v32 = vperm.slane %v2166_v44, 3 }
 0x5f4   :  { %7534 = vst [vmem:[#allocation46_spill] sm:$0xff] %v6366_v25 }
 0x5f5   :  { %7551 = vst [vmem:[#allocation39_spill] sm:$0xff] %v6405_v32  ;;  %v2317_v24 = vadd.f32 %v2316_v60, %v6405_v32 }
 0x5f7   :  { %v6372_v15 = vpop.f32.mrf.mxu0  ;;  %v6376_v21 = vpop.f32.mrf.mxu2 }
 0x5f8   :  { %7537 = vst [vmem:[#allocation35_spill] sm:$0xff] %v6372_v15 }
 0x5f9   :  { %7539 = vst [vmem:[#allocation36_spill] sm:$0xff] %v6376_v21  ;;  %v6378_v31 = vpop.f32.mrf.mxu3  ;;  %v6397_v21 = vperm.slane %v2166_v44, 1 }
 0x5fa   :  { %7540 = vst [vmem:[#allocation31_spill] sm:$0xff] %v6378_v31 }
 0x5fb   :  { %v6374_v40 = vpop.f32.mrf.mxu1  ;;  %7548 = vst [vmem:[#allocation58_spill] sm:$0xff] %v6397_v21 }
 0x5fc   :  { %7538 = vst [vmem:[#allocation21_spill] sm:$0xff] %v6374_v40  ;;  %v6395_v40 = vperm.slane %v2166_v44, 0 }
 0x5fe   :  { %7547 = vst [vmem:[#allocation56_spill] sm:$0xff] %v6395_v40 }
 0x5ff   :  { %v6380_v1 = vpop.f32.mrf.mxu0  ;;  %v6384_v2 = vpop.f32.mrf.mxu2 }
 0x600   :  { %7541 = vst [vmem:[#allocation40_spill] sm:$0xff] %v6380_v1  ;;  %v2194_v1 = vadd.f32 %v2193_v55, %v6395_v40 }
 0x601   :  { %7543 = vst [vmem:[#allocation30_spill] sm:$0xff] %v6384_v2  ;;  %v6386_v16 = vpop.f32.mrf.mxu3 }
 0x602   :  { %7544 = vst [vmem:[#allocation42_spill] sm:$0xff] %v6386_v16 }
 0x603   :  { %v6382_v63 = vpop.f32.mrf.mxu1 }
 0x604   :  { %7542 = vst [vmem:[#allocation38_spill] sm:$0xff] %v6382_v63  ;;  %v2235_v63 = vadd.f32 %v2234_v58, %v6397_v21 }
 0x607   :  { %v6401_v31 = vpop.f32.mrf.mxu2 }
 0x608   :  { %7549 = vst [vmem:[#allocation22_spill] sm:$0xff] %v6401_v31 }
 0x640   :  { %v6391_v25 = vpop.f32.mrf.mxu0  ;;  %v6393_v15 = vpop.f32.mrf.mxu1 }
 0x641   :  { %7545 = vst [vmem:[#allocation45_spill] sm:$0xff] %v6391_v25 }
 0x642   :  { %7546 = vst [vmem:[#allocation55_spill] sm:$0xff] %v6393_v15 }
 0x647   :  { %v6403_v2 = vpop.f32.mrf.mxu3  ;;  %v6408_v20 = vpop.f32.mrf.mxu2 }
 0x648   :  { %7550 = vst [vmem:[#allocation34_spill] sm:$0xff] %v6403_v2  ;;  %v2457_v16 = vpop.f32.mrf.mxu0  ;;  %v2477_v56 = vpop.f32.mrf.mxu1 }
 0x649   :  { %v2520_v10 = vadd.f32 %v2457_v16, %v2194_v1  ;;  %v2521_v23 = vadd.f32 %v2477_v56, %v2235_v63  ;;  %7552 = vst [vmem:[#allocation33_spill] sm:$0xff] %v6408_v20  ;;  %v6410_v16 = vperm.slane %v2166_v44, 2 }
 0x64b   :  { %v4254_v25 = vmul.f32 -1.442695, %v2520_v10  ;;  %v4255_v15 = vmul.f32 -1.442695, %v2521_v23  ;;  %7553 = vst [vmem:[#allocation49_spill] sm:$0xff] %v6410_v16  ;;  %v2276_v23 = vadd.f32 %v2275_v12, %v6410_v16 }
 0x64d   :  { %4426 = vpow2.f32 %v4254_v25 }
 0x64e   :  { %4428 = vpow2.f32 %v4255_v15 }
 0x64f   :  { %v2517_v55 = vpop.f32.mrf.mxu3  ;;  %v2497_v10 = vpop.f32.mrf.mxu2 }
 0x650   :  { %v2523_v58 = vadd.f32 %v2517_v55, %v2317_v24  ;;  %v2522_v56 = vadd.f32 %v2497_v10, %v2276_v23 }
 0x652   :  { %v4256_v18 = vmul.f32 -1.442695, %v2523_v58 }
 0x653   :  { %v4427_v31 = vpop.eup %4426 }
 0x654   :  { %v4429_v19 = vpop.eup %4428  ;;  %v2527_v2 = vadd.f32 1.0, %v4427_v31  ;;  %4430 = vpow2.f32 %v4256_v18 }
 0x655   :  { %v2546_v35 = vadd.f32 1.0, %v4429_v19 }
 0x656   :  { %4432 = vrcp.f32 %v2527_v2  ;;  %v2539_v31 = vand.u32 2147483648, %v2527_v2  ;;  %v2537_v44 = vand.u32 2147483647, %v2527_v2  ;;  %vm2533_vm3 = vweird.f32 %v2527_v2 }
 0x657   :  { %4434 = vrcp.f32 %v2546_v35  ;;  %v2558_v19 = vand.u32 2147483648, %v2546_v35  ;;  %v2556_v53 = vand.u32 2147483647, %v2546_v35  ;;  %vm2552_vm4 = vweird.f32 %v2546_v35 }
 0x658   :  { %v2540_v10 = vor.u32 1.1754944e-38, %v2539_v31  ;;  %vm2538_vm6 = vcmp.eq.f32.partialorder %v2537_v44, 8.507059e+37  ;;  %v6442_v44 = vld [vmem:[#allocation11 + $0x1a8] sm:$0xff] }
 0x659   :  { %v2559_v16 = vor.u32 1.1754944e-38, %v2558_v19  ;;  %vm2557_vm8 = vcmp.eq.f32.partialorder %v2556_v53, 8.507059e+37 }
 0x65a   :  { %v4431_v63 = vpop.eup %4430 }
 0x65b   :  { %v2566_v60 = vadd.f32 1.0, %v4431_v63 }
 0x65c   :  { %v4433_v25 = vpop.eup %4432 }
 0x65d   :  { %v4435_v15 = vpop.eup %4434  ;;  %v2529_v1 = vmul.f32 %v4433_v25, %v2527_v2  ;;  %4436 = vrcp.f32 %v2566_v60  ;;  %vm2534_vm1 = vweird.f32 %v4433_v25  ;;  %vm2572_vm10 = vweird.f32 %v2566_v60 }
 0x65e   :  { %v2548_v24 = vmul.f32 %v4435_v15, %v2546_v35  ;;  %4438 = vtanh.f32 %v2522_v56  ;;  %vm2553_vm2 = vweird.f32 %v4435_v15  ;;  %vm2535_vm5 = vmor %vm2533_vm3, %vm2534_vm1  ;;  %v2576_v2 = vand.u32 2147483647, %v2566_v60 }
 0x65f   :  { %v2530_v55 = vsub.f32 1.0, %v2529_v1  ;;  %vm2554_vm7 = vmor %vm2552_vm4, %vm2553_vm2 }
 0x660   :  { %v2549_v58 = vsub.f32 1.0, %v2548_v24  ;;  %vm2577_vm12 = vcmp.eq.f32.partialorder %v2576_v2, 8.507059e+37 }
 0x661   :  { %v2531_v18 = vmul.f32 %v4433_v25, %v2530_v55 }
 0x662   :  { %v2550_v20 = vmul.f32 %v4435_v15, %v2549_v58 }
 0x663   :  { %v4437_v13 = vpop.eup %4436  ;;  %v2532_v12 = vadd.f32 %v4433_v25, %v2531_v18 }
 0x664   :  { %v2551_v63 = vadd.f32 %v4435_v15, %v2550_v20  ;;  %v2568_v23 = vmul.f32 %v4437_v13, %v2566_v60  ;;  %v4439_v56 = vpop.eup %4438  ;;  %vm2573_vm9 = vweird.f32 %v4437_v13  ;;  %v2578_v20 = vand.u32 2147483648, %v2566_v60  ;;  %v6440_v60 = vld [vmem:[#allocation11 + $0x1a0] sm:$0xff] }
 0x665   :  { %v2536_v1 = vsel %vm2535_vm5, %v4433_v25, %v2532_v12  ;;  %vm2574_vm11 = vmor %vm2572_vm10, %vm2573_vm9 }
 0x666   :  { %v2541_v24 = vsel %vm2538_vm6, %v2540_v10, %v2536_v1  ;;  %v2555_v55 = vsel %vm2554_vm7, %v4435_v15, %v2551_v63  ;;  %v2569_v0 = vsub.f32 1.0, %v2568_v23  ;;  %v2579_v31 = vor.u32 1.1754944e-38, %v2578_v20 }
 0x667   :  { %v2560_v58 = vsel %vm2557_vm8, %v2559_v16, %v2555_v55  ;;  %v2583_v62 = vmul.f32 %v4439_v56, %v2541_v24  ;;  %v6435_v16 = vld [vmem:[#allocation11 + $0x1d8] sm:$0xff] }
 0x668   :  { %v2582_v30 = vmul.f32 0.0, %v2560_v58  ;;  %v2570_v33 = vmul.f32 %v4437_v13, %v2569_v0  ;;  %v6431_v0 = vld [vmem:[#allocation11 + $0x1c0] sm:$0xff] }
 0x66a   :  { %v6413_v18 = vadd.f32 %v2583_v62, %v2582_v30  ;;  %v2571_v35 = vadd.f32 %v4437_v13, %v2570_v33  ;;  %v6422_v62 = vld [vmem:[#allocation11 + $0x1e0] sm:$0xff]  ;;  %v6424_v33 = vld [vmem:[#allocation11 + $0x1e8] sm:$0xff]  ;;  %v6426_v30 = vld [vmem:[#allocation11 + $0x1f8] sm:$0xff] }
 0x66b   :  { %2872 = vmatpush.msrb.mxu0 %v6422_v62  ;;  %2892 = vmatpush.msrb.mxu1 %v6424_v33 }
 0x66c   :  { %4440 = vtanh.f32 %v6413_v18  ;;  %v2575_v25 = vsel %vm2574_vm11, %v4437_v13, %v2571_v35  ;;  %2932 = vmatpush.msrb.mxu3 %v6426_v30  ;;  %v6433_v13 = vld [vmem:[#allocation11 + $0x1c8] sm:$0xff] }
 0x66d   :  { %v2580_v53 = vsel %vm2577_vm12, %v2579_v31, %v2575_v25  ;;  %2873 = vmatpush.msrb.mxu0 %v6431_v0  ;;  %2893 = vmatpush.msrb.mxu1 %v6433_v13 }
 0x66e   :  { %2933 = vmatpush.msrb.mxu3 %v6435_v16 }
 0x66f   :  { %2874 = vmatpush.msrb.mxu0 %v6440_v60  ;;  %2894 = vmatpush.msrb.mxu1 %v6442_v44 }
 0x670   :  { %2934 = vmatpush.msrb.mxu3 %v6057_v29  ;;  %v2197_v29 = vadd.f32 %v6342_v7, %v6395_v40 }
 0x671   :  { %2875 = vmatpush.msrb.mxu0 %v6061_v6  ;;  %2895 = vmatpush.msrb.mxu1 %v6063_v8  ;;  %v2238_v6 = vadd.f32 %v6344_v45, %v6397_v21 }
 0x672   :  { %v4441_v15 = vpop.eup %4440  ;;  %2935 = vmatpush.msrb.mxu3 %v6073_v59 }
 0x673   :  { %v6416_v19 = vmul.f32 %v4441_v15, %v2580_v53  ;;  %2876 = vmatpush.msrb.mxu0 %v6066_v27  ;;  %2896 = vmatpush.msrb.mxu1 %v6071_v4 }
 0x674   :  { %2936 = vmatpush.msrb.mxu3 %v6081_v3 }
 0x675   :  { %7554 = vst [vmem:[#allocation50_spill] sm:$0xff] %v6416_v19  ;;  %2672 = vmatmul.f32.vlgmr.msra.gmra.mxu0 %v6416_v19  ;;  %2692 = vmatmul.f32.vlgmr.msra.gmra.mxu1 %v6416_v19 }
 0x676   :  { %2712 = vmatmul.f32.vlgmr.msra.gmra.mxu2 %v6416_v19  ;;  %2732 = vmatmul.f32.vlgmr.msra.gmra.mxu3 %v6416_v19  ;;  %v6652_v19 = vld [vmem:[#allocation11 + $0x50] sm:$0xff] }
 0x677   :  { %2877 = vmatpush.msrb.mxu0 %v6091_v36  ;;  %2897 = vmatpush.msrb.mxu1 %v6093_v46  ;;  %v2320_v46 = vadd.f32 %v6346_v61, %v6405_v32 }
 0x678   :  { %2937 = vmatpush.msrb.mxu3 %v6095_v43 }
 0x679   :  { %2878 = vmatpush.msrb.mxu0 %v6101_v37  ;;  %2898 = vmatpush.msrb.mxu1 %v6103_v57  ;;  %v7555_v57 = vld [vmem:[#allocation24_spill] sm:$0xff] }
 0x67a   :  { %2938 = vmatpush.msrb.mxu3 %v6106_v48 }
 0x67b   :  { %2879 = vmatpush.msrb.mxu0 %v6113_v49  ;;  %2899 = vmatpush.msrb.mxu1 %v6115_v38  ;;  %v7556_v49 = vld [vmem:[#allocation23_spill] sm:$0xff] }
 0x67c   :  { %2939 = vmatpush.msrb.mxu3 %v6125_v34 }
 0x67d   :  { %2880 = vmatpush.msrb.mxu0 %v6121_v26  ;;  %2900 = vmatpush.msrb.mxu1 %v6123_v51  ;;  %v7557_v26 = vld [vmem:[#allocation29_spill] sm:$0xff] }
 0x67e   :  { %2940 = vmatpush.msrb.mxu3 %v6132_v17  ;;  %v7558_v51 = vld [vmem:[#allocation41_spill] sm:$0xff] }
 0x67f   :  { %2881 = vmatpush.msrb.mxu0 %v6128_v39  ;;  %2901 = vmatpush.msrb.mxu1 %v6130_v28  ;;  %v7559_v28 = vld [vmem:[#allocation32_spill] sm:$0xff] }
 0x680   :  { %2941 = vmatpush.msrb.mxu3 %v6138_v42  ;;  %v7560_v42 = vld [vmem:[#allocation19_spill] sm:$0xff] }
 0x681   :  { %2882 = vmatpush.msrb.mxu0 %v6141_v50  ;;  %2902 = vmatpush.msrb.mxu1 %v6143_v14  ;;  %v7561_v50 = vld [vmem:[#allocation26_spill] sm:$0xff]  ;;  %v7562_v14 = vld [vmem:[#allocation25_spill] sm:$0xff] }
 0x682   :  { %2942 = vmatpush.msrb.mxu3 %v6149_v54 }
 0x683   :  { %2883 = vmatpush.msrb.mxu0 %v6155_v11  ;;  %2903 = vmatpush.msrb.mxu1 %v7510_v52  ;;  %v7563_v52 = vld [vmem:[#allocation49_spill] sm:$0xff] }
 0x684   :  { %2943 = vmatpush.msrb.mxu3 %v7511_v5  ;;  %v7564_v5 = vld [vmem:[#allocation37_spill] sm:$0xff] }
 0x685   :  { %2884 = vmatpush.msrb.mxu0 %v7513_v22  ;;  %2904 = vmatpush.msrb.mxu1 %v7514_v9  ;;  %v2279_v22 = vadd.f32 %v7564_v5, %v7563_v52  ;;  %v6544_v5 = vld [vmem:[#allocation11 + $0x178] sm:$0xff] }
 0x686   :  { %2944 = vmatpush.msrb.mxu3 %v7515_v41  ;;  %7566 = vst [vmem:[#allocation51_spill] sm:$0xff] %v6544_v5 }
 0x687   :  { %2885 = vmatpush.msrb.mxu0 %v7516_v47  ;;  %2905 = vmatpush.msrb.mxu1 %v7555_v57 }
 0x688   :  { %2945 = vmatpush.msrb.mxu3 %v7556_v49 }
 0x689   :  { %2886 = vmatpush.msrb.mxu0 %v7557_v26  ;;  %2906 = vmatpush.msrb.mxu1 %v7558_v51  ;;  %v6515_v51 = vld [vmem:[#allocation11 + $0x1d0] sm:$0xff] }
 0x68a   :  { %2946 = vmatpush.msrb.mxu3 %v7559_v28  ;;  %v6524_v28 = vld [vmem:[#allocation11 + $0x180] sm:$0xff] }
 0x68b   :  { %2887 = vmatpush.msrb.mxu0 %v7560_v42  ;;  %2907 = vmatpush.msrb.mxu1 %v7561_v50  ;;  %v6528_v42 = vld [vmem:[#allocation11 + $0x190] sm:$0xff]  ;;  %v6532_v50 = vld [vmem:[#allocation11 + $0x198] sm:$0xff] }
 0x68c   :  { %2947 = vmatpush.msrb.mxu3 %v7562_v14  ;;  %v6536_v14 = vld [vmem:[#allocation11 + $0x160] sm:$0xff] }
 0x68d   :  { %3088 = vmatpush.msra.mxu0 %v6422_v62  ;;  %3108 = vmatpush.msra.mxu1 %v6424_v33 }
 0x68e   :  { %3148 = vmatpush.msra.mxu3 %v6426_v30 }
 0x68f   :  { %3089 = vmatpush.msra.mxu0 %v6431_v0  ;;  %3109 = vmatpush.msra.mxu1 %v6433_v13 }
 0x690   :  { %3149 = vmatpush.msra.mxu3 %v6435_v16 }
 0x691   :  { %3090 = vmatpush.msra.mxu0 %v6440_v60  ;;  %3110 = vmatpush.msra.mxu1 %v6442_v44 }
 0x693   :  { %3091 = vmatpush.msra.mxu0 %v6524_v28 }
 0x695   :  { %3092 = vmatpush.msra.mxu0 %v6536_v14 }
 0x6f2   :  { %v2673_v8 = vpop.f32.mrf.mxu0  ;;  %v2693_v27 = vpop.f32.mrf.mxu1 }
 0x6f3   :  { %v2736_v4 = vadd.f32 %v2673_v8, %v2197_v29  ;;  %v2737_v59 = vadd.f32 %v2693_v27, %v2238_v6 }
 0x6f5   :  { %v4257_v3 = vmul.f32 -1.442695, %v2736_v4  ;;  %v4258_v36 = vmul.f32 -1.442695, %v2737_v59 }
 0x6f7   :  { %4442 = vpow2.f32 %v4257_v3 }
 0x6f8   :  { %4444 = vpow2.f32 %v4258_v36 }
 0x6f9   :  { %v2733_v43 = vpop.f32.mrf.mxu3  ;;  %v2713_v54 = vpop.f32.mrf.mxu2 }
 0x6fa   :  { %v2739_v37 = vadd.f32 %v2733_v43, %v2320_v46  ;;  %v2738_v47 = vadd.f32 %v2713_v54, %v2279_v22  ;;  %v6538_v54 = vld [vmem:[#allocation11 + $0x168] sm:$0xff]  ;;  %v6548_v22 = vld [vmem:[#allocation11 + $0x140] sm:$0xff] }
 0x6fb   :  { %3093 = vmatpush.msra.mxu0 %v6548_v22 }
 0x6fc   :  { %v4259_v48 = vmul.f32 -1.442695, %v2739_v37 }
 0x6fd   :  { %v4443_v38 = vpop.eup %4442 }
 0x6fe   :  { %v4445_v34 = vpop.eup %4444  ;;  %v2743_v39 = vadd.f32 1.0, %v4443_v38  ;;  %4446 = vpow2.f32 %v4259_v48 }
 0x6ff   :  { %v2762_v17 = vadd.f32 1.0, %v4445_v34  ;;  %v6518_v34 = vld [vmem:[#allocation11 + $0x1b0] sm:$0xff] }
 0x700   :  { %4448 = vrcp.f32 %v2743_v39  ;;  %v2755_v63 = vand.u32 2147483648, %v2743_v39  ;;  %v2753_v56 = vand.u32 2147483647, %v2743_v39  ;;  %vm2749_vm15 = vweird.f32 %v2743_v39 }
 0x701   :  { %4450 = vrcp.f32 %v2762_v17  ;;  %v2774_v23 = vand.u32 2147483648, %v2762_v17  ;;  %v2772_v55 = vand.u32 2147483647, %v2762_v17  ;;  %vm2768_vm0 = vweird.f32 %v2762_v17 }
 0x702   :  { %v2756_v20 = vor.u32 1.1754944e-38, %v2755_v63  ;;  %vm2754_vm3 = vcmp.eq.f32.partialorder %v2753_v56, 8.507059e+37  ;;  %v6574_v63 = vld [vmem:[#allocation11 + $0x108] sm:$0xff]  ;;  %v6584_v56 = vld [vmem:[#allocation11 + $0xe0] sm:$0xff] }
 0x703   :  { %v2775_v31 = vor.u32 1.1754944e-38, %v2774_v23  ;;  %vm2773_vm4 = vcmp.eq.f32.partialorder %v2772_v55, 8.507059e+37  ;;  %v6576_v23 = vld [vmem:[#allocation11 + $0x110] sm:$0xff] }
 0x704   :  { %v4447_v11 = vpop.eup %4446  ;;  %v6588_v55 = vld [vmem:[#allocation11 + $0xf0] sm:$0xff] }
 0x705   :  { %v2782_v9 = vadd.f32 1.0, %v4447_v11  ;;  %v6540_v11 = vld [vmem:[#allocation11 + $0x170] sm:$0xff] }
 0x706   :  { %v4449_v41 = vpop.eup %4448 }
 0x707   :  { %v4451_v7 = vpop.eup %4450  ;;  %v2745_v45 = vmul.f32 %v4449_v41, %v2743_v39  ;;  %4452 = vrcp.f32 %v2782_v9  ;;  %vm2750_vm13 = vweird.f32 %v4449_v41  ;;  %v2794_v43 = vand.u32 2147483648, %v2782_v9  ;;  %v6520_v39 = vld [vmem:[#allocation11 + $0x1b8] sm:$0xff] }
 0x708   :  { %v2764_v61 = vmul.f32 %v4451_v7, %v2762_v17  ;;  %4454 = vtanh.f32 %v2738_v47  ;;  %vm2769_vm14 = vweird.f32 %v4451_v7  ;;  %vm2751_vm1 = vmor %vm2749_vm15, %vm2750_vm13  ;;  %vm2788_vm6 = vweird.f32 %v2782_v9  ;;  %3150 = vmatpush.msra.mxu3 %v6520_v39  ;;  %v6526_v17 = vld [vmem:[#allocation11 + $0x188] sm:$0xff]  ;;  %v6556_v47 = vld [vmem:[#allocation11 + $0x158] sm:$0xff] }
 0x709   :  { %v2746_v12 = vsub.f32 1.0, %v2745_v45  ;;  %vm2770_vm2 = vmor %vm2768_vm0, %vm2769_vm14  ;;  %v2792_v37 = vand.u32 2147483647, %v2782_v9  ;;  %v2795_v48 = vor.u32 1.1754944e-38, %v2794_v43  ;;  %3111 = vmatpush.msra.mxu1 %v6526_v17  ;;  %v6562_v45 = vld [vmem:[#allocation11 + $0x128] sm:$0xff] }
 0x70a   :  { %v2765_v10 = vsub.f32 1.0, %v2764_v61  ;;  %3151 = vmatpush.msra.mxu3 %v6532_v50  ;;  %7569 = vst [vmem:[#allocation54_spill] sm:$0xff] %v6562_v45  ;;  %v6564_v61 = vld [vmem:[#allocation11 + $0x130] sm:$0xff] }
 0x70b   :  { %v2747_v1 = vmul.f32 %v4449_v41, %v2746_v12  ;;  %vm2793_vm8 = vcmp.eq.f32.partialorder %v2792_v37, 8.507059e+37  ;;  %3112 = vmatpush.msra.mxu1 %v6538_v54  ;;  %v6568_v12 = vld [vmem:[#allocation11 + $0x138] sm:$0xff] }
 0x70c   :  { %v2766_v24 = vmul.f32 %v4451_v7, %v2765_v10  ;;  %3152 = vmatpush.msra.mxu3 %v6544_v5  ;;  %7570 = vst [vmem:[#allocation24_spill] sm:$0xff] %v6568_v12  ;;  %v6572_v10 = vld [vmem:[#allocation11 + $0x100] sm:$0xff] }
 0x70d   :  { %v4453_v58 = vpop.eup %4452  ;;  %v2748_v35 = vadd.f32 %v4449_v41, %v2747_v1  ;;  %v6580_v1 = vld [vmem:[#allocation11 + $0x118] sm:$0xff] }
 0x70e   :  { %v2767_v2 = vadd.f32 %v4451_v7, %v2766_v24  ;;  %v2784_v25 = vmul.f32 %v4453_v58, %v2782_v9  ;;  %v4455_v53 = vpop.eup %4454  ;;  %vm2789_vm5 = vweird.f32 %v4453_v58  ;;  %v6550_v9 = vld [vmem:[#allocation11 + $0x148] sm:$0xff]  ;;  %3153 = vmatpush.msra.mxu3 %v6556_v47 }
 0x70f   :  { %v2752_v15 = vsel %vm2751_vm1, %v4449_v41, %v2748_v35  ;;  %vm2790_vm7 = vmor %vm2788_vm6, %vm2789_vm5  ;;  %7567 = vst [vmem:[#allocation52_spill] sm:$0xff] %v6550_v9  ;;  %v6552_v41 = vld [vmem:[#allocation11 + $0x150] sm:$0xff]  ;;  %3113 = vmatpush.msra.mxu1 %v6550_v9  ;;  %v6586_v24 = vld [vmem:[#allocation11 + $0xe8] sm:$0xff] }
 0x710   :  { %v2757_v29 = vsel %vm2754_vm3, %v2756_v20, %v2752_v15  ;;  %v2771_v6 = vsel %vm2770_vm2, %v4451_v7, %v2767_v2  ;;  %v2785_v8 = vsub.f32 1.0, %v2784_v25  ;;  %v6560_v7 = vld [vmem:[#allocation11 + $0x120] sm:$0xff]  ;;  %3154 = vmatpush.msra.mxu3 %v6568_v12  ;;  %v7572_v20 = vld [vmem:[#allocation28_spill] sm:$0xff]  ;;  %v6596_v25 = vld [vmem:[#allocation11 + $0xf8] sm:$0xff] }
 0x711   :  { %v2776_v27 = vsel %vm2773_vm4, %v2775_v31, %v2771_v6  ;;  %v2799_v4 = vmul.f32 %v4455_v53, %v2757_v29  ;;  %7568 = vst [vmem:[#allocation53_spill] sm:$0xff] %v6560_v7  ;;  %3094 = vmatpush.msra.mxu0 %v6560_v7  ;;  %3114 = vmatpush.msra.mxu1 %v6562_v45  ;;  %v6600_v53 = vld [vmem:[#allocation11 + $0xc0] sm:$0xff]  ;;  %v6602_v29 = vld [vmem:[#allocation11 + $0xc8] sm:$0xff]  ;;  %v6604_v6 = vld [vmem:[#allocation11 + $0xd0] sm:$0xff] }
 0x712   :  { %v2798_v59 = vmul.f32 %v2776_v27, %v6413_v18  ;;  %v2786_v3 = vmul.f32 %v4453_v58, %v2785_v8  ;;  %v6512_v18 = vld [vmem:[#allocation11 + $0x1f0] sm:$0xff]  ;;  %3155 = vmatpush.msra.mxu3 %v6580_v1  ;;  %v2241_v2 = vadd.f32 %v7572_v20, %v6397_v21  ;;  %v6636_v20 = vld [vmem:[#allocation11 + $0x68] sm:$0xff] }
 0x713   :  { %3128 = vmatpush.msra.mxu2 %v6512_v18  ;;  %3095 = vmatpush.msra.mxu0 %v6572_v10  ;;  %7575 = vst [vmem:[#allocation41_spill] sm:$0xff] %v6636_v20  ;;  %v6660_v21 = vld [vmem:[#allocation11 + $0x28] sm:$0xff] }
 0x714   :  { %v6503_v36 = vadd.f32 %v2799_v4, %v2798_v59  ;;  %v2787_v46 = vadd.f32 %v4453_v58, %v2786_v3  ;;  %3115 = vmatpush.msra.mxu1 %v6574_v63  ;;  %3156 = vmatpush.msra.mxu3 %v6596_v25  ;;  %v6608_v4 = vld [vmem:[#allocation11 + $0xd8] sm:$0xff]  ;;  %v6612_v59 = vld [vmem:[#allocation11 + $0xa0] sm:$0xff]  ;;  %v6614_v3 = vld [vmem:[#allocation11 + $0xa8] sm:$0xff] }
 0x715   :  { %3129 = vmatpush.msra.mxu2 %v6515_v51  ;;  %3096 = vmatpush.msra.mxu0 %v6584_v56 }
 0x716   :  { %4456 = vtanh.f32 %v6503_v36  ;;  %v2791_v57 = vsel %vm2790_vm7, %v4453_v58, %v2787_v46  ;;  %v7571_v58 = vld [vmem:[#allocation20_spill] sm:$0xff]  ;;  %3116 = vmatpush.msra.mxu1 %v6586_v24  ;;  %3157 = vmatpush.msra.mxu3 %v6608_v4  ;;  %v6616_v46 = vld [vmem:[#allocation11 + $0xb0] sm:$0xff] }
 0x717   :  { %v2796_v38 = vsel %vm2793_vm8, %v2795_v48, %v2791_v57  ;;  %3130 = vmatpush.msra.mxu2 %v6518_v34  ;;  %v2200_v35 = vadd.f32 %v7571_v58, %v6395_v40  ;;  %3097 = vmatpush.msra.mxu0 %v6600_v53  ;;  %v6620_v57 = vld [vmem:[#allocation11 + $0xb8] sm:$0xff]  ;;  %v6624_v48 = vld [vmem:[#allocation11 + $0x80] sm:$0xff]  ;;  %v6664_v40 = vld [vmem:[#allocation11 + $0x30] sm:$0xff] }
 0x718   :  { %3117 = vmatpush.msra.mxu1 %v6602_v29  ;;  %3158 = vmatpush.msra.mxu3 %v6620_v57  ;;  %v6632_v58 = vld [vmem:[#allocation11 + $0x98] sm:$0xff] }
 0x719   :  { %3131 = vmatpush.msra.mxu2 %v6528_v42  ;;  %3098 = vmatpush.msra.mxu0 %v6612_v59  ;;  %7573 = vst [vmem:[#allocation23_spill] sm:$0xff] %v6632_v58 }
 0x71a   :  { %3118 = vmatpush.msra.mxu1 %v6614_v3  ;;  %3159 = vmatpush.msra.mxu3 %v6632_v58 }
 0x71b   :  { %3132 = vmatpush.msra.mxu2 %v6540_v11  ;;  %3099 = vmatpush.msra.mxu0 %v6624_v48 }
 0x71c   :  { %v4457_v49 = vpop.eup %4456 }
 0x71d   :  { %v6506_v26 = vmul.f32 %v4457_v49, %v2796_v38  ;;  %3133 = vmatpush.msra.mxu2 %v6552_v41  ;;  %v6626_v49 = vld [vmem:[#allocation11 + $0x88] sm:$0xff]  ;;  %v6628_v38 = vld [vmem:[#allocation11 + $0x90] sm:$0xff] }
 0x71e   :  { %3119 = vmatpush.msra.mxu1 %v6626_v49 }
 0x71f   :  { %7565 = vst [vmem:[#allocation43_spill] sm:$0xff] %v6506_v26  ;;  %2888 = vmatmul.f32.vlgmr.msrb.gmra.mxu0 %v6506_v26  ;;  %2908 = vmatmul.f32.vlgmr.msrb.gmra.mxu1 %v6506_v26 }
 0x720   :  { %2928 = vmatmul.f32.vlgmr.msrb.gmra.mxu2 %v6506_v26  ;;  %2948 = vmatmul.f32.vlgmr.msrb.gmra.mxu3 %v6506_v26  ;;  %v6650_v26 = vld [vmem:[#allocation11 + $0x48] sm:$0xff] }
 0x721   :  { %3134 = vmatpush.msra.mxu2 %v6564_v61  ;;  %3120 = vmatpush.msra.mxu1 %v6636_v20  ;;  %7580 = vst [vmem:[#allocation25_spill] sm:$0xff] %v6650_v26  ;;  %v6666_v20 = vld [vmem:[#allocation11 + $0x38] sm:$0xff] }
 0x723   :  { %3135 = vmatpush.msra.mxu2 %v6576_v23  ;;  %3121 = vmatpush.msra.mxu1 %v6650_v26  ;;  %v6678_v26 = vld [vmem:[#allocation11 + $0x18] sm:$0xff] }
 0x725   :  { %3136 = vmatpush.msra.mxu2 %v6588_v55  ;;  %3122 = vmatpush.msra.mxu1 %v6660_v21 }
 0x727   :  { %3137 = vmatpush.msra.mxu2 %v6604_v6 }
 0x729   :  { %3138 = vmatpush.msra.mxu2 %v6616_v46 }
 0x72b   :  { %3139 = vmatpush.msra.mxu2 %v6628_v38 }
 0x79c   :  { %v2889_v31 = vpop.f32.mrf.mxu0  ;;  %v2909_v15 = vpop.f32.mrf.mxu1 }
 0x79d   :  { %v2952_v8 = vadd.f32 %v2889_v31, %v2200_v35  ;;  %v2953_v27 = vadd.f32 %v2909_v15, %v2241_v2  ;;  %v6634_v35 = vld [vmem:[#allocation11 + $0x60] sm:$0xff]  ;;  %v6642_v15 = vld [vmem:[#allocation11 + $0x70] sm:$0xff] }
 0x79e   :  { %7574 = vst [vmem:[#allocation29_spill] sm:$0xff] %v6634_v35  ;;  %v7576_v2 = vld [vmem:[#allocation27_spill] sm:$0xff]  ;;  %3100 = vmatpush.msra.mxu0 %v6634_v35  ;;  %3140 = vmatpush.msra.mxu2 %v6642_v15 }
 0x79f   :  { %v4260_v43 = vmul.f32 -1.442695, %v2952_v8  ;;  %v4261_v37 = vmul.f32 -1.442695, %v2953_v27  ;;  %v2323_v31 = vadd.f32 %v7576_v2, %v6405_v32  ;;  %7577 = vst [vmem:[#allocation32_spill] sm:$0xff] %v6642_v15  ;;  %v6644_v8 = vld [vmem:[#allocation11 + $0x78] sm:$0xff] }
 0x7a0   :  { %7578 = vst [vmem:[#allocation19_spill] sm:$0xff] %v6644_v8  ;;  %v6646_v27 = vld [vmem:[#allocation11 + $0x40] sm:$0xff]  ;;  %3160 = vmatpush.msra.mxu3 %v6644_v8  ;;  %3141 = vmatpush.msra.mxu2 %v6652_v19 }
 0x7a1   :  { %4458 = vpow2.f32 %v4260_v43  ;;  %7579 = vst [vmem:[#allocation26_spill] sm:$0xff] %v6646_v27  ;;  %v6658_v32 = vld [vmem:[#allocation11 + $0x20] sm:$0xff]  ;;  %3101 = vmatpush.msra.mxu0 %v6646_v27  ;;  %v6676_v27 = vld [vmem:[#allocation11 + $0x10] sm:$0xff] }
 0x7a2   :  { %4460 = vpow2.f32 %v4261_v37  ;;  %v6654_v37 = vld [vmem:[#allocation11 + $0x58] sm:$0xff]  ;;  %7581 = vst [vmem:[#allocation37_spill] sm:$0xff] %v6676_v27  ;;  %3142 = vmatpush.msra.mxu2 %v6664_v40 }
 0x7a3   :  { %v2949_v43 = vpop.f32.mrf.mxu3  ;;  %3161 = vmatpush.msra.mxu3 %v6654_v37  ;;  %3102 = vmatpush.msra.mxu0 %v6658_v32 }
 0x7a4   :  { %v2955_v2 = vadd.f32 %v2949_v43, %v2323_v31  ;;  %v6670_v31 = vld [vmem:[#allocation11] sm:$0xff]  ;;  %v6672_v43 = vld [vmem:[#allocation11 + $0x8] sm:$0xff]  ;;  %3143 = vmatpush.msra.mxu2 %v6676_v27 }
 0x7a5   :  { %3162 = vmatpush.msra.mxu3 %v6666_v20  ;;  %3103 = vmatpush.msra.mxu0 %v6670_v31 }
 0x7a6   :  { %v4262_v35 = vmul.f32 -1.442695, %v2955_v2  ;;  %3123 = vmatpush.msra.mxu1 %v6672_v43  ;;  %3344 = vmatpush.msrb.mxu2 %v6512_v18 }
 0x7a7   :  { %v4459_v8 = vpop.eup %4458  ;;  %3163 = vmatpush.msra.mxu3 %v6678_v26  ;;  %3304 = vmatpush.msrb.mxu0 %v6422_v62 }
 0x7a8   :  { %v4461_v15 = vpop.eup %4460  ;;  %v6680_v58 = vadd.f32 1.0, %v4459_v8  ;;  %4462 = vpow2.f32 %v4262_v35  ;;  %3324 = vmatpush.msrb.mxu1 %v6424_v33  ;;  %v2929_v35 = vpop.f32.mrf.mxu2  ;;  %v7582_v8 = vld [vmem:[#allocation60_spill] sm:$0xff]  ;;  %3345 = vmatpush.msrb.mxu2 %v6515_v51 }
 0x7a9   :  { %v6684_v2 = vadd.f32 1.0, %v4461_v15  ;;  %3364 = vmatpush.msrb.mxu3 %v6426_v30  ;;  %3305 = vmatpush.msrb.mxu0 %v6431_v0  ;;  %v2282_v27 = vadd.f32 %v7582_v8, %v7563_v52 }
 0x7aa   :  { %4464 = vrcp.f32 %v6680_v58  ;;  %3325 = vmatpush.msrb.mxu1 %v6433_v13  ;;  %3346 = vmatpush.msrb.mxu2 %v6518_v34  ;;  %v2969_v8 = vand.u32 2147483647, %v6680_v58  ;;  %vm2965_vm11 = vweird.f32 %v6680_v58 }
 0x7ab   :  { %4466 = vrcp.f32 %v6684_v2  ;;  %3365 = vmatpush.msrb.mxu3 %v6435_v16  ;;  %3306 = vmatpush.msrb.mxu0 %v6440_v60  ;;  %v2954_v30 = vadd.f32 %v2929_v35, %v2282_v27  ;;  %v2971_v27 = vand.u32 2147483648, %v6680_v58  ;;  %v2990_v35 = vand.u32 2147483648, %v6684_v2 }
 0x7ac   :  { %3326 = vmatpush.msrb.mxu1 %v6442_v44  ;;  %3347 = vmatpush.msrb.mxu2 %v6528_v42  ;;  %vm2984_vm12 = vweird.f32 %v6684_v2  ;;  %vm2970_vm15 = vcmp.eq.f32.partialorder %v2969_v8, 8.507059e+37  ;;  %v7585_v8 = vld [vmem:[#allocation41_spill] sm:$0xff] }
 0x7ad   :  { %3366 = vmatpush.msrb.mxu3 %v6520_v39  ;;  %3307 = vmatpush.msrb.mxu0 %v6524_v28 }
 0x7ae   :  { %v4463_v15 = vpop.eup %4462  ;;  %3327 = vmatpush.msrb.mxu1 %v6526_v17  ;;  %3348 = vmatpush.msrb.mxu2 %v6540_v11 }
 0x7af   :  { %v6702_v62 = vadd.f32 1.0, %v4463_v15  ;;  %3367 = vmatpush.msrb.mxu3 %v6532_v50  ;;  %3308 = vmatpush.msrb.mxu0 %v6536_v14 }
 0x7b0   :  { %v4465_v33 = vpop.eup %4464  ;;  %3328 = vmatpush.msrb.mxu1 %v6538_v54  ;;  %3349 = vmatpush.msrb.mxu2 %v6552_v41 }
 0x7b1   :  { %v4467_v0 = vpop.eup %4466  ;;  %v2961_v13 = vmul.f32 %v4465_v33, %v6680_v58  ;;  %4468 = vrcp.f32 %v6702_v62  ;;  %3368 = vmatpush.msrb.mxu3 %v6544_v5  ;;  %vm2966_vm9 = vweird.f32 %v4465_v33  ;;  %3309 = vmatpush.msrb.mxu0 %v6548_v22  ;;  %v2991_v58 = vor.u32 1.1754944e-38, %v2990_v35  ;;  %v7584_v35 = vld [vmem:[#allocation29_spill] sm:$0xff] }
 0x7b2   :  { %v2980_v16 = vmul.f32 %v4467_v0, %v6684_v2  ;;  %4470 = vtanh.f32 %v2954_v30  ;;  %3329 = vmatpush.msrb.mxu1 %v6550_v9  ;;  %vm2985_vm10 = vweird.f32 %v4467_v0  ;;  %vm2967_vm13 = vmor %vm2965_vm11, %vm2966_vm9  ;;  %3350 = vmatpush.msrb.mxu2 %v6564_v61  ;;  %vm3004_vm2 = vweird.f32 %v6702_v62 }
 0x7b3   :  { %v2962_v60 = vsub.f32 1.0, %v2961_v13  ;;  %3369 = vmatpush.msrb.mxu3 %v6556_v47  ;;  %3310 = vmatpush.msrb.mxu0 %v6560_v7  ;;  %vm2986_vm14 = vmor %vm2984_vm12, %vm2985_vm10 }
 0x7b4   :  { %v2981_v44 = vsub.f32 1.0, %v2980_v16  ;;  %v2988_v16 = vand.u32 2147483647, %v6684_v2  ;;  %3330 = vmatpush.msrb.mxu1 %v6562_v45  ;;  %3351 = vmatpush.msrb.mxu2 %v6576_v23 }
 0x7b5   :  { %v2963_v15 = vmul.f32 %v4465_v33, %v2962_v60  ;;  %v2972_v60 = vor.u32 1.1754944e-38, %v2971_v27  ;;  %3370 = vmatpush.msrb.mxu3 %v6568_v12  ;;  %3311 = vmatpush.msrb.mxu0 %v6572_v10 }
 0x7b6   :  { %v2982_v13 = vmul.f32 %v4467_v0, %v2981_v44  ;;  %3331 = vmatpush.msrb.mxu1 %v6574_v63  ;;  %vm2989_vm0 = vcmp.eq.f32.partialorder %v2988_v16, 8.507059e+37  ;;  %3352 = vmatpush.msrb.mxu2 %v6588_v55 }
 0x7b7   :  { %v6727_v30 = vpop.eup %4468  ;;  %v2964_v5 = vadd.f32 %v4465_v33, %v2963_v15  ;;  %3371 = vmatpush.msrb.mxu3 %v6580_v1  ;;  %3312 = vmatpush.msrb.mxu0 %v6584_v56 }
 0x7b8   :  { %v2983_v44 = vadd.f32 %v4467_v0, %v2982_v13  ;;  %v3000_v9 = vmul.f32 %v6727_v30, %v6702_v62  ;;  %v4471_v2 = vpop.eup %4470  ;;  %3332 = vmatpush.msrb.mxu1 %v6586_v24  ;;  %3353 = vmatpush.msrb.mxu2 %v6604_v6  ;;  %vm3005_vm1 = vweird.f32 %v6727_v30 }
 0x7b9   :  { %v2968_v15 = vsel %vm2967_vm13, %v4465_v33, %v2964_v5  ;;  %3372 = vmatpush.msrb.mxu3 %v6596_v25  ;;  %3313 = vmatpush.msrb.mxu0 %v6600_v53  ;;  %vm3006_vm3 = vmor %vm3004_vm2, %vm3005_vm1 }
 0x7ba   :  { %v2973_v45 = vsel %vm2970_vm15, %v2972_v60, %v2968_v15  ;;  %v2987_v27 = vsel %vm2986_vm14, %v4467_v0, %v2983_v44  ;;  %v3001_v13 = vsub.f32 1.0, %v3000_v9  ;;  %3333 = vmatpush.msrb.mxu1 %v6602_v29  ;;  %3354 = vmatpush.msrb.mxu2 %v6616_v46  ;;  %v7586_v60 = vld [vmem:[#allocation32_spill] sm:$0xff]  ;;  %v7587_v44 = vld [vmem:[#allocation19_spill] sm:$0xff] }
 0x7bb   :  { %v2992_v7 = vsel %vm2989_vm0, %v2991_v58, %v2987_v27  ;;  %v3015_v12 = vmul.f32 %v4471_v2, %v2973_v45  ;;  %3373 = vmatpush.msrb.mxu3 %v6608_v4  ;;  %3314 = vmatpush.msrb.mxu0 %v6612_v59  ;;  %v3008_v45 = vand.u32 2147483647, %v6702_v62  ;;  %v7589_v58 = vld [vmem:[#allocation25_spill] sm:$0xff] }
 0x7bc   :  { %v3014_v5 = vmul.f32 %v2992_v7, %v6503_v36  ;;  %v3002_v33 = vmul.f32 %v6727_v30, %v3001_v13  ;;  %3334 = vmatpush.msrb.mxu1 %v6614_v3  ;;  %v3010_v7 = vand.u32 2147483648, %v6702_v62  ;;  %3355 = vmatpush.msrb.mxu2 %v6628_v38  ;;  %v7588_v62 = vld [vmem:[#allocation26_spill] sm:$0xff]  ;;  %v7591_v27 = vld [vmem:[#allocation37_spill] sm:$0xff]  ;;  %v7596_v13 = vld [vmem:[#allocation39_spill] sm:$0xff] }
 0x7bd   :  { %3374 = vmatpush.msrb.mxu3 %v6620_v57  ;;  %3315 = vmatpush.msrb.mxu0 %v6624_v48  ;;  %vm3009_vm4 = vcmp.eq.f32.partialorder %v3008_v45, 8.507059e+37 }
 0x7be   :  { %v6751_v9 = vadd.f32 %v3015_v12, %v3014_v5  ;;  %v3003_v36 = vadd.f32 %v6727_v30, %v3002_v33  ;;  %3335 = vmatpush.msrb.mxu1 %v6626_v49  ;;  %v7583_v12 = vld [vmem:[#allocation23_spill] sm:$0xff]  ;;  %v3011_v16 = vor.u32 1.1754944e-38, %v3010_v7  ;;  %3356 = vmatpush.msrb.mxu2 %v7586_v60  ;;  %v7597_v5 = vld [vmem:[#allocation57_spill] sm:$0xff] }
 0x7bf   :  { %3375 = vmatpush.msrb.mxu3 %v7583_v12  ;;  %3316 = vmatpush.msrb.mxu0 %v7584_v35 }
 0x7c0   :  { %4472 = vtanh.f32 %v6751_v9  ;;  %v3007_v0 = vsel %vm3006_vm3, %v6727_v30, %v3003_v36  ;;  %3336 = vmatpush.msrb.mxu1 %v7585_v8  ;;  %3357 = vmatpush.msrb.mxu2 %v6652_v19 }
 0x7c1   :  { %3376 = vmatpush.msrb.mxu3 %v7587_v44  ;;  %3317 = vmatpush.msrb.mxu0 %v7588_v62  ;;  %v3012_v2 = vsel %vm3009_vm4, %v3011_v16, %v3007_v0 }
 0x7c2   :  { %3337 = vmatpush.msrb.mxu1 %v7589_v58  ;;  %3358 = vmatpush.msrb.mxu2 %v6664_v40 }
 0x7c3   :  { %3377 = vmatpush.msrb.mxu3 %v6654_v37  ;;  %3318 = vmatpush.msrb.mxu0 %v6658_v32 }
 0x7c4   :  { %3338 = vmatpush.msrb.mxu1 %v6660_v21  ;;  %3359 = vmatpush.msrb.mxu2 %v7591_v27 }
 0x7c5   :  { %3378 = vmatpush.msrb.mxu3 %v6666_v20  ;;  %3319 = vmatpush.msrb.mxu0 %v6670_v31 }
 0x7c6   :  { %v4473_v15 = vpop.eup %4472  ;;  %3339 = vmatpush.msrb.mxu1 %v6672_v43 }
 0x7c7   :  { %v6778_v30 = vmul.f32 %v4473_v15, %v3012_v2  ;;  %3379 = vmatpush.msrb.mxu3 %v6678_v26  ;;  %v7598_v2 = vld [vmem:[#allocation47_spill] sm:$0xff] }
 0x7c9   :  { %7590 = vst [vmem:[#allocation20_spill] sm:$0xff] %v6778_v30  ;;  %3104 = vmatmul.f32.vlgmr.msra.gmra.mxu0 %v6778_v30  ;;  %3124 = vmatmul.f32.vlgmr.msra.gmra.mxu1 %v6778_v30 }
 0x7ca   :  { %3144 = vmatmul.f32.vlgmr.msra.gmra.mxu2 %v6778_v30  ;;  %3164 = vmatmul.f32.vlgmr.msra.gmra.mxu3 %v6778_v30 }
 0x7cb   :  { %3560 = vmatpush.msra.mxu2 %v6512_v18  ;;  %v7592_v18 = vld [vmem:[#allocation56_spill] sm:$0xff] }
 0x7cd   :  { %3561 = vmatpush.msra.mxu2 %v6515_v51  ;;  %v7593_v51 = vld [vmem:[#allocation44_spill] sm:$0xff] }
 0x7cf   :  { %3562 = vmatpush.msra.mxu2 %v6518_v34  ;;  %v2203_v34 = vadd.f32 %v7593_v51, %v7592_v18 }
 0x7d1   :  { %3563 = vmatpush.msra.mxu2 %v6528_v42  ;;  %v7594_v42 = vld [vmem:[#allocation58_spill] sm:$0xff] }
 0x7d3   :  { %3564 = vmatpush.msra.mxu2 %v6540_v11  ;;  %v7595_v11 = vld [vmem:[#allocation59_spill] sm:$0xff] }
 0x7d5   :  { %3565 = vmatpush.msra.mxu2 %v6552_v41  ;;  %v2244_v41 = vadd.f32 %v7595_v11, %v7594_v42 }
 0x7d7   :  { %3566 = vmatpush.msra.mxu2 %v6564_v61 }
 0x7d9   :  { %3567 = vmatpush.msra.mxu2 %v6576_v23 }
 0x7db   :  { %3568 = vmatpush.msra.mxu2 %v6588_v55 }
 0x7dd   :  { %3569 = vmatpush.msra.mxu2 %v6604_v6 }
 0x7df   :  { %3570 = vmatpush.msra.mxu2 %v6616_v46 }
 0x7e1   :  { %3571 = vmatpush.msra.mxu2 %v6628_v38 }
 0x7e3   :  { %3572 = vmatpush.msra.mxu2 %v7586_v60 }
 0x7e5   :  { %3573 = vmatpush.msra.mxu2 %v6652_v19  ;;  %v2326_v19 = vadd.f32 %v7597_v5, %v7596_v13 }
 0x7e7   :  { %3574 = vmatpush.msra.mxu2 %v6664_v40 }
 0x7e9   :  { %3575 = vmatpush.msra.mxu2 %v7591_v27  ;;  %v2285_v27 = vadd.f32 %v7598_v2, %v7563_v52 }
 0x846   :  { %v3105_v61 = vpop.f32.mrf.mxu0  ;;  %v3125_v23 = vpop.f32.mrf.mxu1 }
 0x847   :  { %v3168_v55 = vadd.f32 %v3105_v61, %v2203_v34  ;;  %v3169_v6 = vadd.f32 %v3125_v23, %v2244_v41 }
 0x849   :  { %v4263_v46 = vmul.f32 -1.442695, %v3168_v55  ;;  %v4264_v38 = vmul.f32 -1.442695, %v3169_v6 }
 0x84b   :  { %4474 = vpow2.f32 %v4263_v46 }
 0x84c   :  { %4476 = vpow2.f32 %v4264_v38 }
 0x84d   :  { %v3165_v40 = vpop.f32.mrf.mxu3  ;;  %v3145_v60 = vpop.f32.mrf.mxu2 }
 0x84e   :  { %v3171_v33 = vadd.f32 %v3165_v40, %v2326_v19  ;;  %v3170_v11 = vadd.f32 %v3145_v60, %v2285_v27 }
 0x850   :  { %v4265_v36 = vmul.f32 -1.442695, %v3171_v33 }
 0x851   :  { %v4475_v7 = vpop.eup %4474 }
 0x852   :  { %v4477_v45 = vpop.eup %4476  ;;  %v3175_v0 = vadd.f32 1.0, %v4475_v7  ;;  %4478 = vpow2.f32 %v4265_v36 }
 0x853   :  { %v3194_v16 = vadd.f32 1.0, %v4477_v45 }
 0x854   :  { %4480 = vrcp.f32 %v3175_v0  ;;  %v3187_v46 = vand.u32 2147483648, %v3175_v0  ;;  %v3185_v19 = vand.u32 2147483647, %v3175_v0  ;;  %vm3181_vm7 = vweird.f32 %v3175_v0 }
 0x855   :  { %4482 = vrcp.f32 %v3194_v16  ;;  %v3206_v38 = vand.u32 2147483648, %v3194_v16  ;;  %v3204_v33 = vand.u32 2147483647, %v3194_v16  ;;  %vm3200_vm8 = vweird.f32 %v3194_v16 }
 0x856   :  { %v3188_v45 = vor.u32 1.1754944e-38, %v3187_v46  ;;  %vm3186_vm11 = vcmp.eq.f32.partialorder %v3185_v19, 8.507059e+37 }
 0x857   :  { %v3207_v2 = vor.u32 1.1754944e-38, %v3206_v38  ;;  %vm3205_vm12 = vcmp.eq.f32.partialorder %v3204_v33, 8.507059e+37 }
 0x858   :  { %v4479_v15 = vpop.eup %4478 }
 0x859   :  { %v3214_v51 = vadd.f32 1.0, %v4479_v15 }
 0x85a   :  { %v4481_v34 = vpop.eup %4480 }
 0x85b   :  { %v4483_v41 = vpop.eup %4482  ;;  %v3177_v61 = vmul.f32 %v4481_v34, %v3175_v0  ;;  %4484 = vrcp.f32 %v3214_v51  ;;  %vm3182_vm5 = vweird.f32 %v4481_v34  ;;  %v3226_v46 = vand.u32 2147483648, %v3214_v51 }
 0x85c   :  { %v3196_v23 = vmul.f32 %v4483_v41, %v3194_v16  ;;  %4486 = vtanh.f32 %v3170_v11  ;;  %vm3201_vm6 = vweird.f32 %v4483_v41  ;;  %vm3183_vm9 = vmor %vm3181_vm7, %vm3182_vm5  ;;  %vm3220_vm14 = vweird.f32 %v3214_v51 }
 0x85d   :  { %v3178_v55 = vsub.f32 1.0, %v3177_v61  ;;  %vm3202_vm10 = vmor %vm3200_vm8, %vm3201_vm6  ;;  %v3227_v19 = vor.u32 1.1754944e-38, %v3226_v46 }
 0x85e   :  { %v3197_v6 = vsub.f32 1.0, %v3196_v23 }
 0x85f   :  { %v3179_v5 = vmul.f32 %v4481_v34, %v3178_v55 }
 0x860   :  { %v3198_v40 = vmul.f32 %v4483_v41, %v3197_v6 }
 0x861   :  { %v4485_v36 = vpop.eup %4484  ;;  %v3180_v7 = vadd.f32 %v4481_v34, %v3179_v5 }
 0x862   :  { %v3199_v60 = vadd.f32 %v4483_v41, %v3198_v40  ;;  %v3216_v15 = vmul.f32 %v4485_v36, %v3214_v51  ;;  %v4487_v11 = vpop.eup %4486  ;;  %vm3221_vm13 = vweird.f32 %v4485_v36 }
 0x863   :  { %v3184_v27 = vsel %vm3183_vm9, %v4481_v34, %v3180_v7  ;;  %v3224_v34 = vand.u32 2147483647, %v3214_v51  ;;  %vm3222_vm15 = vmor %vm3220_vm14, %vm3221_vm13  ;;  %v6835_v51 = vld [vmem:[#allocation11 + $0x1c0] sm:$0xff]  ;;  %v6839_v7 = vld [vmem:[#allocation11 + $0x1d8] sm:$0xff] }
 0x864   :  { %v3189_v61 = vsel %vm3186_vm11, %v3188_v45, %v3184_v27  ;;  %v3203_v23 = vsel %vm3202_vm10, %v4483_v41, %v3199_v60  ;;  %v3217_v55 = vsub.f32 1.0, %v3216_v15  ;;  %v6844_v45 = vld [vmem:[#allocation11 + $0x1a0] sm:$0xff]  ;;  %v6846_v60 = vld [vmem:[#allocation11 + $0x1a8] sm:$0xff]  ;;  %v7602_v27 = vld [vmem:[#allocation53_spill] sm:$0xff] }
 0x865   :  { %v3208_v6 = vsel %vm3205_vm12, %v3207_v2, %v3203_v23  ;;  %v3231_v30 = vmul.f32 %v4487_v11, %v3189_v61  ;;  %vm3225_vm0 = vcmp.eq.f32.partialorder %v3224_v34, 8.507059e+37  ;;  %v7600_v15 = vld [vmem:[#allocation51_spill] sm:$0xff]  ;;  %v7601_v2 = vld [vmem:[#allocation52_spill] sm:$0xff] }
 0x866   :  { %v3230_v52 = vmul.f32 %v3208_v6, %v6751_v9  ;;  %v3218_v5 = vmul.f32 %v4485_v36, %v3217_v55  ;;  %v6828_v9 = vld [vmem:[#allocation11 + $0x1e8] sm:$0xff] }
 0x867   :  { %3540 = vmatpush.msra.mxu1 %v6828_v9 }
 0x868   :  { %v6817_v0 = vadd.f32 %v3231_v30, %v3230_v52  ;;  %v3219_v16 = vadd.f32 %v4485_v36, %v3218_v5  ;;  %v6826_v52 = vld [vmem:[#allocation11 + $0x1e0] sm:$0xff]  ;;  %v6830_v30 = vld [vmem:[#allocation11 + $0x1f8] sm:$0xff] }
 0x869   :  { %3520 = vmatpush.msra.mxu0 %v6826_v52  ;;  %3580 = vmatpush.msra.mxu3 %v6830_v30 }
 0x86a   :  { %4488 = vtanh.f32 %v6817_v0  ;;  %v3223_v38 = vsel %vm3222_vm15, %v4485_v36, %v3219_v16  ;;  %v6837_v36 = vld [vmem:[#allocation11 + $0x1c8] sm:$0xff] }
 0x86b   :  { %v3228_v40 = vsel %vm3225_vm0, %v3227_v19, %v3223_v38  ;;  %3521 = vmatpush.msra.mxu0 %v6835_v51  ;;  %3541 = vmatpush.msra.mxu1 %v6837_v36 }
 0x86c   :  { %3581 = vmatpush.msra.mxu3 %v6839_v7 }
 0x86d   :  { %3522 = vmatpush.msra.mxu0 %v6844_v45  ;;  %3542 = vmatpush.msra.mxu1 %v6846_v60 }
 0x86e   :  { %3582 = vmatpush.msra.mxu3 %v6520_v39  ;;  %v7603_v39 = vld [vmem:[#allocation54_spill] sm:$0xff] }
 0x86f   :  { %3523 = vmatpush.msra.mxu0 %v6524_v28  ;;  %3543 = vmatpush.msra.mxu1 %v6526_v17  ;;  %v7604_v28 = vld [vmem:[#allocation24_spill] sm:$0xff]  ;;  %v7605_v17 = vld [vmem:[#allocation61_spill] sm:$0xff] }
 0x870   :  { %v4489_v41 = vpop.eup %4488  ;;  %3583 = vmatpush.msra.mxu3 %v6532_v50  ;;  %v2206_v50 = vadd.f32 %v7605_v17, %v7592_v18 }
 0x871   :  { %v6820_v33 = vmul.f32 %v4489_v41, %v3228_v40  ;;  %3524 = vmatpush.msra.mxu0 %v6536_v14  ;;  %3544 = vmatpush.msra.mxu1 %v6538_v54  ;;  %v7606_v14 = vld [vmem:[#allocation46_spill] sm:$0xff] }
 0x872   :  { %3584 = vmatpush.msra.mxu3 %v7600_v15  ;;  %v2247_v54 = vadd.f32 %v7606_v14, %v7594_v42 }
 0x873   :  { %7599 = vst [vmem:[#allocation28_spill] sm:$0xff] %v6820_v33  ;;  %3320 = vmatmul.f32.vlgmr.msrb.gmra.mxu0 %v6820_v33  ;;  %3340 = vmatmul.f32.vlgmr.msrb.gmra.mxu1 %v6820_v33 }
 0x874   :  { %3360 = vmatmul.f32.vlgmr.msrb.gmra.mxu2 %v6820_v33  ;;  %3380 = vmatmul.f32.vlgmr.msrb.gmra.mxu3 %v6820_v33  ;;  %v7056_v33 = vld [vmem:[#allocation11 + $0x50] sm:$0xff] }
 0x875   :  { %3525 = vmatpush.msra.mxu0 %v6548_v22  ;;  %3545 = vmatpush.msra.mxu1 %v7601_v2 }
 0x876   :  { %3585 = vmatpush.msra.mxu3 %v6556_v47 }
 0x877   :  { %3526 = vmatpush.msra.mxu0 %v7602_v27  ;;  %3546 = vmatpush.msra.mxu1 %v7603_v39 }
 0x878   :  { %3586 = vmatpush.msra.mxu3 %v7604_v28 }
 0x879   :  { %3527 = vmatpush.msra.mxu0 %v6572_v10  ;;  %3547 = vmatpush.msra.mxu1 %v6574_v63 }
 0x87a   :  { %3587 = vmatpush.msra.mxu3 %v6580_v1 }
 0x87b   :  { %3528 = vmatpush.msra.mxu0 %v6584_v56  ;;  %3548 = vmatpush.msra.mxu1 %v6586_v24  ;;  %v7607_v56 = vld [vmem:[#allocation48_spill] sm:$0xff] }
 0x87c   :  { %3588 = vmatpush.msra.mxu3 %v6596_v25  ;;  %v2329_v24 = vadd.f32 %v7607_v56, %v7596_v13 }
 0x87d   :  { %3529 = vmatpush.msra.mxu0 %v6600_v53  ;;  %3549 = vmatpush.msra.mxu1 %v6602_v29 }
 0x87e   :  { %3589 = vmatpush.msra.mxu3 %v6608_v4 }
 0x87f   :  { %3530 = vmatpush.msra.mxu0 %v6612_v59  ;;  %3550 = vmatpush.msra.mxu1 %v6614_v3 }
 0x880   :  { %3590 = vmatpush.msra.mxu3 %v6620_v57 }
 0x881   :  { %3531 = vmatpush.msra.mxu0 %v6624_v48  ;;  %3551 = vmatpush.msra.mxu1 %v6626_v49  ;;  %v7608_v48 = vld [vmem:[#allocation49_spill] sm:$0xff]  ;;  %v7609_v49 = vld [vmem:[#allocation36_spill] sm:$0xff] }
 0x882   :  { %3591 = vmatpush.msra.mxu3 %v7583_v12 }
 0x883   :  { %3532 = vmatpush.msra.mxu0 %v7584_v35  ;;  %3552 = vmatpush.msra.mxu1 %v7585_v8 }
 0x884   :  { %3592 = vmatpush.msra.mxu3 %v7587_v44 }
 0x885   :  { %3533 = vmatpush.msra.mxu0 %v7588_v62  ;;  %3553 = vmatpush.msra.mxu1 %v7589_v58 }
 0x886   :  { %3593 = vmatpush.msra.mxu3 %v6654_v37 }
 0x887   :  { %3534 = vmatpush.msra.mxu0 %v6658_v32  ;;  %3554 = vmatpush.msra.mxu1 %v6660_v21 }
 0x888   :  { %3594 = vmatpush.msra.mxu3 %v6666_v20  ;;  %v2288_v20 = vadd.f32 %v7609_v49, %v7608_v48  ;;  %v6948_v49 = vld [vmem:[#allocation11 + $0x178] sm:$0xff] }
 0x889   :  { %3535 = vmatpush.msra.mxu0 %v6670_v31  ;;  %3555 = vmatpush.msra.mxu1 %v6672_v43 }
 0x88a   :  { %3595 = vmatpush.msra.mxu3 %v6678_v26 }
 0x88b   :  { %3736 = vmatpush.msrb.mxu0 %v6826_v52  ;;  %3756 = vmatpush.msrb.mxu1 %v6828_v9 }
 0x88c   :  { %3796 = vmatpush.msrb.mxu3 %v6830_v30 }
 0x88d   :  { %3737 = vmatpush.msrb.mxu0 %v6835_v51  ;;  %3757 = vmatpush.msrb.mxu1 %v6837_v36 }
 0x88e   :  { %3797 = vmatpush.msrb.mxu3 %v6839_v7 }
 0x88f   :  { %3738 = vmatpush.msrb.mxu0 %v6844_v45  ;;  %3758 = vmatpush.msrb.mxu1 %v6846_v60 }
 0x8f0   :  { %v3321_v22 = vpop.f32.mrf.mxu0  ;;  %v3341_v47 = vpop.f32.mrf.mxu1 }
 0x8f1   :  { %v3384_v11 = vadd.f32 %v3321_v22, %v2206_v50  ;;  %v3385_v10 = vadd.f32 %v3341_v47, %v2247_v54 }
 0x8f3   :  { %v4266_v63 = vmul.f32 -1.442695, %v3384_v11  ;;  %v4267_v1 = vmul.f32 -1.442695, %v3385_v10 }
 0x8f5   :  { %4490 = vpow2.f32 %v4266_v63 }
 0x8f6   :  { %4492 = vpow2.f32 %v4267_v1 }
 0x8f7   :  { %v3381_v25 = vpop.f32.mrf.mxu3  ;;  %v3361_v32 = vpop.f32.mrf.mxu2 }
 0x8f8   :  { %v3387_v53 = vadd.f32 %v3381_v25, %v2329_v24  ;;  %v3386_v31 = vadd.f32 %v3361_v32, %v2288_v20  ;;  %v6919_v24 = vld [vmem:[#allocation11 + $0x1d0] sm:$0xff]  ;;  %v6942_v32 = vld [vmem:[#allocation11 + $0x168] sm:$0xff]  ;;  %v6952_v20 = vld [vmem:[#allocation11 + $0x140] sm:$0xff] }
 0x8f9   :  { %v6922_v25 = vld [vmem:[#allocation11 + $0x1b0] sm:$0xff] }
 0x8fa   :  { %v4268_v29 = vmul.f32 -1.442695, %v3387_v53  ;;  %v6924_v53 = vld [vmem:[#allocation11 + $0x1b8] sm:$0xff] }
 0x8fb   :  { %v4491_v4 = vpop.eup %4490  ;;  %3798 = vmatpush.msrb.mxu3 %v6924_v53 }
 0x8fc   :  { %v4493_v59 = vpop.eup %4492  ;;  %v3391_v3 = vadd.f32 1.0, %v4491_v4  ;;  %4494 = vpow2.f32 %v4268_v29  ;;  %v6928_v29 = vld [vmem:[#allocation11 + $0x180] sm:$0xff]  ;;  %v6930_v4 = vld [vmem:[#allocation11 + $0x188] sm:$0xff] }
 0x8fd   :  { %v3410_v57 = vadd.f32 1.0, %v4493_v59  ;;  %v6932_v59 = vld [vmem:[#allocation11 + $0x190] sm:$0xff]  ;;  %3739 = vmatpush.msrb.mxu0 %v6928_v29  ;;  %3759 = vmatpush.msrb.mxu1 %v6930_v4 }
 0x8fe   :  { %4496 = vrcp.f32 %v3391_v3  ;;  %v3403_v62 = vand.u32 2147483648, %v3391_v3  ;;  %v3401_v23 = vand.u32 2147483647, %v3391_v3  ;;  %vm3397_vm3 = vweird.f32 %v3391_v3 }
 0x8ff   :  { %4498 = vrcp.f32 %v3410_v57  ;;  %v3422_v58 = vand.u32 2147483648, %v3410_v57  ;;  %v3420_v6 = vand.u32 2147483647, %v3410_v57  ;;  %vm3416_vm4 = vweird.f32 %v3410_v57  ;;  %3760 = vmatpush.msrb.mxu1 %v6942_v32 }
 0x900   :  { %v3404_v46 = vor.u32 1.1754944e-38, %v3403_v62  ;;  %vm3402_vm7 = vcmp.eq.f32.partialorder %v3401_v23, 8.507059e+37  ;;  %v6978_v62 = vld [vmem:[#allocation11 + $0x108] sm:$0xff]  ;;  %v6988_v23 = vld [vmem:[#allocation11 + $0xe0] sm:$0xff] }
 0x901   :  { %v3423_v19 = vor.u32 1.1754944e-38, %v3422_v58  ;;  %vm3421_vm8 = vcmp.eq.f32.partialorder %v3420_v6, 8.507059e+37  ;;  %v6980_v58 = vld [vmem:[#allocation11 + $0x110] sm:$0xff] }
 0x902   :  { %v4495_v21 = vpop.eup %4494  ;;  %v6992_v6 = vld [vmem:[#allocation11 + $0xf0] sm:$0xff] }
 0x903   :  { %v3430_v26 = vadd.f32 1.0, %v4495_v21  ;;  %v6944_v21 = vld [vmem:[#allocation11 + $0x170] sm:$0xff] }
 0x904   :  { %v4497_v37 = vpop.eup %4496 }
 0x905   :  { %v4499_v43 = vpop.eup %4498  ;;  %v3393_v12 = vmul.f32 %v4497_v37, %v3391_v3  ;;  %4500 = vrcp.f32 %v3430_v26  ;;  %vm3398_vm1 = vweird.f32 %v4497_v37  ;;  %v3442_v22 = vand.u32 2147483648, %v3430_v26  ;;  %v6936_v3 = vld [vmem:[#allocation11 + $0x198] sm:$0xff] }
 0x906   :  { %v3412_v35 = vmul.f32 %v4499_v43, %v3410_v57  ;;  %4502 = vtanh.f32 %v3386_v31  ;;  %vm3417_vm2 = vweird.f32 %v4499_v43  ;;  %vm3399_vm5 = vmor %vm3397_vm3, %vm3398_vm1  ;;  %vm3436_vm10 = vweird.f32 %v3430_v26  ;;  %3799 = vmatpush.msrb.mxu3 %v6936_v3  ;;  %v6940_v57 = vld [vmem:[#allocation11 + $0x160] sm:$0xff]  ;;  %v6960_v31 = vld [vmem:[#allocation11 + $0x158] sm:$0xff] }
 0x907   :  { %v3394_v8 = vsub.f32 1.0, %v3393_v12  ;;  %vm3418_vm6 = vmor %vm3416_vm4, %vm3417_vm2  ;;  %v3440_v47 = vand.u32 2147483647, %v3430_v26  ;;  %v3443_v10 = vor.u32 1.1754944e-38, %v3442_v22  ;;  %3740 = vmatpush.msrb.mxu0 %v6940_v57  ;;  %v6966_v12 = vld [vmem:[#allocation11 + $0x128] sm:$0xff] }
 0x908   :  { %v3413_v44 = vsub.f32 1.0, %v3412_v35  ;;  %3800 = vmatpush.msrb.mxu3 %v6948_v49  ;;  %v6968_v35 = vld [vmem:[#allocation11 + $0x130] sm:$0xff] }
 0x909   :  { %v3395_v61 = vmul.f32 %v4497_v37, %v3394_v8  ;;  %vm3441_vm12 = vcmp.eq.f32.partialorder %v3440_v47, 8.507059e+37  ;;  %3741 = vmatpush.msrb.mxu0 %v6952_v20  ;;  %v6972_v8 = vld [vmem:[#allocation11 + $0x138] sm:$0xff] }
 0x90a   :  { %v3414_v55 = vmul.f32 %v4499_v43, %v3413_v44  ;;  %3801 = vmatpush.msrb.mxu3 %v6960_v31  ;;  %v6976_v44 = vld [vmem:[#allocation11 + $0x100] sm:$0xff] }
 0x90b   :  { %v4501_v5 = vpop.eup %4500  ;;  %v3396_v16 = vadd.f32 %v4497_v37, %v3395_v61  ;;  %v6984_v61 = vld [vmem:[#allocation11 + $0x118] sm:$0xff] }
 0x90c   :  { %v3415_v34 = vadd.f32 %v4499_v43, %v3414_v55  ;;  %v3432_v38 = vmul.f32 %v4501_v5, %v3430_v26  ;;  %v4503_v40 = vpop.eup %4502  ;;  %vm3437_vm9 = vweird.f32 %v4501_v5  ;;  %v6954_v26 = vld [vmem:[#allocation11 + $0x148] sm:$0xff]  ;;  %3802 = vmatpush.msrb.mxu3 %v6972_v8 }
 0x90d   :  { %v3400_v41 = vsel %vm3399_vm5, %v4497_v37, %v3396_v16  ;;  %vm3438_vm11 = vmor %vm3436_vm10, %vm3437_vm9  ;;  %v6956_v37 = vld [vmem:[#allocation11 + $0x150] sm:$0xff]  ;;  %3761 = vmatpush.msrb.mxu1 %v6954_v26  ;;  %v6990_v55 = vld [vmem:[#allocation11 + $0xe8] sm:$0xff] }
 0x90e   :  { %v3405_v15 = vsel %vm3402_vm7, %v3404_v46, %v3400_v41  ;;  %v3419_v2 = vsel %vm3418_vm6, %v4499_v43, %v3415_v34  ;;  %v3433_v27 = vsub.f32 1.0, %v3432_v38  ;;  %v6964_v43 = vld [vmem:[#allocation11 + $0x120] sm:$0xff]  ;;  %3803 = vmatpush.msrb.mxu3 %v6984_v61  ;;  %v7612_v46 = vld [vmem:[#allocation21_spill] sm:$0xff]  ;;  %v7000_v38 = vld [vmem:[#allocation11 + $0xf8] sm:$0xff] }
 0x90f   :  { %v3424_v39 = vsel %vm3421_vm8, %v3423_v19, %v3419_v2  ;;  %v3447_v28 = vmul.f32 %v4503_v40, %v3405_v15  ;;  %3742 = vmatpush.msrb.mxu0 %v6964_v43  ;;  %3762 = vmatpush.msrb.mxu1 %v6966_v12  ;;  %v2250_v34 = vadd.f32 %v7612_v46, %v7594_v42  ;;  %v7004_v40 = vld [vmem:[#allocation11 + $0xc0] sm:$0xff]  ;;  %v7006_v15 = vld [vmem:[#allocation11 + $0xc8] sm:$0xff]  ;;  %v7008_v2 = vld [vmem:[#allocation11 + $0xd0] sm:$0xff] }
 0x910   :  { %v3446_v17 = vmul.f32 %v3424_v39, %v6817_v0  ;;  %v3434_v50 = vmul.f32 %v4501_v5, %v3433_v27  ;;  %v6916_v0 = vld [vmem:[#allocation11 + $0x1f0] sm:$0xff]  ;;  %3804 = vmatpush.msrb.mxu3 %v7000_v38  ;;  %v7040_v46 = vld [vmem:[#allocation11 + $0x68] sm:$0xff] }
 0x911   :  { %3776 = vmatpush.msrb.mxu2 %v6916_v0  ;;  %3743 = vmatpush.msrb.mxu0 %v6976_v44  ;;  %7615 = vst [vmem:[#allocation29_spill] sm:$0xff] %v7040_v46  ;;  %v7064_v42 = vld [vmem:[#allocation11 + $0x28] sm:$0xff] }
 0x912   :  { %v6907_v14 = vadd.f32 %v3447_v28, %v3446_v17  ;;  %v3435_v54 = vadd.f32 %v4501_v5, %v3434_v50  ;;  %3763 = vmatpush.msrb.mxu1 %v6978_v62  ;;  %v7012_v28 = vld [vmem:[#allocation11 + $0xd8] sm:$0xff]  ;;  %v7016_v17 = vld [vmem:[#allocation11 + $0xa0] sm:$0xff]  ;;  %v7018_v50 = vld [vmem:[#allocation11 + $0xa8] sm:$0xff] }
 0x913   :  { %3777 = vmatpush.msrb.mxu2 %v6919_v24  ;;  %3744 = vmatpush.msrb.mxu0 %v6988_v23 }
 0x914   :  { %4504 = vtanh.f32 %v6907_v14  ;;  %v3439_v11 = vsel %vm3438_vm11, %v4501_v5, %v3435_v54  ;;  %v7611_v5 = vld [vmem:[#allocation35_spill] sm:$0xff]  ;;  %3764 = vmatpush.msrb.mxu1 %v6990_v55  ;;  %3805 = vmatpush.msrb.mxu3 %v7012_v28  ;;  %v7020_v54 = vld [vmem:[#allocation11 + $0xb0] sm:$0xff] }
 0x915   :  { %v3444_v1 = vsel %vm3441_vm12, %v3443_v10, %v3439_v11  ;;  %3778 = vmatpush.msrb.mxu2 %v6922_v25  ;;  %v2209_v16 = vadd.f32 %v7611_v5, %v7592_v18  ;;  %3745 = vmatpush.msrb.mxu0 %v7004_v40  ;;  %v7024_v11 = vld [vmem:[#allocation11 + $0xb8] sm:$0xff]  ;;  %v7028_v10 = vld [vmem:[#allocation11 + $0x80] sm:$0xff]  ;;  %v7068_v18 = vld [vmem:[#allocation11 + $0x30] sm:$0xff] }
 0x916   :  { %3765 = vmatpush.msrb.mxu1 %v7006_v15  ;;  %3806 = vmatpush.msrb.mxu3 %v7024_v11  ;;  %v7036_v5 = vld [vmem:[#allocation11 + $0x98] sm:$0xff] }
 0x917   :  { %3779 = vmatpush.msrb.mxu2 %v6932_v59  ;;  %3746 = vmatpush.msrb.mxu0 %v7016_v17  ;;  %7613 = vst [vmem:[#allocation60_spill] sm:$0xff] %v7036_v5 }
 0x918   :  { %3766 = vmatpush.msrb.mxu1 %v7018_v50  ;;  %3807 = vmatpush.msrb.mxu3 %v7036_v5 }
 0x919   :  { %3780 = vmatpush.msrb.mxu2 %v6944_v21  ;;  %3747 = vmatpush.msrb.mxu0 %v7028_v10 }
 0x91a   :  { %v4505_v63 = vpop.eup %4504 }
 0x91b   :  { %v6910_v56 = vmul.f32 %v4505_v63, %v3444_v1  ;;  %3781 = vmatpush.msrb.mxu2 %v6956_v37  ;;  %v7030_v63 = vld [vmem:[#allocation11 + $0x88] sm:$0xff]  ;;  %v7032_v1 = vld [vmem:[#allocation11 + $0x90] sm:$0xff] }
 0x91c   :  { %3767 = vmatpush.msrb.mxu1 %v7030_v63 }
 0x91d   :  { %7610 = vst [vmem:[#allocation27_spill] sm:$0xff] %v6910_v56  ;;  %3536 = vmatmul.f32.vlgmr.msra.gmra.mxu0 %v6910_v56  ;;  %3556 = vmatmul.f32.vlgmr.msra.gmra.mxu1 %v6910_v56 }
 0x91e   :  { %3576 = vmatmul.f32.vlgmr.msra.gmra.mxu2 %v6910_v56  ;;  %3596 = vmatmul.f32.vlgmr.msra.gmra.mxu3 %v6910_v56  ;;  %v7054_v56 = vld [vmem:[#allocation11 + $0x48] sm:$0xff] }
 0x91f   :  { %3782 = vmatpush.msrb.mxu2 %v6968_v35  ;;  %3768 = vmatpush.msrb.mxu1 %v7040_v46  ;;  %7620 = vst [vmem:[#allocation26_spill] sm:$0xff] %v7054_v56  ;;  %v7070_v46 = vld [vmem:[#allocation11 + $0x38] sm:$0xff] }
 0x921   :  { %3783 = vmatpush.msrb.mxu2 %v6980_v58  ;;  %3769 = vmatpush.msrb.mxu1 %v7054_v56  ;;  %v7082_v56 = vld [vmem:[#allocation11 + $0x18] sm:$0xff] }
 0x923   :  { %3784 = vmatpush.msrb.mxu2 %v6992_v6  ;;  %3770 = vmatpush.msrb.mxu1 %v7064_v42 }
 0x925   :  { %3785 = vmatpush.msrb.mxu2 %v7008_v2 }
 0x927   :  { %3786 = vmatpush.msrb.mxu2 %v7020_v54 }
 0x929   :  { %3787 = vmatpush.msrb.mxu2 %v7032_v1 }
 0x99a   :  { %v3537_v19 = vpop.f32.mrf.mxu0  ;;  %v3557_v41 = vpop.f32.mrf.mxu1 }
 0x99b   :  { %v3600_v27 = vadd.f32 %v3537_v19, %v2209_v16  ;;  %v3601_v39 = vadd.f32 %v3557_v41, %v2250_v34  ;;  %v7038_v16 = vld [vmem:[#allocation11 + $0x60] sm:$0xff]  ;;  %v7046_v41 = vld [vmem:[#allocation11 + $0x70] sm:$0xff] }
 0x99c   :  { %7614 = vst [vmem:[#allocation23_spill] sm:$0xff] %v7038_v16  ;;  %v7616_v34 = vld [vmem:[#allocation31_spill] sm:$0xff]  ;;  %3748 = vmatpush.msrb.mxu0 %v7038_v16  ;;  %3788 = vmatpush.msrb.mxu2 %v7046_v41 }
 0x99d   :  { %v4269_v22 = vmul.f32 -1.442695, %v3600_v27  ;;  %v4270_v47 = vmul.f32 -1.442695, %v3601_v39  ;;  %v2332_v19 = vadd.f32 %v7616_v34, %v7596_v13  ;;  %7617 = vst [vmem:[#allocation41_spill] sm:$0xff] %v7046_v41  ;;  %v7048_v27 = vld [vmem:[#allocation11 + $0x78] sm:$0xff] }
 0x99e   :  { %7618 = vst [vmem:[#allocation32_spill] sm:$0xff] %v7048_v27  ;;  %v7050_v39 = vld [vmem:[#allocation11 + $0x40] sm:$0xff]  ;;  %3808 = vmatpush.msrb.mxu3 %v7048_v27  ;;  %3789 = vmatpush.msrb.mxu2 %v7056_v33 }
 0x99f   :  { %4506 = vpow2.f32 %v4269_v22  ;;  %7619 = vst [vmem:[#allocation19_spill] sm:$0xff] %v7050_v39  ;;  %v7062_v13 = vld [vmem:[#allocation11 + $0x20] sm:$0xff]  ;;  %3749 = vmatpush.msrb.mxu0 %v7050_v39  ;;  %v7080_v39 = vld [vmem:[#allocation11 + $0x10] sm:$0xff] }
 0x9a0   :  { %4508 = vpow2.f32 %v4270_v47  ;;  %v7058_v47 = vld [vmem:[#allocation11 + $0x58] sm:$0xff]  ;;  %7621 = vst [vmem:[#allocation25_spill] sm:$0xff] %v7080_v39  ;;  %3790 = vmatpush.msrb.mxu2 %v7068_v18 }
 0x9a1   :  { %v3597_v22 = vpop.f32.mrf.mxu3  ;;  %3809 = vmatpush.msrb.mxu3 %v7058_v47  ;;  %3750 = vmatpush.msrb.mxu0 %v7062_v13 }
 0x9a2   :  { %v3603_v34 = vadd.f32 %v3597_v22, %v2332_v19  ;;  %v7074_v19 = vld [vmem:[#allocation11] sm:$0xff]  ;;  %v7076_v22 = vld [vmem:[#allocation11 + $0x8] sm:$0xff]  ;;  %3791 = vmatpush.msrb.mxu2 %v7080_v39 }
 0x9a3   :  { %3810 = vmatpush.msrb.mxu3 %v7070_v46  ;;  %3751 = vmatpush.msrb.mxu0 %v7074_v19 }
 0x9a4   :  { %v4271_v16 = vmul.f32 -1.442695, %v3603_v34  ;;  %3771 = vmatpush.msrb.mxu1 %v7076_v22  ;;  %3992 = vmatpush.msra.mxu2 %v6916_v0 }
 0x9a5   :  { %v4507_v27 = vpop.eup %4506  ;;  %3811 = vmatpush.msrb.mxu3 %v7082_v56  ;;  %3952 = vmatpush.msra.mxu0 %v6826_v52 }
 0x9a6   :  { %v4509_v41 = vpop.eup %4508  ;;  %v7084_v5 = vadd.f32 1.0, %v4507_v27  ;;  %4510 = vpow2.f32 %v4271_v16  ;;  %3972 = vmatpush.msra.mxu1 %v6828_v9  ;;  %v3577_v16 = vpop.f32.mrf.mxu2  ;;  %v7622_v27 = vld [vmem:[#allocation30_spill] sm:$0xff]  ;;  %3993 = vmatpush.msra.mxu2 %v6919_v24 }
 0x9a7   :  { %v7088_v34 = vadd.f32 1.0, %v4509_v41  ;;  %4012 = vmatpush.msra.mxu3 %v6830_v30  ;;  %3953 = vmatpush.msra.mxu0 %v6835_v51  ;;  %v2291_v39 = vadd.f32 %v7622_v27, %v7608_v48  ;;  %v4117_v27 = vld [vmem:[#allocation13 + $0x48] sm:$0xff] }
 0x9a8   :  { %4512 = vrcp.f32 %v7084_v5  ;;  %3973 = vmatpush.msra.mxu1 %v6837_v36  ;;  %3994 = vmatpush.msra.mxu2 %v6922_v25  ;;  %v3619_v0 = vand.u32 2147483648, %v7084_v5  ;;  %vm3613_vm15 = vweird.f32 %v7084_v5 }
 0x9a9   :  { %4514 = vrcp.f32 %v7088_v34  ;;  %4013 = vmatpush.msra.mxu3 %v6839_v7  ;;  %3954 = vmatpush.msra.mxu0 %v6844_v45  ;;  %v3602_v30 = vadd.f32 %v3577_v16, %v2291_v39  ;;  %v3638_v24 = vand.u32 2147483648, %v7088_v34  ;;  %vm3632_vm0 = vweird.f32 %v7088_v34  ;;  %v7633_v39 = vld [vmem:[#allocation58_spill] sm:$0xff]  ;;  %v4118_v16 = vld [vmem:[#allocation13 + $0x50] sm:$0xff] }
 0x9aa   :  { %3974 = vmatpush.msra.mxu1 %v6846_v60  ;;  %3995 = vmatpush.msra.mxu2 %v6932_v59 }
 0x9ab   :  { %4014 = vmatpush.msra.mxu3 %v6924_v53  ;;  %3955 = vmatpush.msra.mxu0 %v6928_v29  ;;  %v3617_v53 = vand.u32 2147483647, %v7084_v5 }
 0x9ac   :  { %v4511_v41 = vpop.eup %4510  ;;  %3975 = vmatpush.msra.mxu1 %v6930_v4  ;;  %3996 = vmatpush.msra.mxu2 %v6944_v21  ;;  %v3636_v4 = vand.u32 2147483647, %v7088_v34 }
 0x9ad   :  { %v7106_v52 = vadd.f32 1.0, %v4511_v41  ;;  %4015 = vmatpush.msra.mxu3 %v6936_v3  ;;  %3956 = vmatpush.msra.mxu0 %v6940_v57  ;;  %v3620_v57 = vor.u32 1.1754944e-38, %v3619_v0  ;;  %vm3618_vm3 = vcmp.eq.f32.partialorder %v3617_v53, 8.507059e+37 }
 0x9ae   :  { %v4513_v9 = vpop.eup %4512  ;;  %3976 = vmatpush.msra.mxu1 %v6942_v32  ;;  %3997 = vmatpush.msra.mxu2 %v6956_v37  ;;  %vm3637_vm4 = vcmp.eq.f32.partialorder %v3636_v4, 8.507059e+37 }
 0x9af   :  { %v4515_v51 = vpop.eup %4514  ;;  %v3609_v36 = vmul.f32 %v4513_v9, %v7084_v5  ;;  %4516 = vrcp.f32 %v7106_v52  ;;  %4016 = vmatpush.msra.mxu3 %v6948_v49  ;;  %vm3614_vm13 = vweird.f32 %v4513_v9  ;;  %3957 = vmatpush.msra.mxu0 %v6952_v20  ;;  %v3639_v49 = vor.u32 1.1754944e-38, %v3638_v24  ;;  %v7632_v5 = vld [vmem:[#allocation40_spill] sm:$0xff] }
 0x9b0   :  { %v3628_v7 = vmul.f32 %v4515_v51, %v7088_v34  ;;  %4518 = vtanh.f32 %v3602_v30  ;;  %3977 = vmatpush.msra.mxu1 %v6954_v26  ;;  %vm3633_vm14 = vweird.f32 %v4515_v51  ;;  %vm3615_vm1 = vmor %vm3613_vm15, %vm3614_vm13  ;;  %3998 = vmatpush.msra.mxu2 %v6968_v35  ;;  %vm3652_vm6 = vweird.f32 %v7106_v52  ;;  %v4116_v30 = vld [vmem:[#allocation13 + $0x40] sm:$0xff] }
 0x9b1   :  { %v3610_v45 = vsub.f32 1.0, %v3609_v36  ;;  %4017 = vmatpush.msra.mxu3 %v6960_v31  ;;  %3958 = vmatpush.msra.mxu0 %v6964_v43  ;;  %vm3634_vm2 = vmor %vm3632_vm0, %vm3633_vm14  ;;  %v7635_v36 = vld [vmem:[#allocation39_spill] sm:$0xff] }
 0x9b2   :  { %v3629_v60 = vsub.f32 1.0, %v3628_v7  ;;  %3978 = vmatpush.msra.mxu1 %v6966_v12  ;;  %3999 = vmatpush.msra.mxu2 %v6980_v58  ;;  %v3658_v58 = vand.u32 2147483648, %v7106_v52  ;;  %v7636_v7 = vld [vmem:[#allocation42_spill] sm:$0xff] }
 0x9b3   :  { %v3611_v25 = vmul.f32 %v4513_v9, %v3610_v45  ;;  %4018 = vmatpush.msra.mxu3 %v6972_v8  ;;  %3959 = vmatpush.msra.mxu0 %v6976_v44  ;;  %v2335_v45 = vadd.f32 %v7636_v7, %v7635_v36  ;;  %v7639_v7 = vld [vmem:[#allocation43_spill] sm:$0xff] }
 0x9b4   :  { %v3630_v29 = vmul.f32 %v4515_v51, %v3629_v60  ;;  %3979 = vmatpush.msra.mxu1 %v6978_v62  ;;  %4000 = vmatpush.msra.mxu2 %v6992_v6  ;;  %v7624_v6 = vld [vmem:[#allocation23_spill] sm:$0xff]  ;;  %v4114_v60 = vld [vmem:[#allocation13 + $0x30] sm:$0xff] }
 0x9b5   :  { %v7131_v59 = vpop.eup %4516  ;;  %v3612_v3 = vadd.f32 %v4513_v9, %v3611_v25  ;;  %4019 = vmatpush.msra.mxu3 %v6984_v61  ;;  %3960 = vmatpush.msra.mxu0 %v6988_v23  ;;  %v3656_v61 = vand.u32 2147483647, %v7106_v52  ;;  %v7623_v23 = vld [vmem:[#allocation60_spill] sm:$0xff] }
 0x9b6   :  { %v3631_v32 = vadd.f32 %v4515_v51, %v3630_v29  ;;  %v3648_v21 = vmul.f32 %v7131_v59, %v7106_v52  ;;  %v4519_v26 = vpop.eup %4518  ;;  %3980 = vmatpush.msra.mxu1 %v6990_v55  ;;  %4001 = vmatpush.msra.mxu2 %v7008_v2  ;;  %vm3653_vm5 = vweird.f32 %v7131_v59  ;;  %v7627_v2 = vld [vmem:[#allocation32_spill] sm:$0xff]  ;;  %v4112_v29 = vld [vmem:[#allocation13 + $0x20] sm:$0xff] }
 0x9b7   :  { %v3616_v20 = vsel %vm3615_vm1, %v4513_v9, %v3612_v3  ;;  %4020 = vmatpush.msra.mxu3 %v7000_v38  ;;  %3961 = vmatpush.msra.mxu0 %v7004_v40  ;;  %vm3654_vm7 = vmor %vm3652_vm6, %vm3653_vm5  ;;  %v7625_v38 = vld [vmem:[#allocation29_spill] sm:$0xff]  ;;  %v3659_v40 = vor.u32 1.1754944e-38, %v3658_v58  ;;  %vm3657_vm8 = vcmp.eq.f32.partialorder %v3656_v61, 8.507059e+37  ;;  %v4113_v25 = vld [vmem:[#allocation13 + $0x28] sm:$0xff] }
 0x9b8   :  { %v3621_v37 = vsel %vm3618_vm3, %v3620_v57, %v3616_v20  ;;  %v3635_v31 = vsel %vm3634_vm2, %v4515_v51, %v3631_v32  ;;  %v3649_v43 = vsub.f32 1.0, %v3648_v21  ;;  %3981 = vmatpush.msra.mxu1 %v7006_v15  ;;  %4002 = vmatpush.msra.mxu2 %v7020_v54  ;;  %v7626_v15 = vld [vmem:[#allocation41_spill] sm:$0xff]  ;;  %v4115_v51 = vld [vmem:[#allocation13 + $0x38] sm:$0xff] }
 0x9b9   :  { %v3640_v12 = vsel %vm3637_vm4, %v3639_v49, %v3635_v31  ;;  %v3663_v35 = vmul.f32 %v4519_v26, %v3621_v37  ;;  %4021 = vmatpush.msra.mxu3 %v7012_v28  ;;  %3962 = vmatpush.msra.mxu0 %v7016_v17  ;;  %v7628_v28 = vld [vmem:[#allocation19_spill] sm:$0xff]  ;;  %v7629_v17 = vld [vmem:[#allocation26_spill] sm:$0xff]  ;;  %v4110_v21 = vld [vmem:[#allocation13 + $0x10] sm:$0xff] }
 0x9ba   :  { %v3662_v8 = vmul.f32 %v3640_v12, %v6907_v14  ;;  %v3650_v44 = vmul.f32 %v7131_v59, %v3649_v43  ;;  %3982 = vmatpush.msra.mxu1 %v7018_v50  ;;  %4003 = vmatpush.msra.mxu2 %v7032_v1  ;;  %v7631_v1 = vld [vmem:[#allocation56_spill] sm:$0xff]  ;;  %v4111_v32 = vld [vmem:[#allocation13 + $0x18] sm:$0xff]  ;;  %v4108_v43 = vld [vmem:[#allocation13] sm:$0xff] }
 0x9bb   :  { %4022 = vmatpush.msra.mxu3 %v7024_v11  ;;  %3963 = vmatpush.msra.mxu0 %v7028_v10  ;;  %v4120_v10 = vld [vmem:[#allocation13 + $0x60] sm:$0xff]  ;;  %v4109_v49 = vld [vmem:[#allocation13 + $0x8] sm:$0xff]  ;;  %v7637_v37 = vld [vmem:[#allocation22_spill] sm:$0xff] }
 0x9bc   :  { %v7155_v62 = vadd.f32 %v3663_v35, %v3662_v8  ;;  %v3651_v14 = vadd.f32 %v7131_v59, %v3650_v44  ;;  %3983 = vmatpush.msra.mxu1 %v7030_v63  ;;  %4004 = vmatpush.msra.mxu2 %v7626_v15  ;;  %v4119_v63 = vld [vmem:[#allocation13 + $0x58] sm:$0xff]  ;;  %v2294_v31 = vadd.f32 %v7637_v37, %v7608_v48 }
 0x9bd   :  { %4023 = vmatpush.msra.mxu3 %v7623_v23  ;;  %3964 = vmatpush.msra.mxu0 %v7624_v6 }
 0x9be   :  { %4520 = vtanh.f32 %v7155_v62  ;;  %v3655_v55 = vsel %vm3654_vm7, %v7131_v59, %v3651_v14  ;;  %3984 = vmatpush.msra.mxu1 %v7625_v38  ;;  %4005 = vmatpush.msra.mxu2 %v7056_v33  ;;  %v7630_v33 = vld [vmem:[#allocation25_spill] sm:$0xff] }
 0x9bf   :  { %4024 = vmatpush.msra.mxu3 %v7627_v2  ;;  %3965 = vmatpush.msra.mxu0 %v7628_v28  ;;  %v3660_v54 = vsel %vm3657_vm8, %v3659_v40, %v3655_v55 }
 0x9c0   :  { %3985 = vmatpush.msra.mxu1 %v7629_v17  ;;  %4006 = vmatpush.msra.mxu2 %v7068_v18  ;;  %v4122_v18 = vld [vmem:[#allocation13 + $0x70] sm:$0xff] }
 0x9c1   :  { %4025 = vmatpush.msra.mxu3 %v7058_v47  ;;  %3966 = vmatpush.msra.mxu0 %v7062_v13  ;;  %v4121_v13 = vld [vmem:[#allocation13 + $0x68] sm:$0xff]  ;;  %v7634_v47 = vld [vmem:[#allocation38_spill] sm:$0xff] }
 0x9c2   :  { %3986 = vmatpush.msra.mxu1 %v7064_v42  ;;  %4007 = vmatpush.msra.mxu2 %v7630_v33  ;;  %v4123_v42 = vld [vmem:[#allocation13 + $0x78] sm:$0xff] }
 0x9c3   :  { %4026 = vmatpush.msra.mxu3 %v7070_v46  ;;  %3967 = vmatpush.msra.mxu0 %v7074_v19  ;;  %v2212_v46 = vadd.f32 %v7632_v5, %v7631_v1  ;;  %v2253_v19 = vadd.f32 %v7634_v47, %v7633_v39 }
 0x9c4   :  { %v4521_v50 = vpop.eup %4520  ;;  %3987 = vmatpush.msra.mxu1 %v7076_v22 }
 0x9c5   :  { %v7182_v11 = vmul.f32 %v4521_v50, %v3660_v54  ;;  %4027 = vmatpush.msra.mxu3 %v7082_v56 }
 0x9c7   :  { %3752 = vmatmul.f32.vlgmr.msrb.gmra.mxu0 %v7182_v11  ;;  %3772 = vmatmul.f32.vlgmr.msrb.gmra.mxu1 %v7182_v11 }
 0x9c8   :  { %3792 = vmatmul.f32.vlgmr.msrb.gmra.mxu2 %v7182_v11  ;;  %3812 = vmatmul.f32.vlgmr.msrb.gmra.mxu3 %v7182_v11 }
 0x9c9   :  { %4128 = vmatpush.msrb.mxu0 %v4123_v42 }
 0x9cb   :  { %4129 = vmatpush.msrb.mxu0 %v4122_v18 }
 0x9cd   :  { %4130 = vmatpush.msrb.mxu0 %v4121_v13 }
 0x9cf   :  { %4131 = vmatpush.msrb.mxu0 %v4120_v10 }
 0x9d1   :  { %4132 = vmatpush.msrb.mxu0 %v4119_v63 }
 0x9d3   :  { %4133 = vmatpush.msrb.mxu0 %v4118_v16 }
 0x9d5   :  { %4134 = vmatpush.msrb.mxu0 %v4117_v27 }
 0x9d7   :  { %4135 = vmatpush.msrb.mxu0 %v4116_v30 }
 0x9d9   :  { %4136 = vmatpush.msrb.mxu0 %v4115_v51 }
 0x9db   :  { %4137 = vmatpush.msrb.mxu0 %v4114_v60  ;;  %v7641_v60 = vld [vmem:[#allocation28_spill] sm:$0xff] }
 0x9dd   :  { %4138 = vmatpush.msrb.mxu0 %v4113_v25 }
 0x9df   :  { %4139 = vmatpush.msrb.mxu0 %v4112_v29 }
 0x9e1   :  { %4140 = vmatpush.msrb.mxu0 %v4111_v32 }
 0x9e3   :  { %4141 = vmatpush.msrb.mxu0 %v4110_v21 }
 0x9e5   :  { %4142 = vmatpush.msrb.mxu0 %v4109_v49  ;;  %v7221_v49 = vld [vmem:[%s7250_s8] ss:$0 sm:$0xff]  ;;  %s4716_s8 = smov [#allocation14]  }
 0x9e6   :  { %s4181_s29 = sshll.u32 %s4716_s8, 4  ;;  %s4182_s29 = int_to_ptr.vmem [resolvable:$true] %s4181_s29 }
 0x9e7   :  { %4143 = vmatpush.msrb.mxu0 %v4108_v43 }
 0xa44   :  { %v3753_v22 = vpop.f32.mrf.mxu0  ;;  %v3773_v34 = vpop.f32.mrf.mxu1 }
 0xa45   :  { %v3816_v56 = vadd.f32 %v3753_v22, %v2212_v46  ;;  %v3817_v41 = vadd.f32 %v3773_v34, %v2253_v19 }
 0xa47   :  { %v4272_v52 = vmul.f32 -1.442695, %v3816_v56  ;;  %v4273_v9 = vmul.f32 -1.442695, %v3817_v41 }
 0xa49   :  { %4522 = vpow2.f32 %v4272_v52 }
 0xa4a   :  { %4524 = vpow2.f32 %v4273_v9 }
 0xa4b   :  { %v3813_v0 = vpop.f32.mrf.mxu3  ;;  %v3793_v20 = vpop.f32.mrf.mxu2 }
 0xa4c   :  { %v3819_v24 = vadd.f32 %v3813_v0, %v2335_v45  ;;  %v3818_v8 = vadd.f32 %v3793_v20, %v2294_v31  ;;  %v7640_v45 = vld [vmem:[#allocation20_spill] sm:$0xff]  ;;  %v7642_v0 = vld [vmem:[#allocation27_spill] sm:$0xff] }
 0xa4e   :  { %v4274_v53 = vmul.f32 -1.442695, %v3819_v24  ;;  %v7643_v24 = vld [vmem:[#allocation45_spill] sm:$0xff] }
 0xa4f   :  { %v4523_v4 = vpop.eup %4522  ;;  %v2215_v25 = vadd.f32 %v7643_v24, %v7631_v1 }
 0xa50   :  { %v4525_v59 = vpop.eup %4524  ;;  %v3823_v3 = vadd.f32 1.0, %v4523_v4  ;;  %4526 = vpow2.f32 %v4274_v53  ;;  %v7644_v53 = vld [vmem:[#allocation55_spill] sm:$0xff] }
 0xa51   :  { %v3842_v57 = vadd.f32 1.0, %v4525_v59  ;;  %v2256_v29 = vadd.f32 %v7644_v53, %v7633_v39 }
 0xa52   :  { %4528 = vrcp.f32 %v3823_v3  ;;  %v3835_v55 = vand.u32 2147483648, %v3823_v3  ;;  %v3833_v40 = vand.u32 2147483647, %v3823_v3  ;;  %vm3829_vm11 = vweird.f32 %v3823_v3 }
 0xa53   :  { %4530 = vrcp.f32 %v3842_v57  ;;  %v3854_v6 = vand.u32 2147483648, %v3842_v57  ;;  %v3852_v2 = vand.u32 2147483647, %v3842_v57  ;;  %vm3848_vm12 = vweird.f32 %v3842_v57 }
 0xa54   :  { %v3836_v50 = vor.u32 1.1754944e-38, %v3835_v55  ;;  %vm3834_vm15 = vcmp.eq.f32.partialorder %v3833_v40, 8.507059e+37 }
 0xa55   :  { %v3855_v42 = vor.u32 1.1754944e-38, %v3854_v6  ;;  %vm3853_vm0 = vcmp.eq.f32.partialorder %v3852_v2, 8.507059e+37 }
 0xa56   :  { %v4527_v26 = vpop.eup %4526 }
 0xa57   :  { %v3862_v12 = vadd.f32 1.0, %v4527_v26 }
 0xa58   :  { %v4529_v35 = vpop.eup %4528 }
 0xa59   :  { %v4531_v44 = vpop.eup %4530  ;;  %v3825_v14 = vmul.f32 %v4529_v35, %v3823_v3  ;;  %4532 = vrcp.f32 %v3862_v12  ;;  %vm3830_vm9 = vweird.f32 %v4529_v35  ;;  %v3874_v56 = vand.u32 2147483648, %v3862_v12 }
 0xa5a   :  { %v3844_v58 = vmul.f32 %v4531_v44, %v3842_v57  ;;  %4534 = vtanh.f32 %v3818_v8  ;;  %vm3849_vm10 = vweird.f32 %v4531_v44  ;;  %vm3831_vm13 = vmor %vm3829_vm11, %vm3830_vm9  ;;  %vm3868_vm2 = vweird.f32 %v3862_v12 }
 0xa5b   :  { %v3826_v61 = vsub.f32 1.0, %v3825_v14  ;;  %vm3850_vm14 = vmor %vm3848_vm12, %vm3849_vm10  ;;  %v3872_v41 = vand.u32 2147483647, %v3862_v12  ;;  %v3875_v52 = vor.u32 1.1754944e-38, %v3874_v56 }
 0xa5c   :  { %v3845_v23 = vsub.f32 1.0, %v3844_v58 }
 0xa5d   :  { %v3827_v38 = vmul.f32 %v4529_v35, %v3826_v61  ;;  %vm3873_vm4 = vcmp.eq.f32.partialorder %v3872_v41, 8.507059e+37  ;;  %v7646_v61 = vld [vmem:[#allocation33_spill] sm:$0xff] }
 0xa5e   :  { %v3846_v15 = vmul.f32 %v4531_v44, %v3845_v23  ;;  %v2297_v23 = vadd.f32 %v7646_v61, %v7608_v48 }
 0xa5f   :  { %v4533_v28 = vpop.eup %4532  ;;  %v3828_v17 = vadd.f32 %v4529_v35, %v3827_v38 }
 0xa60   :  { %v3847_v54 = vadd.f32 %v4531_v44, %v3846_v15  ;;  %v3864_v33 = vmul.f32 %v4533_v28, %v3862_v12  ;;  %v4535_v13 = vpop.eup %4534  ;;  %vm3869_vm1 = vweird.f32 %v4533_v28 }
 0xa61   :  { %v3832_v18 = vsel %vm3831_vm13, %v4529_v35, %v3828_v17  ;;  %vm3870_vm3 = vmor %vm3868_vm2, %vm3869_vm1 }
 0xa62   :  { %v3837_v10 = vsel %vm3834_vm15, %v3836_v50, %v3832_v18  ;;  %v3851_v63 = vsel %vm3850_vm14, %v4531_v44, %v3847_v54  ;;  %v3865_v5 = vsub.f32 1.0, %v3864_v33 }
 0xa63   :  { %v3856_v46 = vsel %vm3853_vm0, %v3855_v42, %v3851_v63  ;;  %v3879_v47 = vmul.f32 %v4535_v13, %v3837_v10 }
 0xa64   :  { %v3878_v19 = vmul.f32 %v3856_v46, %v7155_v62  ;;  %v3866_v22 = vmul.f32 %v4533_v28, %v3865_v5  ;;  %v7638_v62 = vld [vmem:[#allocation50_spill] sm:$0xff] }
 0xa66   :  { %v7205_v34 = vadd.f32 %v3879_v47, %v3878_v19  ;;  %v3867_v16 = vadd.f32 %v4533_v28, %v3866_v22 }
 0xa68   :  { %4536 = vtanh.f32 %v7205_v34  ;;  %v3871_v27 = vsel %vm3870_vm3, %v4533_v28, %v3867_v16 }
 0xa69   :  { %v3876_v30 = vsel %vm3873_vm4, %v3875_v52, %v3871_v27 }
 0xa6e   :  { %v4537_v9 = vpop.eup %4536 }
 0xa6f   :  { %v3882_v51 = vmul.f32 %v4537_v9, %v3876_v30 }
 0xa71   :  { %3968 = vmatmul.f32.vlgmr.msra.gmra.mxu0 %v3882_v51  ;;  %3988 = vmatmul.f32.vlgmr.msra.gmra.mxu1 %v3882_v51 }
 0xa72   :  { %4008 = vmatmul.f32.vlgmr.msra.gmra.mxu2 %v3882_v51  ;;  %4028 = vmatmul.f32.vlgmr.msra.gmra.mxu3 %v3882_v51 }
 0xa79   :  { %4144 = vmatmul.f32.vlgmr.msrb.gmra.mxu0 %v7638_v62 }
 0xa81   :  { %4147 = vmatmul.f32.gmra.mxu0 %v7639_v7 }
 0xa89   :  { %4150 = vmatmul.f32.gmra.mxu0 %v7640_v45 }
 0xa91   :  { %4153 = vmatmul.f32.gmra.mxu0 %v7641_v60 }
 0xa99   :  { %4156 = vmatmul.f32.gmra.mxu0 %v7642_v0 }
 0xaa1   :  { %4159 = vmatmul.f32.gmra.mxu0 %v7182_v11  ;;  %v7645_v11 = vld [vmem:[#allocation34_spill] sm:$0xff] }
 0xaa2   :  { %v2338_v20 = vadd.f32 %v7645_v11, %v7635_v36 }
 0xaa9   :  { %4162 = vmatmul.f32.gmra.mxu0 %v3882_v51 }
 0xaee   :  { %v3969_v4 = vpop.f32.mrf.mxu0  ;;  %v3989_v59 = vpop.f32.mrf.mxu1 }
 0xaef   :  { %v4032_v3 = vadd.f32 %v3969_v4, %v2215_v25  ;;  %v4033_v57 = vadd.f32 %v3989_v59, %v2256_v29 }
 0xaf1   :  { %v4275_v32 = vmul.f32 -1.442695, %v4032_v3  ;;  %v4276_v21 = vmul.f32 -1.442695, %v4033_v57 }
 0xaf3   :  { %4538 = vpow2.f32 %v4275_v32 }
 0xaf4   :  { %4540 = vpow2.f32 %v4276_v21 }
 0xaf5   :  { %v4029_v1 = vpop.f32.mrf.mxu3  ;;  %v4009_v14 = vpop.f32.mrf.mxu2 }
 0xaf6   :  { %v4035_v26 = vadd.f32 %v4029_v1, %v2338_v20  ;;  %v4145_v37 = vpop.f32.mrf.mxu0  ;;  %v4034_v38 = vadd.f32 %v4009_v14, %v2297_v23 }
 0xaf7   :  { %v4146_v39 = vadd.f32 %v7221_v49, %v4145_v37 }
 0xaf8   :  { %v4277_v31 = vmul.f32 -1.442695, %v4035_v26 }
 0xaf9   :  { %v4539_v43 = vpop.eup %4538  ;;  %4169 = vst [vmem:[#allocation14] sm:$0xff] %v4146_v39 }
 0xafa   :  { %v4541_v12 = vpop.eup %4540  ;;  %v4039_v35 = vadd.f32 1.0, %v4539_v43  ;;  %4542 = vpow2.f32 %v4277_v31 }
 0xafb   :  { %v4058_v8 = vadd.f32 1.0, %v4541_v12 }
 0xafc   :  { %4544 = vrcp.f32 %v4039_v35  ;;  %v4049_v50 = vand.u32 2147483647, %v4039_v35  ;;  %v4051_v54 = vand.u32 2147483648, %v4039_v35  ;;  %vm4045_vm7 = vweird.f32 %v4039_v35 }
 0xafd   :  { %4546 = vrcp.f32 %v4058_v8  ;;  %v4070_v42 = vand.u32 2147483648, %v4058_v8  ;;  %v4068_v10 = vand.u32 2147483647, %v4058_v8  ;;  %vm4064_vm8 = vweird.f32 %v4058_v8 }
 0xafe   :  { %v4148_v44 = vpop.f32.mrf.mxu0  ;;  %v4052_v46 = vor.u32 1.1754944e-38, %v4051_v54  ;;  %vm4050_vm11 = vcmp.eq.f32.partialorder %v4049_v50, 8.507059e+37 }
 0xaff   :  { %v4149_v58 = vadd.f32 %v7221_v49, %v4148_v44  ;;  %v4071_v22 = vor.u32 1.1754944e-38, %v4070_v42  ;;  %vm4069_vm12 = vcmp.eq.f32.partialorder %v4068_v10, 8.507059e+37 }
 0xb00   :  { %v4543_v36 = vpop.eup %4542 }
 0xb01   :  { %v4078_v55 = vadd.f32 1.0, %v4543_v36  ;;  %4170 = vst [vmem:[#allocation14 + $0x8] sm:$0xff] %v4149_v58 }
 0xb02   :  { %v4545_v6 = vpop.eup %4544 }
 0xb03   :  { %v4547_v40 = vpop.eup %4546  ;;  %v4041_v15 = vmul.f32 %v4545_v6, %v4039_v35  ;;  %4548 = vrcp.f32 %v4078_v55  ;;  %vm4046_vm5 = vweird.f32 %v4545_v6  ;;  %v4090_v24 = vand.u32 2147483648, %v4078_v55 }
 0xb04   :  { %v4060_v2 = vmul.f32 %v4547_v40, %v4058_v8  ;;  %4550 = vtanh.f32 %v4034_v38  ;;  %vm4065_vm6 = vweird.f32 %v4547_v40  ;;  %vm4047_vm9 = vmor %vm4045_vm7, %vm4046_vm5  ;;  %vm4084_vm14 = vweird.f32 %v4078_v55 }
 0xb05   :  { %v4042_v28 = vsub.f32 1.0, %v4041_v15  ;;  %vm4066_vm10 = vmor %vm4064_vm8, %vm4065_vm6  ;;  %v4088_v25 = vand.u32 2147483647, %v4078_v55  ;;  %v4091_v4 = vor.u32 1.1754944e-38, %v4090_v24 }
 0xb06   :  { %v4061_v17 = vsub.f32 1.0, %v4060_v2  ;;  %v4151_v33 = vpop.f32.mrf.mxu0 }
 0xb07   :  { %v4043_v18 = vmul.f32 %v4545_v6, %v4042_v28  ;;  %v4152_v13 = vadd.f32 %v7221_v49, %v4151_v33  ;;  %vm4089_vm0 = vcmp.eq.f32.partialorder %v4088_v25, 8.507059e+37 }
 0xb08   :  { %v4062_v48 = vmul.f32 %v4547_v40, %v4061_v17 }
 0xb09   :  { %v4549_v63 = vpop.eup %4548  ;;  %v4044_v5 = vadd.f32 %v4545_v6, %v4043_v18  ;;  %4171 = vst [vmem:[#allocation14 + $0x10] sm:$0xff] %v4152_v13 }
 0xb0a   :  { %v4063_v47 = vadd.f32 %v4547_v40, %v4062_v48  ;;  %v4080_v19 = vmul.f32 %v4549_v63, %v4078_v55  ;;  %v4551_v56 = vpop.eup %4550  ;;  %vm4085_vm13 = vweird.f32 %v4549_v63 }
 0xb0b   :  { %v4048_v16 = vsel %vm4047_vm9, %v4545_v6, %v4044_v5  ;;  %vm4086_vm15 = vmor %vm4084_vm14, %vm4085_vm13 }
 0xb0c   :  { %v4053_v41 = vsel %vm4050_vm11, %v4052_v46, %v4048_v16  ;;  %v4067_v27 = vsel %vm4066_vm10, %v4547_v40, %v4063_v47  ;;  %v4081_v52 = vsub.f32 1.0, %v4080_v19 }
 0xb0d   :  { %v4072_v9 = vsel %vm4069_vm12, %v4071_v22, %v4067_v27  ;;  %v4095_v30 = vmul.f32 %v4551_v56, %v4053_v41 }
 0xb0e   :  { %v4094_v51 = vmul.f32 %v4072_v9, %v7205_v34  ;;  %v4154_v62 = vpop.f32.mrf.mxu0  ;;  %v4082_v7 = vmul.f32 %v4549_v63, %v4081_v52 }
 0xb0f   :  { %v4155_v45 = vadd.f32 %v7221_v49, %v4154_v62 }
 0xb10   :  { %v4096_v60 = vadd.f32 %v4095_v30, %v4094_v51  ;;  %v4083_v0 = vadd.f32 %v4549_v63, %v4082_v7 }
 0xb11   :  { %4172 = vst [vmem:[#allocation14 + $0x18] sm:$0xff] %v4155_v45 }
 0xb12   :  { %4552 = vtanh.f32 %v4096_v60  ;;  %v4087_v53 = vsel %vm4086_vm15, %v4549_v63, %v4083_v0 }
 0xb13   :  { %v4092_v3 = vsel %vm4089_vm0, %v4091_v4, %v4087_v53 }
 0xb16   :  { %v4157_v29 = vpop.f32.mrf.mxu0 }
 0xb17   :  { %v4158_v59 = vadd.f32 %v7221_v49, %v4157_v29 }
 0xb18   :  { %v4553_v34 = vpop.eup %4552 }
 0xb19   :  { %4173 = vst [vmem:[#allocation14 + $0x20] sm:$0xff] %v4158_v59  ;;  %v4098_v57 = vmul.f32 %v4553_v34, %v4092_v3 }
 0xb1b   :  { %4165 = vmatmul.f32.gmra.mxu0 %v4098_v57 }
 0xb1e   :  { %v4160_v32 = vpop.f32.mrf.mxu0 }
 0xb1f   :  { %v4161_v21 = vadd.f32 %v7221_v49, %v4160_v32 }
 0xb21   :  { %4174 = vst [vmem:[#allocation14 + $0x28] sm:$0xff] %v4161_v21 }
 0xb26   :  { %v4163_v11 = vpop.f32.mrf.mxu0 }
 0xb27   :  { %v4164_v20 = vadd.f32 %v7221_v49, %v4163_v11 }
 0xb29   :  { %4175 = vst [vmem:[#allocation14 + $0x30] sm:$0xff] %v4164_v20 }
 0xb98   :  { %v4166_v1 = vpop.f32.mrf.mxu0 }
 0xb99   :  { %v4167_v26 = vadd.f32 %v7221_v49, %v4166_v1 }
 0xb9b   :  { %4176 = vst [vmem:[#allocation14 + $0x38] sm:$0xff] %v4167_v26 }
 0xb9c   :  { %4189 = dma.vmem_to_hbm [thread:$0]  %s4182_s29, 1024, %s4184_s1, [#allocation7], %s4713_s12, %s4713_s12, %s4714_s13  }
 0xb9d   :  { %4704 = dma.done.wait [#allocation7], 1024  }
 0xb9e   :  { %4705 = vsyncadd [#allocation7], 4294966272 }
 0xb9f   :  { %4194 = vsyncpa [#allocation6], 1 }
 0xba0   :  { %4195 = vsyncpa [#allocation9], 1 }
 0xba1   :  { %4196 = vsyncpa [#allocation12], 1 }
 0xba2   :  { %4197 = vsyncpa [#allocation7], 1 }

</bundles_post_ra>
